<compile_context>
chip_gen: v6e
topology: v6e:2x2x1
jax: 0.10.0
libtpu: 0.0.40
codegen_flags: <defaults>
</compile_context>

<pallas_src>
import functools

import jax
import jax.numpy as jnp
from jax.experimental import pallas as pl
from jax.experimental.pallas import tpu as pltpu

NUM_HIDDEN = 64


def _round_up(x, m):
    return ((x + m - 1) // m) * m


# ----------------------------- Pallas kernels ------------------------------ #

def conv_relu_kernel(patches_ref, wc_ref, bc_ref, out_ref):
    # patches_ref: (1, P_pad//2, 8*C) bf16  -- two spatial positions per row
    # wc_ref:      (8*C, 128)       bf16   -- block-diag [[wc, 0], [0, wc]]
    # bc_ref:      (1, 128)         f32    -- conv bias repeated twice
    # out_ref:     (1, P_pad//2, 128) bf16 -- lane-dense, flatten-ready (p, c)
    acc = jnp.dot(patches_ref[0], wc_ref[...], preferred_element_type=jnp.float32)
    out_ref[0] = jnp.maximum(acc + bc_ref[...], 0.0).astype(out_ref.dtype)


def mlp_head_kernel(x_ref, w1_ref, b1_ref, w2_ref, b2_ref, wh_ref, bh_ref,
                    probs_ref, value_ref):
    # x_ref:  (B, F_pad) bf16       w1_ref: (F_pad, 64) bf16
    # wh_ref: (64, A+1)  f32        -- [w41.T / T | w42.T], temperature folded in
    num_actions = probs_ref.shape[1]

    h1 = jnp.dot(x_ref[...], w1_ref[...], preferred_element_type=jnp.float32)
    h1 = jnp.maximum(h1 + b1_ref[...], 0.0)                           # (B, 64)
    h2 = jnp.dot(h1, w2_ref[...], preferred_element_type=jnp.float32)
    h2 = jnp.maximum(h2 + b2_ref[...], 0.0)                           # (B, 64)

    head = jnp.dot(h2, wh_ref[...], preferred_element_type=jnp.float32)
    head = head + bh_ref[...]                                         # (B, A+1)

    logits = head[:, :num_actions]
    m = jnp.max(logits, axis=-1, keepdims=True)
    e = jnp.exp(logits - m)
    probs_ref[...] = e / jnp.sum(e, axis=-1, keepdims=True)           # exact
    value_ref[...] = head[:, num_actions:num_actions + 1]             # (B, 1)


# --------------------------- one-time weight prep --------------------------- #

def prepare_params(params, temperature=1.0):
    """One-time re-layout of PyTorch-style params into kernel-friendly form."""
    O = NUM_HIDDEN
    inv_t = 1.0 / float(temperature)

    conv_w = params["conv_w"].astype(jnp.float32)             # (64, C, 2, 2)
    C = conv_w.shape[1]
    # rows ordered (di, dj, c_in) to match the im2col patch column order
    wc = jnp.transpose(conv_w, (2, 3, 1, 0)).reshape(4 * C, O)
    # block-diagonal version: two spatial positions per matmul row so kernel 1's
    # output is 128 lanes wide (unmasked stores) and flatten-ready.
    wc2 = jnp.zeros((8 * C, 2 * O), jnp.float32)
    wc2 = wc2.at[:4 * C, :O].set(wc).at[4 * C:, O:].set(wc)
    bc = params["conv_b"].astype(jnp.float32)
    bc2 = jnp.concatenate([bc, bc]).reshape(1, 2 * O)

    l1_w = params["l1_w"].astype(jnp.float32)                 # (64, F_in), cols (c, p)
    F_in = l1_w.shape[1]
    P = F_in // O
    P_pad = _round_up(P, 16)
    # rows re-ordered to (p, c) = the flatten order kernel 1 produces; zero-pad
    w1 = jnp.transpose(l1_w.reshape(O, O, P), (2, 1, 0)).reshape(F_in, O)
    w1 = jnp.pad(w1, ((0, (P_pad - P) * O), (0, 0))).astype(jnp.bfloat16)

    A = params["l41_w"].shape[0]
    # actor head pre-scaled by 1/temperature; actor & critic heads concatenated
    w_head = jnp.concatenate(
        [params["l41_w"].T.astype(jnp.float32) * inv_t,
         params["l42_w"].T.astype(jnp.float32)], axis=1)      # (64, A+1)
    b_head = jnp.concatenate(
        [params["l41_b"].astype(jnp.float32) * inv_t,
         params["l42_b"].astype(jnp.float32)]).reshape(1, A + 1)

    return {
        "wc2": wc2.astype(jnp.bfloat16), "bc2": bc2,
        "w1": w1,
        "b1": params["l1_b"].reshape(1, O).astype(jnp.float32),
        "w2": params["l2_w"].T.astype(jnp.float32),
        "b2": params["l2_b"].reshape(1, O).astype(jnp.float32),
        "w_head": w_head, "b_head": b_head,
    }


# ------------------------------- forward ----------------------------------- #

@jax.jit
def default_model_forward(x_nchw, kp):
    B, C, H, W = x_nchw.shape
    h, w = H - 1, W - 1            # conv2d_size_out with kernel=2, stride=1
    P = h * w
    O = NUM_HIDDEN
    P_pad = kp["w1"].shape[0] // O
    P_half = P_pad // 2
    F_pad = P_pad * O
    A = kp["w_head"].shape[1] - 1

    # im2col glue (a single small XLA fusion on a ~29 KB tensor): patch columns
    # ordered (di, dj, c_in), rows (p); zero-padded to P_pad and paired so each
    # row of `patches2` holds two consecutive spatial positions.
    x_nhwc = jnp.transpose(x_nchw, (0, 2, 3, 1)).astype(jnp.bfloat16)
    patches = jnp.concatenate(
        [x_nhwc[:, 0:h, 0:w, :], x_nhwc[:, 0:h, 1:, :],
         x_nhwc[:, 1:, 0:w, :], x_nhwc[:, 1:, 1:, :]],
        axis=-1).reshape(B, P, 4 * C)
    patches = jnp.pad(patches, ((0, 0), (0, P_pad - P), (0, 0)))
    patches2 = patches.reshape(B, P_half, 8 * C)

    # Kernel 1: conv(2x2, stride 1) + bias + ReLU, lane-dense bf16 output.
    conv_out = pl.pallas_call(
        conv_relu_kernel,
        out_shape=jax.ShapeDtypeStruct((B, P_half, 2 * O), jnp.bfloat16),
        grid=(B,),
        in_specs=[pl.BlockSpec((1, P_half, 8 * C), lambda b: (b, 0, 0)),
                  pl.BlockSpec((8 * C, 2 * O), lambda b: (0, 0)),
                  pl.BlockSpec((1, 2 * O), lambda b: (0, 0))],
        out_specs=pl.BlockSpec((1, P_half, 2 * O), lambda b: (b, 0, 0)),
        compiler_params=pltpu.CompilerParams(dimension_semantics=("parallel",)),
    )(patches2, kp["wc2"], kp["bc2"])

    # Free row-major reshape: columns already ordered (p, c), matching w1 rows.
    flat = conv_out.reshape(B, F_pad)

    # Kernel 2: fused linear1 + linear2 + (actor || critic) head + softmax,
    # single grid step (w1 is only ~1.8 MB bf16; chunking hid nothing at B=2).
    probs, value = pl.pallas_call(
        mlp_head_kernel,
        out_shape=(jax.ShapeDtypeStruct((B, A), jnp.float32),
                   jax.ShapeDtypeStruct((B, 1), jnp.float32)),
        grid=(1,),
        in_specs=[pl.BlockSpec((B, F_pad), lambda i: (0, 0)),
                  pl.BlockSpec((F_pad, O), lambda i: (0, 0)),
                  pl.BlockSpec((1, O), lambda i: (0, 0)),
                  pl.BlockSpec((O, O), lambda i: (0, 0)),
                  pl.BlockSpec((1, O), lambda i: (0, 0)),
                  pl.BlockSpec((O, A + 1), lambda i: (0, 0)),
                  pl.BlockSpec((1, A + 1), lambda i: (0, 0))],
        out_specs=(pl.BlockSpec((B, A), lambda i: (0, 0)),
                   pl.BlockSpec((B, 1), lambda i: (0, 0))),
        compiler_params=pltpu.CompilerParams(dimension_semantics=("arbitrary",)),
    )(flat, kp["w1"], kp["b1"], kp["w2"], kp["b2"], kp["w_head"], kp["b_head"])
    return probs, value


# --------------------------- deterministic init ----------------------------- #

def lecun_normal(key, shape, fan_in, gain=1.0):
    return (gain / jnp.sqrt(float(fan_in))) * jax.random.normal(
        key, shape, dtype=jnp.float32)


def init_params(key, obs_space, act_space):
    C, H, W = obs_space
    h, w = H - 1, W - 1
    F_in = NUM_HIDDEN * h * w
    ks = jax.random.split(key, 5)
    return {
        "conv_w": lecun_normal(ks[0], (NUM_HIDDEN, C, 2, 2), C * 2 * 2),
        "conv_b": jnp.zeros((NUM_HIDDEN,), jnp.float32),
        "l1_w": lecun_normal(ks[1], (NUM_HIDDEN, F_in), F_in),
        "l1_b": jnp.zeros((NUM_HIDDEN,), jnp.float32),
        "l2_w": lecun_normal(ks[2], (NUM_HIDDEN, NUM_HIDDEN), NUM_HIDDEN),
        "l2_b": jnp.zeros((NUM_HIDDEN,), jnp.float32),
        "l41_w": lecun_normal(ks[3], (act_space, NUM_HIDDEN), NUM_HIDDEN, gain=0.01),
        "l41_b": jnp.zeros((act_space,), jnp.float32),
        "l42_w": lecun_normal(ks[4], (1, NUM_HIDDEN), NUM_HIDDEN),
        "l42_b": jnp.zeros((1,), jnp.float32),
    }


# -------------------------- pure-JAX reference ------------------------------ #

def reference_forward(x_nchw, params, temperature=1.0):
    B = x_nchw.shape[0]
    conv = jax.lax.conv_general_dilated(
        x_nchw, params["conv_w"], window_strides=(1, 1), padding="VALID",
        dimension_numbers=("NCHW", "OIHW", "NCHW"))
    conv = jnp.maximum(conv + params["conv_b"][None, :, None, None], 0.0)
    flat = conv.reshape(B, -1)
    h1 = jnp.maximum(flat @ params["l1_w"].T + params["l1_b"], 0.0)
    h2 = jnp.maximum(h1 @ params["l2_w"].T + params["l2_b"], 0.0)
    logits = (h2 @ params["l41_w"].T + params["l41_b"]) / temperature
    probs = jax.nn.softmax(logits, axis=-1)
    value = h2 @ params["l42_w"].T + params["l42_b"]
    return probs, value


# --------------------------------- main ------------------------------------- #

if __name__ == "__main__":
    obs_space = (4, 16, 16)     # (C, H, W)
    act_space = 6
    batch = 2
    temperature = 1.0

    key = jax.random.PRNGKey(0)
    k_params, k_x = jax.random.split(key)
    params = init_params(k_params, obs_space, act_space)
    kparams = prepare_params(params, temperature=temperature)   # one-time re-layout
    x = jax.random.normal(k_x, (batch,) + obs_space, dtype=jnp.float32)

    probs, value = default_model_forward(x, kparams)
    jax.block_until_ready((probs, value))

    ref_probs, ref_value = reference_forward(x, params, temperature)
    assert probs.shape == (batch, act_space) and value.shape == (batch, 1)
    # bf16 inputs / conv activations / w1 (with f32 MXU accumulation) give
    # ~1e-3..1e-2 relative error vs the pure-f32 reference.
    assert jnp.allclose(probs, ref_probs, atol=1e-2, rtol=1e-2)
    assert jnp.allclose(value, ref_value, atol=2e-2, rtol=2e-2)
    assert jnp.allclose(jnp.sum(probs, axis=-1), 1.0, atol=1e-3)

    print("KERNEL_OK")
</pallas_src>

<mosaic_0001>
module attributes {stable_mosaic.version = 11 : i64} {
  func.func @conv_relu_kernel(%arg0: i32, %arg1: memref<1x120x32xbf16, #tpu.memory_space<vmem>>, %arg2: memref<32x128xbf16, #tpu.memory_space<vmem>>, %arg3: memref<1x128xf32, #tpu.memory_space<vmem>>, %arg4: memref<1x120x128xbf16, #tpu.memory_space<vmem>>) attributes {dimension_semantics = [#tpu.dimension_semantics<parallel>], iteration_bounds = array<i64: 2>, scalar_prefetch = 0 : i64, scratch_operands = 0 : i64, tpu.core_type = #tpu.core_type<tc>, window_params = [{transform_indices = @transform_0, window_bounds = array<i64: 1, 120, 32>}, {pipeline_mode = #tpu.pipeline_mode<synchronous>, transform_indices = @transform_1, window_bounds = array<i64: 32, 128>}, {pipeline_mode = #tpu.pipeline_mode<synchronous>, transform_indices = @transform_2, window_bounds = array<i64: 1, 128>}, {transform_indices = @transform_3, window_bounds = array<i64: 1, 120, 128>}]} {
    %c0 = arith.constant 0 : index
    %c0_0 = arith.constant 0 : index
    %c0_1 = arith.constant 0 : index
    %0 = vector.load %arg1[%c0, %c0_0, %c0_1] : memref<1x120x32xbf16, #tpu.memory_space<vmem>>, vector<1x120x32xbf16>
    %1 = vector.shape_cast %0 : vector<1x120x32xbf16> to vector<120x32xbf16>
    %c0_2 = arith.constant 0 : index
    %c0_3 = arith.constant 0 : index
    %2 = vector.load %arg2[%c0_2, %c0_3] : memref<32x128xbf16, #tpu.memory_space<vmem>>, vector<32x128xbf16>
    %cst = arith.constant dense<0.000000e+00> : vector<120x128xf32>
    %3 = tpu.matmul %1, %2, %cst {dimension_numbers = #tpu.dot_dimension_numbers<[1], [0], [0], [1], [0, 0, 1, 1], [], []>} : vector<120x32xbf16>, vector<32x128xbf16>, vector<120x128xf32> -> vector<120x128xf32>
    %c0_4 = arith.constant 0 : index
    %c0_5 = arith.constant 0 : index
    %4 = vector.load %arg3[%c0_4, %c0_5] : memref<1x128xf32, #tpu.memory_space<vmem>>, vector<1x128xf32>
    %5 = vector.broadcast %4 : vector<1x128xf32> to vector<120x128xf32>
    %6 = arith.addf %3, %5 : vector<120x128xf32>
    %cst_6 = arith.constant 0.000000e+00 : f32
    %7 = vector.broadcast %cst_6 : f32 to vector<120x128xf32>
    %8 = arith.maximumf %6, %7 : vector<120x128xf32>
    %9 = arith.truncf %8 : vector<120x128xf32> to vector<120x128xbf16>
    %c0_7 = arith.constant 0 : index
    %c0_8 = arith.constant 0 : index
    %c0_9 = arith.constant 0 : index
    %10 = vector.load %arg4[%c0_7, %c0_8, %c0_9] : memref<1x120x128xbf16, #tpu.memory_space<vmem>>, vector<1x120x128xbf16>
    %11 = vector.shape_cast %10 : vector<1x120x128xbf16> to vector<120x128xbf16>
    %12 = vector.shape_cast %9 : vector<120x128xbf16> to vector<1x120x128xbf16>
    tpu.vector_store %arg4[%c0_7, %c0_8, %c0_9], %12 {strides = array<i32>} : memref<1x120x128xbf16, #tpu.memory_space<vmem>>, vector<1x120x128xbf16>,
    return
  }
  func.func @transform_0(%arg0: i32) -> (i32, i32, i32) {
    %c0_i32 = arith.constant 0 : i32
    %c0_i32_0 = arith.constant 0 : i32
    %c0_i32_1 = arith.constant 0 : i32
    return %arg0, %c0_i32, %c0_i32_0 : i32, i32, i32
  }
  func.func @transform_1(%arg0: i32) -> (i32, i32) {
    %c0_i32 = arith.constant 0 : i32
    %c0_i32_0 = arith.constant 0 : i32
    %c0_i32_1 = arith.constant 0 : i32
    return %c0_i32, %c0_i32_0 : i32, i32
  }
  func.func @transform_2(%arg0: i32) -> (i32, i32) {
    %c0_i32 = arith.constant 0 : i32
    %c0_i32_0 = arith.constant 0 : i32
    %c0_i32_1 = arith.constant 0 : i32
    return %c0_i32, %c0_i32_0 : i32, i32
  }
  func.func @transform_3(%arg0: i32) -> (i32, i32, i32) {
    %c0_i32 = arith.constant 0 : i32
    %c0_i32_0 = arith.constant 0 : i32
    %c0_i32_1 = arith.constant 0 : i32
    return %arg0, %c0_i32, %c0_i32_0 : i32, i32, i32
  }
}

module attributes {stable_mosaic.version = 11 : i64} {
  func.func @mlp_head_kernel(%arg0: i32, %arg1: memref<2x15360xbf16, #tpu.memory_space<vmem>>, %arg2: memref<15360x64xbf16, #tpu.memory_space<vmem>>, %arg3: memref<1x64xf32, #tpu.memory_space<vmem>>, %arg4: memref<64x64xf32, #tpu.memory_space<vmem>>, %arg5: memref<1x64xf32, #tpu.memory_space<vmem>>, %arg6: memref<64x7xf32, #tpu.memory_space<vmem>>, %arg7: memref<1x7xf32, #tpu.memory_space<vmem>>, %arg8: memref<2x6xf32, #tpu.memory_space<vmem>>, %arg9: memref<2x1xf32, #tpu.memory_space<vmem>>) attributes {dimension_semantics = [#tpu.dimension_semantics<arbitrary>], iteration_bounds = array<i64: 1>, scalar_prefetch = 0 : i64, scratch_operands = 0 : i64, tpu.core_type = #tpu.core_type<tc>, window_params = [{pipeline_mode = #tpu.pipeline_mode<synchronous>, transform_indices = @transform_0, window_bounds = array<i64: 2, 15360>}, {pipeline_mode = #tpu.pipeline_mode<synchronous>, transform_indices = @transform_1, window_bounds = array<i64: 15360, 64>}, {pipeline_mode = #tpu.pipeline_mode<synchronous>, transform_indices = @transform_2, window_bounds = array<i64: 1, 64>}, {pipeline_mode = #tpu.pipeline_mode<synchronous>, transform_indices = @transform_3, window_bounds = array<i64: 64, 64>}, {pipeline_mode = #tpu.pipeline_mode<synchronous>, transform_indices = @transform_4, window_bounds = array<i64: 1, 64>}, {pipeline_mode = #tpu.pipeline_mode<synchronous>, transform_indices = @transform_5, window_bounds = array<i64: 64, 7>}, {pipeline_mode = #tpu.pipeline_mode<synchronous>, transform_indices = @transform_6, window_bounds = array<i64: 1, 7>}, {pipeline_mode = #tpu.pipeline_mode<synchronous>, transform_indices = @transform_7, window_bounds = array<i64: 2, 6>}, {pipeline_mode = #tpu.pipeline_mode<synchronous>, transform_indices = @transform_8, window_bounds = array<i64: 2, 1>}]} {
    %c0 = arith.constant 0 : index
    %c0_0 = arith.constant 0 : index
    %0 = vector.load %arg1[%c0, %c0_0] : memref<2x15360xbf16, #tpu.memory_space<vmem>>, vector<2x15360xbf16>
    %c0_1 = arith.constant 0 : index
    %c0_2 = arith.constant 0 : index
    %1 = vector.load %arg2[%c0_1, %c0_2] : memref<15360x64xbf16, #tpu.memory_space<vmem>>, vector<15360x64xbf16>
    %cst = arith.constant dense<0.000000e+00> : vector<2x64xf32>
    %2 = tpu.matmul %0, %1, %cst {dimension_numbers = #tpu.dot_dimension_numbers<[1], [0], [0], [1], [0, 0, 1, 1], [], []>} : vector<2x15360xbf16>, vector<15360x64xbf16>, vector<2x64xf32> -> vector<2x64xf32>
    %c0_3 = arith.constant 0 : index
    %c0_4 = arith.constant 0 : index
    %3 = vector.load %arg3[%c0_3, %c0_4] : memref<1x64xf32, #tpu.memory_space<vmem>>, vector<1x64xf32>
    %4 = vector.broadcast %3 : vector<1x64xf32> to vector<2x64xf32>
    %5 = arith.addf %2, %4 : vector<2x64xf32>
    %cst_5 = arith.constant 0.000000e+00 : f32
    %6 = vector.broadcast %cst_5 : f32 to vector<2x64xf32>
    %7 = arith.maximumf %5, %6 : vector<2x64xf32>
    %c0_6 = arith.constant 0 : index
    %c0_7 = arith.constant 0 : index
    %8 = vector.load %arg4[%c0_6, %c0_7] : memref<64x64xf32, #tpu.memory_space<vmem>>, vector<64x64xf32>
    %cst_8 = arith.constant dense<0.000000e+00> : vector<2x64xf32>
    %9 = tpu.matmul %7, %8, %cst_8 {dimension_numbers = #tpu.dot_dimension_numbers<[1], [0], [0], [1], [0, 0, 1, 1], [], []>} : vector<2x64xf32>, vector<64x64xf32>, vector<2x64xf32> -> vector<2x64xf32>
    %c0_9 = arith.constant 0 : index
    %c0_10 = arith.constant 0 : index
    %10 = vector.load %arg5[%c0_9, %c0_10] : memref<1x64xf32, #tpu.memory_space<vmem>>, vector<1x64xf32>
    %11 = vector.broadcast %10 : vector<1x64xf32> to vector<2x64xf32>
    %12 = arith.addf %9, %11 : vector<2x64xf32>
    %cst_11 = arith.constant 0.000000e+00 : f32
    %13 = vector.broadcast %cst_11 : f32 to vector<2x64xf32>
    %14 = arith.maximumf %12, %13 : vector<2x64xf32>
    %c0_12 = arith.constant 0 : index
    %c0_13 = arith.constant 0 : index
    %15 = vector.load %arg6[%c0_12, %c0_13] : memref<64x7xf32, #tpu.memory_space<vmem>>, vector<64x7xf32>
    %cst_14 = arith.constant dense<0.000000e+00> : vector<2x7xf32>
    %16 = tpu.matmul %14, %15, %cst_14 {dimension_numbers = #tpu.dot_dimension_numbers<[1], [0], [0], [1], [0, 0, 1, 1], [], []>} : vector<2x64xf32>, vector<64x7xf32>, vector<2x7xf32> -> vector<2x7xf32>
    %c0_15 = arith.constant 0 : index
    %c0_16 = arith.constant 0 : index
    %17 = vector.load %arg7[%c0_15, %c0_16] : memref<1x7xf32, #tpu.memory_space<vmem>>, vector<1x7xf32>
    %18 = vector.broadcast %17 : vector<1x7xf32> to vector<2x7xf32>
    %19 = arith.addf %16, %18 : vector<2x7xf32>
    %20 = vector.extract_strided_slice %19 {offsets = [0, 0], sizes = [2, 6], strides = [1, 1]} : vector<2x7xf32> to vector<2x6xf32>
    %cst_17 = arith.constant dense<0xFF800000> : vector<2xf32>
    %21 = vector.multi_reduction <maximumf>, %20, %cst_17 [1] : vector<2x6xf32> to vector<2xf32>
    %22 = vector.shape_cast %21 : vector<2xf32> to vector<2x1xf32>
    %23 = vector.broadcast %22 : vector<2x1xf32> to vector<2x6xf32>
    %24 = arith.subf %20, %23 : vector<2x6xf32>
    %25 = math.exp %24 : vector<2x6xf32>
    %cst_18 = arith.constant dense<0.000000e+00> : vector<2xf32>
    %26 = vector.multi_reduction <add>, %25, %cst_18 [1] : vector<2x6xf32> to vector<2xf32>
    %27 = vector.shape_cast %26 : vector<2xf32> to vector<2x1xf32>
    %28 = vector.broadcast %27 : vector<2x1xf32> to vector<2x6xf32>
    %29 = arith.divf %25, %28 : vector<2x6xf32>
    %c0_19 = arith.constant 0 : index
    %c0_20 = arith.constant 0 : index
    %30 = vector.load %arg8[%c0_19, %c0_20] : memref<2x6xf32, #tpu.memory_space<vmem>>, vector<2x6xf32>
    tpu.vector_store %arg8[%c0_19, %c0_20], %29 {strides = array<i32>} : memref<2x6xf32, #tpu.memory_space<vmem>>, vector<2x6xf32>,
    %31 = vector.extract_strided_slice %19 {offsets = [0, 6], sizes = [2, 1], strides = [1, 1]} : vector<2x7xf32> to vector<2x1xf32>
    %c0_21 = arith.constant 0 : index
    %c0_22 = arith.constant 0 : index
    %32 = vector.load %arg9[%c0_21, %c0_22] : memref<2x1xf32, #tpu.memory_space<vmem>>, vector<2x1xf32>
    tpu.vector_store %arg9[%c0_21, %c0_22], %31 {strides = array<i32>} : memref<2x1xf32, #tpu.memory_space<vmem>>, vector<2x1xf32>,
    return
  }
  func.func @transform_0(%arg0: i32) -> (i32, i32) {
    %c0_i32 = arith.constant 0 : i32
    %c0_i32_0 = arith.constant 0 : i32
    %c0_i32_1 = arith.constant 0 : i32
    return %c0_i32, %c0_i32_0 : i32, i32
  }
  func.func @transform_1(%arg0: i32) -> (i32, i32) {
    %c0_i32 = arith.constant 0 : i32
    %c0_i32_0 = arith.constant 0 : i32
    %c0_i32_1 = arith.constant 0 : i32
    return %c0_i32, %c0_i32_0 : i32, i32
  }
  func.func @transform_2(%arg0: i32) -> (i32, i32) {
    %c0_i32 = arith.constant 0 : i32
    %c0_i32_0 = arith.constant 0 : i32
    %c0_i32_1 = arith.constant 0 : i32
    return %c0_i32, %c0_i32_0 : i32, i32
  }
  func.func @transform_3(%arg0: i32) -> (i32, i32) {
    %c0_i32 = arith.constant 0 : i32
    %c0_i32_0 = arith.constant 0 : i32
    %c0_i32_1 = arith.constant 0 : i32
    return %c0_i32, %c0_i32_0 : i32, i32
  }
  func.func @transform_4(%arg0: i32) -> (i32, i32) {
    %c0_i32 = arith.constant 0 : i32
    %c0_i32_0 = arith.constant 0 : i32
    %c0_i32_1 = arith.constant 0 : i32
    return %c0_i32, %c0_i32_0 : i32, i32
  }
  func.func @transform_5(%arg0: i32) -> (i32, i32) {
    %c0_i32 = arith.constant 0 : i32
    %c0_i32_0 = arith.constant 0 : i32
    %c0_i32_1 = arith.constant 0 : i32
    return %c0_i32, %c0_i32_0 : i32, i32
  }
  func.func @transform_6(%arg0: i32) -> (i32, i32) {
    %c0_i32 = arith.constant 0 : i32
    %c0_i32_0 = arith.constant 0 : i32
    %c0_i32_1 = arith.constant 0 : i32
    return %c0_i32, %c0_i32_0 : i32, i32
  }
  func.func @transform_7(%arg0: i32) -> (i32, i32) {
    %c0_i32 = arith.constant 0 : i32
    %c0_i32_0 = arith.constant 0 : i32
    %c0_i32_1 = arith.constant 0 : i32
    return %c0_i32, %c0_i32_0 : i32, i32
  }
  func.func @transform_8(%arg0: i32) -> (i32, i32) {
    %c0_i32 = arith.constant 0 : i32
    %c0_i32_0 = arith.constant 0 : i32
    %c0_i32_1 = arith.constant 0 : i32
    return %c0_i32, %c0_i32_0 : i32, i32
  }
}

</mosaic_0001>

<bundles_post_ra>
// kernel: default_model_forward.2
= control target key start
LH: loop header
LB: loop body
LE: loop exit
PB: predicated region body
PF: predicated region fallthrough
CT: control target
= control target key end

     0   :  { %8 = vsyncpa [#allocation3], 0  ;;  %s923_s0 = inlined_call_operand.vmem [shape: bf16[2,120,32], index: 0, kind: input, shape index: {}]   ;;  %s924_s1 = inlined_call_operand.hbm [shape: bf16[32,128], index: 1, kind: input, shape index: {}]   ;;  %s925_s2 = inlined_call_operand.hbm [shape: f32[1,128], index: 2, kind: input, shape index: {}]   ;;  %s926_s3 = inlined_call_operand.vmem [shape: bf16[2,120,128], index: 3, kind: output, shape index: {}]  }
   0x1   :  { %9 = vsyncpa [#allocation5], 0  ;;  %s836_s12 = smov 0  }
   0x2 LB: > { %s842_s13 = sadd.s32 4294967295, %s810_s12   ;;  %p567_p0 = scmp.ge.s32.totalorder %s810_s12, 1  ;;  %s810_s12 = sphi %s836_s12, %s15_s12  }
   0x3   : > { %p114_p1 = scmp.lt.s32.totalorder %s810_s12, 3  ;;  %s812_s14 = smov [#allocation2]  }
   0x4   : > { %s126_s15 = sshll.u32 %s812_s14, 4  ;;  %p718_p3 = scmp.eq.s32.totalorder %s842_s13, 0  ;;  %s127_s15 = int_to_ptr.vmem [resolvable:$true] %s126_s15 }
   0x5   : > { %p846_p2 = pnand %p567_p0, %p114_p1  ;;  %s813_s17 = smov [#allocation4]  }
   0x6   : > { %s140_s18 = sshll.u32 %s813_s17, 4  ;;  %s755_s20 = scalar_lea.vmem %s127_s15, 256  ;;  %s141_s18 = int_to_ptr.vmem [resolvable:$true] %s140_s18 }
   0x7   : > { %p711_p4 = pneg %p846_p2  ;;  %p756_p7 = scmp.ne.s32.totalorder %s127_s15, %s755_s20 }
   0x8   : > { %p763_p10 = scmp.lt.s32.totalorder %s127_s15, %s127_s15  ;;  %p764_p11 = scmp.lt.s32.totalorder %s755_s20, %s755_s20 }
   0x9   : > { %p855_p5 = pnand %p718_p3, %p711_p4 }
   0xa   : > { %p765_p12 = por %p764_p11, %p763_p10 }
   0xb   : > { %p746_p6 = pneg %p855_p5 }
   0xd   : > { %p758_p8 = pnand %p756_p7, %p746_p6 }
   0xf   : > { %p759_p9 = pneg %p758_p8 }
  0x11   : > { %p766_p13 = pnand %p765_p12, %p759_p9 }
  0x13   : > { %769 = shalt.err (!%p766_p13)
}
  0x14   : > { %s814_s21 = smov 64   ;;  %s815_s22 = smov 4  }
  0x15   : > { %714 = dma.hbm_to_vmem [thread:$0]  (!%p855_p5), %s924_s1, 256, %s127_s15, [#allocation3], %s814_s21, %s814_s21, %s815_s22  }
  0x16   : > { %s781_s25 = scalar_lea.vmem %s141_s18, 16  ;;  %s788_s26 = scalar_lea.vmem %s141_s18, 32 }
  0x17   : > { %p782_p0 = scmp.ne.s32.totalorder %s141_s18, %s781_s25  ;;  %p789_p7 = scmp.lt.s32.totalorder %s141_s18, %s141_s18 }
  0x18   : > { %p790_p8 = scmp.lt.s32.totalorder %s788_s26, %s781_s25 }
  0x19   : > { %p784_p1 = pnand %p782_p0, %p746_p6 }
  0x1a   : > { %p791_p9 = por %p790_p8, %p789_p7 }
  0x1b   : > { %p785_p4 = pneg %p784_p1 }
  0x1d   : > { %p792_p10 = pnand %p791_p9, %p785_p4 }
  0x1f   : > { %795 = shalt.err (!%p792_p10)
}
  0x20   : > { %717 = dma.hbm_to_vmem [thread:$0]  (!%p855_p5), %s925_s2, 16, %s141_s18, [#allocation5]  }
  0x21   : > { %161 = sbr.rel (%p846_p2) target bundleno = 264 (0x108), region = 32 }
  0x26   : > { %801 = dma.done.wait (%p718_p3), [#allocation3], 256  }
  0x27   : > { %803 = vsyncadd (%p718_p3), [#allocation3], 4294967040 }
  0x28   : > { %805 = dma.done.wait (%p718_p3), [#allocation5], 16  }
  0x29   : > { %807 = vsyncadd (%p718_p3), [#allocation5], 4294967280  ;;  %p189_p6 = scmp.lt.s32.totalorder %s842_s13, 1  ;;  %v734_v0 = vld [vmem:[#allocation2 + $0x8] sm:$0xff]   ;;  %v735_v1 = vld [vmem:[#allocation2] sm:$0xff]   ;;  %vm276_vm0 = vcmask 261120  }
  0x2a   : > { %678 = vmatprep.subr.bf16.mxu0 %v734_v0  ;;  %698 = vmatprep.subr.bf16.mxu1 %v734_v0  ;;  %v576_v10 = vld [vmem:[#allocation4] ss:$0 sm:$0xff] }
  0x2b   : > { %s930_s13 = smov (!%p189_p6, %s842_s13), 1  ;;  %679 = vmatpush3.bf16.msra.mxu0 %v734_v0  ;;  %700 = vmatpush3.bf16.msra.mxu1 %v734_v0 }
  0x2c   : > { %s702_s29 = smul.u32 60, %s930_s13  ;;  %680 = vmatprep.subr.bf16.mxu0 %v735_v1  ;;  %699 = vmatprep.subr.bf16.mxu1 %v735_v1 }
  0x2e   : > { %s193_s5 = scalar_lea.vmem %s923_s0, %s702_s29  ;;  %s910_s8 = scalar_lea.vmem %s926_s3, %s702_s29 }
  0x2f   : > { %v736_v2 = vld [vmem:[%s193_s5] sm:$0xff]   ;;  %v738_v4 = vld [vmem:[%s193_s5 + $0x8] sm:$0xff]   ;;  %v740_v6 = vld [vmem:[%s193_s5 + $0x10] sm:$0xff]   ;;  %681 = vmatpush3.bf16.msra.mxu0 %v735_v1  ;;  %701 = vmatpush3.bf16.msra.mxu1 %v735_v1 }
  0x30   : > { %v737_v3 = vld [vmem:[%s193_s5 + $0x20] sm:$0xff]   ;;  %682 = vmatprep.mubr.msk.bf16.mxu0 %vm276_vm0, %v736_v2  ;;  %v739_v5 = vld [vmem:[%s193_s5 + $0x28] sm:$0xff]   ;;  %v741_v7 = vld [vmem:[%s193_s5 + $0x30] sm:$0xff]  }
  0x31   : > { %690 = vmatprep.mubr.msk.bf16.mxu1 %vm276_vm0, %v737_v3  ;;  %v742_v8 = vld [vmem:[%s193_s5 + $0x18] sm:$0xff]  }
  0x32   : > { %683 = vmatmul.mubr.msk.bf16.vlgmr.msra.gmra.mxu0 %vm276_vm0, %v738_v4  ;;  %691 = vmatmul.mubr.msk.bf16.vlgmr.msra.gmra.mxu1 %vm276_vm0, %v739_v5  ;;  %v743_v9 = vld [vmem:[%s193_s5 + $0x38] ss:$0 sps:$4 sm:$0xff]  }
  0x33   : > { %686 = vmatprep.mubr.msk.bf16.mxu0 %vm276_vm0, %v740_v6  ;;  %694 = vmatprep.mubr.msk.bf16.mxu1 %vm276_vm0, %v741_v7 }
  0x3a   : > { %687 = vmatmul.mubr.msk.bf16.gmra.mxu0 %vm276_vm0, %v742_v8  ;;  %695 = vmatmul.mubr.msk.bf16.gmra.mxu1 %vm276_vm0, %v743_v9 }
  0xf2   : > { %v684_v11 = vpop.f32.mrf.mxu0  ;;  %v692_v12 = vpop.f32.mrf.mxu1 }
  0xf3   : > { %v344_v13 = vadd.f32 %v684_v11, %v576_v10  ;;  %v376_v14 = vadd.f32 %v692_v12, %v576_v10 }
  0xf4   : > { %v335_v15 = vpop.f32.mrf.mxu0  ;;  %v367_v16 = vpop.f32.mrf.mxu1 }
  0xf5   : > { %v336_v17 = vadd.f32 %v576_v10, %v335_v15  ;;  %v368_v18 = vadd.f32 %v576_v10, %v367_v16  ;;  %v399_v23 = vmax.f32 %v344_v13, 0.0  ;;  %v407_v24 = vmax.f32 %v376_v14, 0.0 }
  0xf6   : > { %v685_v19 = vpop.f32.mrf.mxu0  ;;  %v693_v20 = vpop.f32.mrf.mxu1 }
  0xf7   : > { %v347_v21 = vadd.f32 %v685_v19, %v576_v10  ;;  %v379_v22 = vadd.f32 %v693_v20, %v576_v10  ;;  %v397_v31 = vmax.f32 %v336_v17, 0.0  ;;  %v405_v32 = vmax.f32 %v368_v18, 0.0 }
  0xf8   : > { %v338_v25 = vpop.f32.mrf.mxu0  ;;  %v370_v26 = vpop.f32.mrf.mxu1 }
  0xf9   : > { %v400_v27 = vmax.f32 %v347_v21, 0.0  ;;  %v408_v28 = vmax.f32 %v379_v22, 0.0  ;;  %v339_v29 = vadd.f32 %v576_v10, %v338_v25  ;;  %v371_v30 = vadd.f32 %v576_v10, %v370_v26 }
  0xfa   : > { %v688_v33 = vpop.f32.mrf.mxu0  ;;  %v696_v34 = vpop.f32.mrf.mxu1 }
  0xfb   : > { %v635_v35 = vpack.c.bf16 %v400_v27, %v399_v23  ;;  %v655_v36 = vpack.c.bf16 %v408_v28, %v407_v24  ;;  %v398_v37 = vmax.f32 %v339_v29, 0.0  ;;  %v406_v38 = vmax.f32 %v371_v30, 0.0 }
  0xfc   : > { %v392_v39 = vadd.f32 %v696_v34, %v576_v10  ;;  %v351_v40 = vpop.f32.mrf.mxu0  ;;  %v383_v41 = vpop.f32.mrf.mxu1  ;;  %v360_v44 = vadd.f32 %v688_v33, %v576_v10 }
  0xfd   : > { %662 = vst [vmem:[%s910_s8 + $0x8] sm:$0xff] %v635_v35   ;;  %666 = vst [vmem:[%s910_s8 + $0x28] sm:$0xff] %v655_v36   ;;  %v630_v42 = vpack.c.bf16 %v398_v37, %v397_v31  ;;  %v650_v43 = vpack.c.bf16 %v406_v38, %v405_v32  ;;  %v352_v46 = vadd.f32 %v576_v10, %v351_v40 }
  0xfe   : > { %v411_v45 = vmax.f32 %v392_v39, 0.0  ;;  %v689_v47 = vpop.f32.mrf.mxu0  ;;  %v697_v48 = vpop.f32.mrf.mxu1  ;;  %v384_v49 = vadd.f32 %v576_v10, %v383_v41  ;;  %v403_v54 = vmax.f32 %v360_v44, 0.0 }
  0xff   : > { %631 = vst [vmem:[%s910_s8] sm:$0xff] %v630_v42   ;;  %665 = vst [vmem:[%s910_s8 + $0x20] sm:$0xff] %v650_v43   ;;  %v363_v50 = vadd.f32 %v689_v47, %v576_v10  ;;  %v401_v58 = vmax.f32 %v352_v46, 0.0 }
 0x100   : > { %v626_v51 = vpack.c.bf16 %v411_v45, %v411_v45  ;;  %v354_v52 = vpop.f32.mrf.mxu0  ;;  %v386_v53 = vpop.f32.mrf.mxu1  ;;  %v409_v59 = vmax.f32 %v384_v49, 0.0 }
 0x101   : > { %v404_v55 = vmax.f32 %v363_v50, 0.0  ;;  %v355_v56 = vadd.f32 %v576_v10, %v354_v52  ;;  %v387_v57 = vadd.f32 %v576_v10, %v386_v53 }
 0x102   : > { %487 = vst [vmem:[%s910_s8 + $0x38] sm:$0xf] %v626_v51 }
 0x103   : > { %v645_v60 = vpack.c.bf16 %v404_v55, %v403_v54  ;;  %v402_v61 = vmax.f32 %v355_v56, 0.0  ;;  %v410_v62 = vmax.f32 %v387_v57, 0.0 }
 0x105   : > { %664 = vst [vmem:[%s910_s8 + $0x18] sm:$0xff] %v645_v60   ;;  %v640_v63 = vpack.c.bf16 %v402_v61, %v401_v58  ;;  %v660_v0 = vpack.c.bf16 %v410_v62, %v409_v59 }
 0x107   : > { %663 = vst [vmem:[%s910_s8 + $0x10] sm:$0xff] %v640_v63   ;;  %667 = vst [vmem:[%s910_s8 + $0x30] sm:$0xff] %v660_v0  }
 0x108 PF: > { %s15_s12 = sadd.s32 1, %s810_s12  }
 0x109   : > { %p12_p2 = scmp.ge.s32.totalorder %s15_s12, 4  }
 0x10b   :  { %14 = sbr.rel (!%p12_p2) target bundleno = 2 (0x2), region = 71 }
 0x110   :  { %509 = vsyncpa [#allocation3], 1 }
 0x111   :  { %511 = vsyncpa [#allocation3 + $0x1], 1 }
 0x112   :  { %512 = vsyncpa [#allocation5], 1 }

// kernel: default_model_forward.3
= control target key start
LH: loop header
LB: loop body
LE: loop exit
PB: predicated region body
PF: predicated region fallthrough
CT: control target
= control target key end

     0   :  { %v1991_v28 = vlaneseq  ;;  %v14565_v36 = vmov 1966171168   ;;  %s17859_s0 = inlined_call_operand.vmem [shape: bf16[2,15360], index: 0, kind: input, shape index: {}]   ;;  %s17860_s1 = inlined_call_operand.vmem [shape: bf16[15360,64], index: 1, kind: input, shape index: {}]   ;;  %s17861_s2 = inlined_call_operand.vmem [shape: f32[1,64], index: 2, kind: input, shape index: {}]   ;;  %s17862_s3 = inlined_call_operand.vmem [shape: f32[64,64], index: 3, kind: input, shape index: {}]   ;;  %s17863_s4 = inlined_call_operand.vmem [shape: f32[1,64], index: 4, kind: input, shape index: {}]   ;;  %s17864_s5 = inlined_call_operand.vmem [shape: f32[64,7], index: 5, kind: input, shape index: {}]   ;;  %s17865_s6 = inlined_call_operand.vmem [shape: f32[1,7], index: 6, kind: input, shape index: {}]   ;;  %s17866_s7 = inlined_call_operand.hbm [shape: f32[2,6], index: 7, kind: output, shape index: {0}]   ;;  %s17867_s8 = inlined_call_operand.vmem [shape: f32[2,1], index: 8, kind: output, shape index: {1}]  }
   0x1   :  { %v13564_v0 = vld [vmem:[%s17860_s1 + $0x78] sm:$0xff]   ;;  %v13568_v4 = vld [vmem:[%s17860_s1 + $0x70] sm:$0xff]   ;;  %v13572_v8 = vld [vmem:[%s17860_s1 + $0x68] sm:$0xff]   ;;  %v1989_v37 = vunpack.c.l.s4 %v14565_v36 }
   0x2   :  { %v13565_v1 = vld [vmem:[%s17860_s1 + $0xf8] sm:$0xff]   ;;  %12183 = vmatprep.subr.bf16.mxu0 %v13564_v0  ;;  %v13569_v5 = vld [vmem:[%s17860_s1 + $0xf0] sm:$0xff]   ;;  %v13573_v9 = vld [vmem:[%s17860_s1 + $0xe8] sm:$0xff]   ;;  %v1992_v33 = vshrl.u32 %v1991_v28, 7 }
   0x3   :  { %v13566_v2 = vld [vmem:[%s17860_s1 + $0x38] sm:$0xff]   ;;  %12205 = vmatprep.subr.bf16.mxu1 %v13565_v1  ;;  %v13570_v6 = vld [vmem:[%s17860_s1 + $0x30] sm:$0xff]   ;;  %v13574_v10 = vld [vmem:[%s17860_s1 + $0x28] sm:$0xff]   ;;  %v1990_v40 = vunpack.c.0.s8 %v1989_v37 }
   0x4   :  { %v13567_v3 = vld [vmem:[%s17860_s1 + $0xb8] sm:$0xff]   ;;  %12184 = vmatpush3.bf16.msra.mxu0 %v13566_v2  ;;  %v13571_v7 = vld [vmem:[%s17860_s1 + $0xb0] sm:$0xff]   ;;  %v13575_v11 = vld [vmem:[%s17860_s1 + $0xa8] sm:$0xff]  }
   0x5   :  { %12206 = vmatpush3.bf16.msra.mxu1 %v13567_v3  ;;  %12185 = vmatprep.subr.bf16.mxu0 %v13568_v4  ;;  %v13576_v12 = vld [vmem:[%s17860_s1 + $0x60] sm:$0xff]   ;;  %v13580_v16 = vld [vmem:[%s17860_s1 + $0x58] sm:$0xff]   ;;  %v13584_v20 = vld [vmem:[%s17860_s1 + $0x50] sm:$0xff]   ;;  %v14720_v41 = vsub.s32 %v1990_v40, %v1992_v33 }
   0x6   :  { %12207 = vmatprep.subr.bf16.mxu1 %v13569_v5  ;;  %v13577_v13 = vld [vmem:[%s17860_s1 + $0xe0] sm:$0xff]   ;;  %v13581_v17 = vld [vmem:[%s17860_s1 + $0xd8] sm:$0xff]   ;;  %v13585_v21 = vld [vmem:[%s17860_s1 + $0xd0] sm:$0xff]  }
   0x7   :  { %v13578_v14 = vld [vmem:[%s17860_s1 + $0x20] sm:$0xff]   ;;  %v13582_v18 = vld [vmem:[%s17860_s1 + $0x18] sm:$0xff]   ;;  %v13586_v22 = vld [vmem:[%s17860_s1 + $0x10] sm:$0xff]  }
   0x8   :  { %12186 = vmatpush3.bf16.msra.mxu0 %v13570_v6  ;;  %v13579_v15 = vld [vmem:[%s17860_s1 + $0xa0] sm:$0xff]   ;;  %v13583_v19 = vld [vmem:[%s17860_s1 + $0x98] sm:$0xff]   ;;  %v13587_v23 = vld [vmem:[%s17860_s1 + $0x90] sm:$0xff]  }
   0x9   :  { %12208 = vmatpush3.bf16.msra.mxu1 %v13571_v7  ;;  %12187 = vmatprep.subr.bf16.mxu0 %v13572_v8  ;;  %v13588_v24 = vld [vmem:[%s17860_s1 + $0x48] sm:$0xff]   ;;  %v13592_v29 = vld [vmem:[%s17860_s1 + $0x40] sm:$0xff]   ;;  %v13597_v35 = vld [vmem:[%s17860_s1 + $0x178] sm:$0xff]  }
   0xa   :  { %12209 = vmatprep.subr.bf16.mxu1 %v13573_v9  ;;  %v13589_v25 = vld [vmem:[%s17860_s1 + $0xc8] sm:$0xff]   ;;  %v13593_v30 = vld [vmem:[%s17860_s1 + $0xc0] sm:$0xff]   ;;  %v13598_v38 = vld [vmem:[%s17860_s1 + $0x1f8] sm:$0xff]  }
   0xb   :  { %v13590_v26 = vld [vmem:[%s17860_s1 + $0x8] sm:$0xff]   ;;  %v13594_v31 = vld [vmem:[%s17860_s1] sm:$0xff]   ;;  %v13599_v47 = vld [vmem:[%s17860_s1 + $0x138] sm:$0xff]  }
   0xc   :  { %12188 = vmatpush3.bf16.msra.mxu0 %v13574_v10  ;;  %v13591_v27 = vld [vmem:[%s17860_s1 + $0x88] sm:$0xff]   ;;  %v13595_v32 = vld [vmem:[%s17860_s1 + $0x80] sm:$0xff]   ;;  %v13600_v49 = vld [vmem:[%s17860_s1 + $0x1b8] sm:$0xff]  }
   0xd   :  { %12210 = vmatpush3.bf16.msra.mxu1 %v13575_v11  ;;  %12189 = vmatprep.subr.bf16.mxu0 %v13576_v12  ;;  %v30_v34 = vld [vmem:[%s17859_s0] sm:$0xff]  ;;  %v13601_v52 = vld [vmem:[%s17860_s1 + $0x170] sm:$0xff]   ;;  %v13605_v58 = vld [vmem:[%s17860_s1 + $0x168] sm:$0xff]  }
   0xe   :  { %12211 = vmatprep.subr.bf16.mxu1 %v13577_v13  ;;  %v1987_v39 = vcombine.high %v30_v34, %v30_v34  ;;  %v1994_v42 = vrot.slane %v30_v34, %v14720_v41  ;;  %v13602_v54 = vld [vmem:[%s17860_s1 + $0x1f0] sm:$0xff]   ;;  %v13606_v59 = vld [vmem:[%s17860_s1 + $0x1e8] sm:$0xff]   ;;  %v13609_v62 = vld [vmem:[%s17860_s1 + $0x160] sm:$0xff]  }
   0xf   :  { %v13603_v55 = vld [vmem:[%s17860_s1 + $0x130] sm:$0xff]   ;;  %v13607_v60 = vld [vmem:[%s17860_s1 + $0x128] sm:$0xff]   ;;  %v13610_v63 = vld [vmem:[%s17860_s1 + $0x1e0] sm:$0xff]  }
  0x10   :  { %12190 = vmatpush3.bf16.msra.mxu0 %v13578_v14  ;;  %v14724_v43 = vrot.slane %v1987_v39, %v14720_v41  ;;  %v2002_v44 = vcombine.high %v1994_v42, %v1994_v42  ;;  %v2010_v45 = vrot.slane %v1994_v42, %v14720_v41  ;;  %v13604_v57 = vld [vmem:[%s17860_s1 + $0x1b0] sm:$0xff]   ;;  %v13608_v61 = vld [vmem:[%s17860_s1 + $0x1a8] sm:$0xff]   ;;  %v13611_v0 = vld [vmem:[%s17860_s1 + $0x120] sm:$0xff]  }
  0x11   :  { %12212 = vmatpush3.bf16.msra.mxu1 %v13579_v15  ;;  %12191 = vmatprep.subr.bf16.mxu0 %v13580_v16  ;;  %v13612_v1 = vld [vmem:[%s17860_s1 + $0x1a0] sm:$0xff]   ;;  %v13613_v2 = vld [vmem:[%s17860_s1 + $0x158] sm:$0xff]   ;;  %v13617_v6 = vld [vmem:[%s17860_s1 + $0x150] sm:$0xff]  }
  0x12   :  { %12213 = vmatprep.subr.bf16.mxu1 %v13581_v17  ;;  %v2003_v46 = vcombine.high %v14724_v43, %v14724_v43  ;;  %v2024_v48 = vrot.slane %v2002_v44, %v14720_v41  ;;  %v2032_v51 = vcombine.high %v2010_v45, %v2010_v45  ;;  %v13614_v3 = vld [vmem:[%s17860_s1 + $0x1d8] sm:$0xff]   ;;  %v13618_v7 = vld [vmem:[%s17860_s1 + $0x1d0] sm:$0xff]   ;;  %v13621_v10 = vld [vmem:[%s17860_s1 + $0x148] sm:$0xff]  }
  0x13   :  { %v13615_v4 = vld [vmem:[%s17860_s1 + $0x118] sm:$0xff]   ;;  %v13619_v8 = vld [vmem:[%s17860_s1 + $0x110] sm:$0xff]   ;;  %v13622_v11 = vld [vmem:[%s17860_s1 + $0x1c8] sm:$0xff]  }
  0x14   :  { %12192 = vmatpush3.bf16.msra.mxu0 %v13582_v18  ;;  %v2031_v50 = vrot.slane %v2003_v46, %v14720_v41  ;;  %8634 = vmatprep.mubr.bf16.mxu0 %v2024_v48  ;;  %v2034_v53 = vcombine.high %v2024_v48, %v2024_v48  ;;  %v13616_v5 = vld [vmem:[%s17860_s1 + $0x198] sm:$0xff]   ;;  %v13620_v9 = vld [vmem:[%s17860_s1 + $0x190] sm:$0xff]   ;;  %v13623_v12 = vld [vmem:[%s17860_s1 + $0x108] sm:$0xff]   ;;  %v2017_v18 = vrot.slane %v14724_v43, %v14720_v41 }
  0x15   :  { %12214 = vmatpush3.bf16.msra.mxu1 %v13583_v19  ;;  %12193 = vmatprep.subr.bf16.mxu0 %v13584_v20  ;;  %v13624_v13 = vld [vmem:[%s17860_s1 + $0x188] sm:$0xff]   ;;  %v13625_v14 = vld [vmem:[%s17860_s1 + $0x140] sm:$0xff]   ;;  %v13629_v19 = vld [vmem:[%s17860_s1 + $0x278] sm:$0xff]  }
  0x16   :  { %12215 = vmatprep.subr.bf16.mxu1 %v13585_v21  ;;  %v2035_v56 = vcombine.high %v2031_v50, %v2031_v50  ;;  %8674 = vmatprep.mubr.bf16.mxu1 %v2034_v53  ;;  %v13626_v15 = vld [vmem:[%s17860_s1 + $0x1c0] sm:$0xff]   ;;  %v13630_v20 = vld [vmem:[%s17860_s1 + $0x2f8] sm:$0xff]   ;;  %v13637_v28 = vld [vmem:[%s17860_s1 + $0x268] sm:$0xff]  }
  0x17   :  { %v13627_v16 = vld [vmem:[%s17860_s1 + $0x100] sm:$0xff]   ;;  %v13631_v21 = vld [vmem:[%s17860_s1 + $0x238] sm:$0xff]   ;;  %v13649_v40 = vld [vmem:[%s17860_s1 + $0x250] sm:$0xff]  }
  0x18   :  { %12194 = vmatpush3.bf16.msra.mxu0 %v13586_v22  ;;  %v13628_v17 = vld [vmem:[%s17860_s1 + $0x180] sm:$0xff]   ;;  %v13632_v22 = vld [vmem:[%s17860_s1 + $0x2b8] sm:$0xff]   ;;  %v13650_v42 = vld [vmem:[%s17860_s1 + $0x2d0] sm:$0xff]  }
  0x19   :  { %12216 = vmatpush3.bf16.msra.mxu1 %v13587_v23  ;;  %12195 = vmatprep.subr.bf16.mxu0 %v13588_v24  ;;  %v2033_v23 = vcombine.high %v2017_v18, %v2017_v18  ;;  %v13633_v24 = vld [vmem:[%s17860_s1 + $0x270] sm:$0xff]   ;;  %v13642_v33 = vld [vmem:[%s17860_s1 + $0x2e0] sm:$0xff]   ;;  %v13645_v36 = vld [vmem:[%s17860_s1 + $0x258] sm:$0xff]  }
  0x1a   :  { %12217 = vmatprep.subr.bf16.mxu1 %v13589_v25  ;;  %v13634_v25 = vld [vmem:[%s17860_s1 + $0x2f0] sm:$0xff]   ;;  %v13643_v34 = vld [vmem:[%s17860_s1 + $0x220] sm:$0xff]   ;;  %v13646_v37 = vld [vmem:[%s17860_s1 + $0x2d8] sm:$0xff]  }
  0x1b   :  { %v13648_v39 = vld [vmem:[%s17860_s1 + $0x298] sm:$0xff]   ;;  %v13651_v43 = vld [vmem:[%s17860_s1 + $0x210] sm:$0xff]   ;;  %v31_v46 = vld [vmem:[%s17859_s0 + $0x8] sm:$0xff] }
  0x1c   :  { %12196 = vmatpush3.bf16.msra.mxu0 %v13590_v26  ;;  %v13635_v26 = vld [vmem:[%s17860_s1 + $0x230] sm:$0xff]   ;;  %v2043_v48 = vrot.slane %v31_v46, %v14720_v41 }
  0x1d   :  { %12218 = vmatpush3.bf16.msra.mxu1 %v13591_v27  ;;  %12197 = vmatprep.subr.bf16.mxu0 %v13592_v29  ;;  %v13636_v27 = vld [vmem:[%s17860_s1 + $0x2b0] sm:$0xff]   ;;  %v13638_v29 = vld [vmem:[%s17860_s1 + $0x2e8] sm:$0xff]  }
  0x1e   :  { %12219 = vmatprep.subr.bf16.mxu1 %v13593_v30  ;;  %v13639_v30 = vld [vmem:[%s17860_s1 + $0x228] sm:$0xff]   ;;  %v13652_v44 = vld [vmem:[%s17860_s1 + $0x290] sm:$0xff]  }
  0x20   :  { %12198 = vmatpush3.bf16.msra.mxu0 %v13594_v31  ;;  %v13640_v31 = vld [vmem:[%s17860_s1 + $0x2a8] sm:$0xff]  }
  0x21   :  { %12220 = vmatpush3.bf16.msra.mxu1 %v13595_v32  ;;  %12227 = vmatprep.subr.bf16.mxu0 %v13597_v35  ;;  %v13641_v32 = vld [vmem:[%s17860_s1 + $0x260] sm:$0xff]  }
  0x22   :  { %12249 = vmatprep.subr.bf16.mxu1 %v13598_v38  ;;  %v13644_v35 = vld [vmem:[%s17860_s1 + $0x2a0] sm:$0xff]   ;;  %v13647_v38 = vld [vmem:[%s17860_s1 + $0x218] sm:$0xff]  }
  0x23   :  { %8635 = vmatmul.mubr.bf16.vlgmr.msra.gmra.mxu0 %v2010_v45  ;;  %v13653_v45 = vld [vmem:[%s17860_s1 + $0x248] sm:$0xff]  }
  0x24   :  { %12228 = vmatpush3.bf16.msra.mxu0 %v13599_v47  ;;  %8675 = vmatmul.mubr.bf16.vlgmr.msra.gmra.mxu1 %v2032_v51  ;;  %v13654_v47 = vld [vmem:[%s17860_s1 + $0x2c8] sm:$0xff]  }
  0x25   :  { %12229 = vmatprep.subr.bf16.mxu0 %v13601_v52  ;;  %12250 = vmatpush3.bf16.msra.mxu1 %v13600_v49  ;;  %v2036_v49 = vcombine.high %v31_v46, %v31_v46  ;;  %v13656_v51 = vld [vmem:[%s17860_s1 + $0x288] sm:$0xff]   ;;  %v2051_v52 = vcombine.high %v2043_v48, %v2043_v48 }
  0x26   :  { %8714 = vmatprep.mubr.bf16.mxu0 %v2031_v50  ;;  %12251 = vmatprep.subr.bf16.mxu1 %v13602_v54  ;;  %v13655_v50 = vld [vmem:[%s17860_s1 + $0x208] sm:$0xff]   ;;  %v13657_v54 = vld [vmem:[%s17860_s1 + $0x240] sm:$0xff]  }
  0x27   :  { %8754 = vmatprep.mubr.bf16.mxu1 %v2035_v56  ;;  %v14912_v53 = vrot.slane %v2036_v49, %v14720_v41  ;;  %v2073_v56 = vrot.slane %v2051_v52, %v14720_v41  ;;  %v13704_v46 = vld [vmem:[%s17860_s1 + $0x428] sm:$0xff]   ;;  %v13707_v49 = vld [vmem:[%s17860_s1 + $0x4e0] sm:$0xff]   ;;  %v13710_v52 = vld [vmem:[%s17860_s1 + $0x458] sm:$0xff]  }
  0x28   :  { %12230 = vmatpush3.bf16.msra.mxu0 %v13603_v55  ;;  %v13658_v55 = vld [vmem:[%s17860_s1 + $0x2c0] sm:$0xff]  }
  0x29   :  { %12231 = vmatprep.subr.bf16.mxu0 %v13605_v58  ;;  %12252 = vmatpush3.bf16.msra.mxu1 %v13604_v57  ;;  %v2052_v57 = vcombine.high %v14912_v53, %v14912_v53  ;;  %v13659_v58 = vld [vmem:[%s17860_s1 + $0x200] sm:$0xff]  }
  0x2a   :  { %12253 = vmatprep.subr.bf16.mxu1 %v13606_v59  ;;  %v13660_v59 = vld [vmem:[%s17860_s1 + $0x280] sm:$0xff]  }
  0x2c   :  { %12232 = vmatpush3.bf16.msra.mxu0 %v13607_v60  ;;  %v2083_v60 = vcombine.high %v2073_v56, %v2073_v56 }
  0x2d   :  { %12233 = vmatprep.subr.bf16.mxu0 %v13609_v62  ;;  %12254 = vmatpush3.bf16.msra.mxu1 %v13608_v61  ;;  %v2059_v61 = vrot.slane %v2043_v48, %v14720_v41  ;;  %v13661_v62 = vld [vmem:[%s17860_s1 + $0x378] sm:$0xff]   ;;  %v13706_v48 = vld [vmem:[%s17860_s1 + $0x460] sm:$0xff]  }
  0x2e   :  { %12255 = vmatprep.subr.bf16.mxu1 %v13610_v63  ;;  %v13662_v63 = vld [vmem:[%s17860_s1 + $0x3f8] sm:$0xff]  }
  0x30   :  { %12234 = vmatpush3.bf16.msra.mxu0 %v13611_v0  ;;  %v2080_v0 = vrot.slane %v2052_v57, %v14720_v41  ;;  %v13715_v57 = vld [vmem:[%s17860_s1 + $0x4d0] sm:$0xff]  }
  0x31   :  { %12235 = vmatprep.subr.bf16.mxu0 %v13613_v2  ;;  %12256 = vmatpush3.bf16.msra.mxu1 %v13612_v1  ;;  %v13663_v1 = vld [vmem:[%s17860_s1 + $0x338] sm:$0xff]  }
  0x32   :  { %12257 = vmatprep.subr.bf16.mxu1 %v13614_v3  ;;  %v13664_v2 = vld [vmem:[%s17860_s1 + $0x3b8] sm:$0xff]   ;;  %v2081_v3 = vcombine.high %v2059_v61, %v2059_v61 }
  0x34   :  { %12236 = vmatpush3.bf16.msra.mxu0 %v13615_v4  ;;  %v13665_v4 = vld [vmem:[%s17860_s1 + $0x370] sm:$0xff]  }
  0x35   :  { %12237 = vmatprep.subr.bf16.mxu0 %v13617_v6  ;;  %12258 = vmatpush3.bf16.msra.mxu1 %v13616_v5  ;;  %v13666_v5 = vld [vmem:[%s17860_s1 + $0x3f0] sm:$0xff]   ;;  %v2084_v6 = vcombine.high %v2080_v0, %v2080_v0 }
  0x36   :  { %12259 = vmatprep.subr.bf16.mxu1 %v13618_v7  ;;  %v13667_v7 = vld [vmem:[%s17860_s1 + $0x330] sm:$0xff]  }
  0x38   :  { %12238 = vmatpush3.bf16.msra.mxu0 %v13619_v8  ;;  %v13668_v8 = vld [vmem:[%s17860_s1 + $0x3b0] sm:$0xff]  }
  0x39   :  { %12239 = vmatprep.subr.bf16.mxu0 %v13621_v10  ;;  %12260 = vmatpush3.bf16.msra.mxu1 %v13620_v9  ;;  %v13669_v9 = vld [vmem:[%s17860_s1 + $0x368] sm:$0xff]  }
  0x3a   :  { %12261 = vmatprep.subr.bf16.mxu1 %v13622_v11  ;;  %v13670_v10 = vld [vmem:[%s17860_s1 + $0x3e8] sm:$0xff]  }
  0x3b   :  { %v13671_v11 = vld [vmem:[%s17860_s1 + $0x328] sm:$0xff]  }
  0x3c   :  { %12240 = vmatpush3.bf16.msra.mxu0 %v13623_v12  ;;  %v13672_v12 = vld [vmem:[%s17860_s1 + $0x3a8] sm:$0xff]  }
  0x3d   :  { %12241 = vmatprep.subr.bf16.mxu0 %v13625_v14  ;;  %12262 = vmatpush3.bf16.msra.mxu1 %v13624_v13  ;;  %v13673_v13 = vld [vmem:[%s17860_s1 + $0x360] sm:$0xff]  }
  0x3e   :  { %12263 = vmatprep.subr.bf16.mxu1 %v13626_v15  ;;  %v13674_v14 = vld [vmem:[%s17860_s1 + $0x3e0] sm:$0xff]  }
  0x3f   :  { %v13675_v15 = vld [vmem:[%s17860_s1 + $0x320] sm:$0xff]  }
  0x40   :  { %12242 = vmatpush3.bf16.msra.mxu0 %v13627_v16  ;;  %v13676_v16 = vld [vmem:[%s17860_s1 + $0x3a0] sm:$0xff]  }
  0x41   :  { %12271 = vmatprep.subr.bf16.mxu0 %v13629_v19  ;;  %12264 = vmatpush3.bf16.msra.mxu1 %v13628_v17  ;;  %v13677_v17 = vld [vmem:[%s17860_s1 + $0x358] sm:$0xff]  }
  0x42   :  { %12293 = vmatprep.subr.bf16.mxu1 %v13630_v20  ;;  %v13679_v19 = vld [vmem:[%s17860_s1 + $0x318] sm:$0xff]  }
  0x43   :  { %8715 = vmatmul.mubr.bf16.vlgmr.msra.gmra.mxu0 %v2017_v18  ;;  %v13678_v18 = vld [vmem:[%s17860_s1 + $0x3d8] sm:$0xff]  }
  0x44   :  { %12272 = vmatpush3.bf16.msra.mxu0 %v13631_v21  ;;  %8755 = vmatmul.mubr.bf16.vlgmr.msra.gmra.mxu1 %v2033_v23  ;;  %v13680_v20 = vld [vmem:[%s17860_s1 + $0x398] sm:$0xff]   ;;  %v13681_v21 = vld [vmem:[%s17860_s1 + $0x350] sm:$0xff]  }
  0x45   :  { %12273 = vmatprep.subr.bf16.mxu0 %v13633_v24  ;;  %12294 = vmatpush3.bf16.msra.mxu1 %v13632_v22  ;;  %v13682_v22 = vld [vmem:[%s17860_s1 + $0x3d0] sm:$0xff]  }
  0x46   :  { %12295 = vmatprep.subr.bf16.mxu1 %v13634_v25  ;;  %8794 = vmatprep.mubr.bf16.mxu0 %v2073_v56  ;;  %v13683_v23 = vld [vmem:[%s17860_s1 + $0x310] sm:$0xff]   ;;  %v13685_v25 = vld [vmem:[%s17860_s1 + $0x348] sm:$0xff]  }
  0x47   :  { %8834 = vmatprep.mubr.bf16.mxu1 %v2083_v60  ;;  %v13684_v24 = vld [vmem:[%s17860_s1 + $0x390] sm:$0xff]   ;;  %v13718_v60 = vld [vmem:[%s17860_s1 + $0x448] sm:$0xff]  }
  0x48   :  { %12274 = vmatpush3.bf16.msra.mxu0 %v13635_v26  ;;  %v13686_v26 = vld [vmem:[%s17860_s1 + $0x3c8] sm:$0xff]   ;;  %v13714_v56 = vld [vmem:[%s17860_s1 + $0x450] sm:$0xff]  }
  0x49   :  { %12275 = vmatprep.subr.bf16.mxu0 %v13637_v28  ;;  %12296 = vmatpush3.bf16.msra.mxu1 %v13636_v27  ;;  %v13687_v27 = vld [vmem:[%s17860_s1 + $0x308] sm:$0xff]  }
  0x4a   :  { %12297 = vmatprep.subr.bf16.mxu1 %v13638_v29  ;;  %v13688_v28 = vld [vmem:[%s17860_s1 + $0x388] sm:$0xff]   ;;  %v13689_v29 = vld [vmem:[%s17860_s1 + $0x340] sm:$0xff]  }
  0x4c   :  { %12276 = vmatpush3.bf16.msra.mxu0 %v13639_v30  ;;  %v13690_v30 = vld [vmem:[%s17860_s1 + $0x3c0] sm:$0xff]  }
  0x4d   :  { %12277 = vmatprep.subr.bf16.mxu0 %v13641_v32  ;;  %12298 = vmatpush3.bf16.msra.mxu1 %v13640_v31  ;;  %v13691_v31 = vld [vmem:[%s17860_s1 + $0x300] sm:$0xff]  }
  0x4e   :  { %12299 = vmatprep.subr.bf16.mxu1 %v13642_v33  ;;  %v13692_v32 = vld [vmem:[%s17860_s1 + $0x380] sm:$0xff]   ;;  %v2066_v33 = vrot.slane %v14912_v53, %v14720_v41  ;;  %v13711_v53 = vld [vmem:[%s17860_s1 + $0x4d8] sm:$0xff]  }
  0x50   :  { %12278 = vmatpush3.bf16.msra.mxu0 %v13643_v34  ;;  %v13694_v34 = vld [vmem:[%s17860_s1 + $0x478] sm:$0xff]  }
  0x51   :  { %12279 = vmatprep.subr.bf16.mxu0 %v13645_v36  ;;  %12300 = vmatpush3.bf16.msra.mxu1 %v13644_v35  ;;  %v13695_v35 = vld [vmem:[%s17860_s1 + $0x4f8] sm:$0xff]  }
  0x52   :  { %12301 = vmatprep.subr.bf16.mxu1 %v13646_v37  ;;  %v13696_v36 = vld [vmem:[%s17860_s1 + $0x438] sm:$0xff]  }
  0x53   :  { %v13697_v37 = vld [vmem:[%s17860_s1 + $0x4b8] sm:$0xff]  }
  0x54   :  { %12280 = vmatpush3.bf16.msra.mxu0 %v13647_v38  ;;  %v2082_v38 = vcombine.high %v2066_v33, %v2066_v33 }
  0x55   :  { %12281 = vmatprep.subr.bf16.mxu0 %v13649_v40  ;;  %12302 = vmatpush3.bf16.msra.mxu1 %v13648_v39  ;;  %v13698_v39 = vld [vmem:[%s17860_s1 + $0x470] sm:$0xff]  }
  0x56   :  { %12303 = vmatprep.subr.bf16.mxu1 %v13650_v42  ;;  %v13699_v40 = vld [vmem:[%s17860_s1 + $0x4f0] sm:$0xff]  }
  0x57   :  { %v13700_v42 = vld [vmem:[%s17860_s1 + $0x430] sm:$0xff]  }
  0x58   :  { %12282 = vmatpush3.bf16.msra.mxu0 %v13651_v43  ;;  %v13701_v43 = vld [vmem:[%s17860_s1 + $0x4b0] sm:$0xff]  }
  0x59   :  { %12283 = vmatprep.subr.bf16.mxu0 %v13653_v45  ;;  %12304 = vmatpush3.bf16.msra.mxu1 %v13652_v44  ;;  %v13702_v44 = vld [vmem:[%s17860_s1 + $0x468] sm:$0xff]  }
  0x5a   :  { %12305 = vmatprep.subr.bf16.mxu1 %v13654_v47  ;;  %v13703_v45 = vld [vmem:[%s17860_s1 + $0x4e8] sm:$0xff]  }
  0x5b   :  { %v13705_v47 = vld [vmem:[%s17860_s1 + $0x4a8] sm:$0xff]  }
  0x5c   :  { %12284 = vmatpush3.bf16.msra.mxu0 %v13655_v50  ;;  %v13708_v50 = vld [vmem:[%s17860_s1 + $0x420] sm:$0xff]  }
  0x5d   :  { %12285 = vmatprep.subr.bf16.mxu0 %v13657_v54  ;;  %12306 = vmatpush3.bf16.msra.mxu1 %v13656_v51  ;;  %v13709_v51 = vld [vmem:[%s17860_s1 + $0x4a0] sm:$0xff]   ;;  %v13712_v54 = vld [vmem:[%s17860_s1 + $0x418] sm:$0xff]  }
  0x5e   :  { %12307 = vmatprep.subr.bf16.mxu1 %v13658_v55  ;;  %v13713_v55 = vld [vmem:[%s17860_s1 + $0x498] sm:$0xff]  }
  0x60   :  { %12286 = vmatpush3.bf16.msra.mxu0 %v13659_v58  ;;  %v13716_v58 = vld [vmem:[%s17860_s1 + $0x410] sm:$0xff]  }
  0x61   :  { %12315 = vmatprep.subr.bf16.mxu0 %v13661_v62  ;;  %12308 = vmatpush3.bf16.msra.mxu1 %v13660_v59  ;;  %v13717_v59 = vld [vmem:[%s17860_s1 + $0x490] sm:$0xff]   ;;  %v13719_v62 = vld [vmem:[%s17860_s1 + $0x4c8] sm:$0xff]  }
  0x62   :  { %12337 = vmatprep.subr.bf16.mxu1 %v13662_v63 }
  0x63   :  { %8795 = vmatmul.mubr.bf16.vlgmr.msra.gmra.mxu0 %v2059_v61  ;;  %v32_v61 = vld [vmem:[%s17859_s0 + $0x10] sm:$0xff] }
  0x64   :  { %12316 = vmatpush3.bf16.msra.mxu0 %v13663_v1  ;;  %8874 = vmatprep.mubr.bf16.mxu0 %v2080_v0  ;;  %v2092_v63 = vrot.slane %v32_v61, %v14720_v41  ;;  %v2085_v0 = vcombine.high %v32_v61, %v32_v61  ;;  %v13720_v1 = vld [vmem:[%s17860_s1 + $0x408] sm:$0xff]  }
  0x65   :  { %8835 = vmatmul.mubr.bf16.vlgmr.msra.gmra.mxu1 %v2081_v3  ;;  %12317 = vmatprep.subr.bf16.mxu0 %v13665_v4  ;;  %v13769_v61 = vld [vmem:[%s17860_s1 + $0x628] sm:$0xff]  }
  0x66   :  { %12338 = vmatpush3.bf16.msra.mxu1 %v13664_v2  ;;  %8914 = vmatprep.mubr.bf16.mxu1 %v2084_v6  ;;  %v13721_v2 = vld [vmem:[%s17860_s1 + $0x488] sm:$0xff]   ;;  %v2100_v3 = vcombine.high %v2092_v63, %v2092_v63  ;;  %v15118_v4 = vrot.slane %v2085_v0, %v14720_v41  ;;  %v13723_v6 = vld [vmem:[%s17860_s1 + $0x4c0] sm:$0xff]  }
  0x67   :  { %12339 = vmatprep.subr.bf16.mxu1 %v13666_v5  ;;  %v13722_v5 = vld [vmem:[%s17860_s1 + $0x440] sm:$0xff]  }
  0x68   :  { %12318 = vmatpush3.bf16.msra.mxu0 %v13667_v7  ;;  %v2122_v7 = vrot.slane %v2100_v3, %v14720_v41  ;;  %v13772_v0 = vld [vmem:[%s17860_s1 + $0x6e0] sm:$0xff]   ;;  %v13775_v3 = vld [vmem:[%s17860_s1 + $0x658] sm:$0xff]  }
  0x69   :  { %12319 = vmatprep.subr.bf16.mxu0 %v13669_v9  ;;  %v13724_v9 = vld [vmem:[%s17860_s1 + $0x400] sm:$0xff]  }
  0x6a   :  { %12340 = vmatpush3.bf16.msra.mxu1 %v13668_v8  ;;  %v2101_v8 = vcombine.high %v15118_v4, %v15118_v4 }
  0x6b   :  { %12341 = vmatprep.subr.bf16.mxu1 %v13670_v10  ;;  %v13725_v10 = vld [vmem:[%s17860_s1 + $0x480] sm:$0xff]  }
  0x6c   :  { %12320 = vmatpush3.bf16.msra.mxu0 %v13671_v11  ;;  %v2132_v11 = vcombine.high %v2122_v7, %v2122_v7 }
  0x6d   :  { %12321 = vmatprep.subr.bf16.mxu0 %v13673_v13  ;;  %v13726_v13 = vld [vmem:[%s17860_s1 + $0x578] sm:$0xff]  }
  0x6e   :  { %12342 = vmatpush3.bf16.msra.mxu1 %v13672_v12  ;;  %v2108_v12 = vrot.slane %v2092_v63, %v14720_v41  ;;  %v13771_v63 = vld [vmem:[%s17860_s1 + $0x660] sm:$0xff]  }
  0x6f   :  { %12343 = vmatprep.subr.bf16.mxu1 %v13674_v14  ;;  %v13727_v14 = vld [vmem:[%s17860_s1 + $0x5f8] sm:$0xff]  }
  0x70   :  { %12322 = vmatpush3.bf16.msra.mxu0 %v13675_v15  ;;  %v2129_v15 = vrot.slane %v2101_v8, %v14720_v41  ;;  %v13780_v8 = vld [vmem:[%s17860_s1 + $0x6d0] sm:$0xff]  }
  0x71   :  { %12323 = vmatprep.subr.bf16.mxu0 %v13677_v17  ;;  %v13729_v17 = vld [vmem:[%s17860_s1 + $0x5b8] sm:$0xff]  }
  0x72   :  { %12344 = vmatpush3.bf16.msra.mxu1 %v13676_v16  ;;  %v13728_v16 = vld [vmem:[%s17860_s1 + $0x538] sm:$0xff]  }
  0x73   :  { %12345 = vmatprep.subr.bf16.mxu1 %v13678_v18  ;;  %v2130_v18 = vcombine.high %v2108_v12, %v2108_v12 }
  0x74   :  { %12324 = vmatpush3.bf16.msra.mxu0 %v13679_v19  ;;  %v13730_v19 = vld [vmem:[%s17860_s1 + $0x570] sm:$0xff]  }
  0x75   :  { %12325 = vmatprep.subr.bf16.mxu0 %v13681_v21  ;;  %v2133_v21 = vcombine.high %v2129_v15, %v2129_v15 }
  0x76   :  { %12346 = vmatpush3.bf16.msra.mxu1 %v13680_v20  ;;  %v13731_v20 = vld [vmem:[%s17860_s1 + $0x5f0] sm:$0xff]  }
  0x77   :  { %12347 = vmatprep.subr.bf16.mxu1 %v13682_v22  ;;  %v13732_v22 = vld [vmem:[%s17860_s1 + $0x530] sm:$0xff]  }
  0x78   :  { %12326 = vmatpush3.bf16.msra.mxu0 %v13683_v23  ;;  %v13733_v23 = vld [vmem:[%s17860_s1 + $0x5b0] sm:$0xff]  }
  0x79   :  { %12327 = vmatprep.subr.bf16.mxu0 %v13685_v25  ;;  %v13735_v25 = vld [vmem:[%s17860_s1 + $0x5e8] sm:$0xff]  }
  0x7a   :  { %12348 = vmatpush3.bf16.msra.mxu1 %v13684_v24  ;;  %v13734_v24 = vld [vmem:[%s17860_s1 + $0x568] sm:$0xff]  }
  0x7b   :  { %12349 = vmatprep.subr.bf16.mxu1 %v13686_v26  ;;  %v13736_v26 = vld [vmem:[%s17860_s1 + $0x528] sm:$0xff]  }
  0x7c   :  { %12328 = vmatpush3.bf16.msra.mxu0 %v13687_v27  ;;  %v13737_v27 = vld [vmem:[%s17860_s1 + $0x5a8] sm:$0xff]  }
  0x7d   :  { %12329 = vmatprep.subr.bf16.mxu0 %v13689_v29  ;;  %v13739_v29 = vld [vmem:[%s17860_s1 + $0x5e0] sm:$0xff]  }
  0x7e   :  { %12350 = vmatpush3.bf16.msra.mxu1 %v13688_v28  ;;  %v13738_v28 = vld [vmem:[%s17860_s1 + $0x560] sm:$0xff]  }
  0x7f   :  { %12351 = vmatprep.subr.bf16.mxu1 %v13690_v30  ;;  %v13740_v30 = vld [vmem:[%s17860_s1 + $0x520] sm:$0xff]  }
  0x80   :  { %12330 = vmatpush3.bf16.msra.mxu0 %v13691_v31  ;;  %v13741_v31 = vld [vmem:[%s17860_s1 + $0x5a0] sm:$0xff]  }
  0x81   :  { %12359 = vmatprep.subr.bf16.mxu0 %v13694_v34  ;;  %v13744_v34 = vld [vmem:[%s17860_s1 + $0x518] sm:$0xff]  }
  0x82   :  { %12352 = vmatpush3.bf16.msra.mxu1 %v13692_v32  ;;  %v13742_v32 = vld [vmem:[%s17860_s1 + $0x558] sm:$0xff]  }
  0x83   :  { %8875 = vmatmul.mubr.bf16.vlgmr.msra.gmra.mxu0 %v2066_v33  ;;  %12381 = vmatprep.subr.bf16.mxu1 %v13695_v35  ;;  %v13743_v33 = vld [vmem:[%s17860_s1 + $0x5d8] sm:$0xff]  }
  0x84   :  { %12360 = vmatpush3.bf16.msra.mxu0 %v13696_v36  ;;  %8954 = vmatprep.mubr.bf16.mxu0 %v2122_v7  ;;  %v13745_v35 = vld [vmem:[%s17860_s1 + $0x598] sm:$0xff]   ;;  %v13746_v36 = vld [vmem:[%s17860_s1 + $0x550] sm:$0xff]  }
  0x85   :  { %8915 = vmatmul.mubr.bf16.vlgmr.msra.gmra.mxu1 %v2082_v38  ;;  %12361 = vmatprep.subr.bf16.mxu0 %v13698_v39  ;;  %v13748_v38 = vld [vmem:[%s17860_s1 + $0x510] sm:$0xff]  }
  0x86   :  { %12382 = vmatpush3.bf16.msra.mxu1 %v13697_v37  ;;  %8994 = vmatprep.mubr.bf16.mxu1 %v2132_v11  ;;  %v13747_v37 = vld [vmem:[%s17860_s1 + $0x5d0] sm:$0xff]   ;;  %v13783_v11 = vld [vmem:[%s17860_s1 + $0x648] sm:$0xff]  }
  0x87   :  { %12383 = vmatprep.subr.bf16.mxu1 %v13699_v40  ;;  %v13749_v39 = vld [vmem:[%s17860_s1 + $0x590] sm:$0xff]   ;;  %v13750_v40 = vld [vmem:[%s17860_s1 + $0x548] sm:$0xff]  }
  0x88   :  { %12362 = vmatpush3.bf16.msra.mxu0 %v13700_v42  ;;  %v13751_v42 = vld [vmem:[%s17860_s1 + $0x5c8] sm:$0xff]   ;;  %v13779_v7 = vld [vmem:[%s17860_s1 + $0x650] sm:$0xff]  }
  0x89   :  { %12363 = vmatprep.subr.bf16.mxu0 %v13702_v44  ;;  %v13753_v44 = vld [vmem:[%s17860_s1 + $0x588] sm:$0xff]  }
  0x8a   :  { %12384 = vmatpush3.bf16.msra.mxu1 %v13701_v43  ;;  %v13752_v43 = vld [vmem:[%s17860_s1 + $0x508] sm:$0xff]  }
  0x8b   :  { %12385 = vmatprep.subr.bf16.mxu1 %v13703_v45  ;;  %v13754_v45 = vld [vmem:[%s17860_s1 + $0x540] sm:$0xff]  }
  0x8c   :  { %12364 = vmatpush3.bf16.msra.mxu0 %v13704_v46  ;;  %v13755_v46 = vld [vmem:[%s17860_s1 + $0x5c0] sm:$0xff]  }
  0x8d   :  { %12365 = vmatprep.subr.bf16.mxu0 %v13706_v48  ;;  %v13757_v48 = vld [vmem:[%s17860_s1 + $0x580] sm:$0xff]  }
  0x8e   :  { %12386 = vmatpush3.bf16.msra.mxu1 %v13705_v47  ;;  %v13756_v47 = vld [vmem:[%s17860_s1 + $0x500] sm:$0xff]  }
  0x8f   :  { %12387 = vmatprep.subr.bf16.mxu1 %v13707_v49  ;;  %v2115_v49 = vrot.slane %v15118_v4, %v14720_v41  ;;  %v13776_v4 = vld [vmem:[%s17860_s1 + $0x6d8] sm:$0xff]  }
  0x90   :  { %12366 = vmatpush3.bf16.msra.mxu0 %v13708_v50  ;;  %v13759_v50 = vld [vmem:[%s17860_s1 + $0x678] sm:$0xff]  }
  0x91   :  { %12367 = vmatprep.subr.bf16.mxu0 %v13710_v52  ;;  %v13761_v52 = vld [vmem:[%s17860_s1 + $0x638] sm:$0xff]  }
  0x92   :  { %12388 = vmatpush3.bf16.msra.mxu1 %v13709_v51  ;;  %v13760_v51 = vld [vmem:[%s17860_s1 + $0x6f8] sm:$0xff]  }
  0x93   :  { %12389 = vmatprep.subr.bf16.mxu1 %v13711_v53  ;;  %v13762_v53 = vld [vmem:[%s17860_s1 + $0x6b8] sm:$0xff]  }
  0x94   :  { %12368 = vmatpush3.bf16.msra.mxu0 %v13712_v54  ;;  %v2131_v54 = vcombine.high %v2115_v49, %v2115_v49 }
  0x95   :  { %12369 = vmatprep.subr.bf16.mxu0 %v13714_v56  ;;  %v13764_v56 = vld [vmem:[%s17860_s1 + $0x6f0] sm:$0xff]  }
  0x96   :  { %12390 = vmatpush3.bf16.msra.mxu1 %v13713_v55  ;;  %v13763_v55 = vld [vmem:[%s17860_s1 + $0x670] sm:$0xff]  }
  0x97   :  { %12391 = vmatprep.subr.bf16.mxu1 %v13715_v57  ;;  %v13765_v57 = vld [vmem:[%s17860_s1 + $0x630] sm:$0xff]  }
  0x98   :  { %12370 = vmatpush3.bf16.msra.mxu0 %v13716_v58  ;;  %v13766_v58 = vld [vmem:[%s17860_s1 + $0x6b0] sm:$0xff]  }
  0x99   :  { %12371 = vmatprep.subr.bf16.mxu0 %v13718_v60  ;;  %v13768_v60 = vld [vmem:[%s17860_s1 + $0x6e8] sm:$0xff]  }
  0x9a   :  { %12392 = vmatpush3.bf16.msra.mxu1 %v13717_v59  ;;  %v13767_v59 = vld [vmem:[%s17860_s1 + $0x668] sm:$0xff]  }
  0x9b   :  { %12393 = vmatprep.subr.bf16.mxu1 %v13719_v62  ;;  %v13770_v62 = vld [vmem:[%s17860_s1 + $0x6a8] sm:$0xff]  }
  0x9c   :  { %12372 = vmatpush3.bf16.msra.mxu0 %v13720_v1  ;;  %v13773_v1 = vld [vmem:[%s17860_s1 + $0x620] sm:$0xff]  }
  0x9d   :  { %12373 = vmatprep.subr.bf16.mxu0 %v13722_v5  ;;  %v13777_v5 = vld [vmem:[%s17860_s1 + $0x618] sm:$0xff]  }
  0x9e   :  { %12394 = vmatpush3.bf16.msra.mxu1 %v13721_v2  ;;  %v13774_v2 = vld [vmem:[%s17860_s1 + $0x6a0] sm:$0xff]  }
  0x9f   :  { %12395 = vmatprep.subr.bf16.mxu1 %v13723_v6  ;;  %v13778_v6 = vld [vmem:[%s17860_s1 + $0x698] sm:$0xff]  }
  0xa0   :  { %12374 = vmatpush3.bf16.msra.mxu0 %v13724_v9  ;;  %v13781_v9 = vld [vmem:[%s17860_s1 + $0x610] sm:$0xff]  }
  0xa1   :  { %12403 = vmatprep.subr.bf16.mxu0 %v13726_v13  ;;  %v13784_v13 = vld [vmem:[%s17860_s1 + $0x6c8] sm:$0xff]  }
  0xa2   :  { %12396 = vmatpush3.bf16.msra.mxu1 %v13725_v10  ;;  %v13782_v10 = vld [vmem:[%s17860_s1 + $0x690] sm:$0xff]  }
  0xa3   :  { %8955 = vmatmul.mubr.bf16.vlgmr.msra.gmra.mxu0 %v2108_v12  ;;  %12425 = vmatprep.subr.bf16.mxu1 %v13727_v14  ;;  %v33_v12 = vld [vmem:[%s17859_s0 + $0x18] sm:$0xff] }
  0xa4   :  { %12404 = vmatpush3.bf16.msra.mxu0 %v13728_v16  ;;  %9034 = vmatprep.mubr.bf16.mxu0 %v2129_v15  ;;  %v2141_v14 = vrot.slane %v33_v12, %v14720_v41  ;;  %v2134_v15 = vcombine.high %v33_v12, %v33_v12  ;;  %v13785_v16 = vld [vmem:[%s17860_s1 + $0x608] sm:$0xff]   ;;  %v13822_v12 = vld [vmem:[%s17860_s1 + $0x780] sm:$0xff]  }
  0xa5   :  { %8995 = vmatmul.mubr.bf16.vlgmr.msra.gmra.mxu1 %v2130_v18  ;;  %12405 = vmatprep.subr.bf16.mxu0 %v13730_v19 }
  0xa6   :  { %12426 = vmatpush3.bf16.msra.mxu1 %v13729_v17  ;;  %9074 = vmatprep.mubr.bf16.mxu1 %v2133_v21  ;;  %v13787_v17 = vld [vmem:[%s17860_s1 + $0x640] sm:$0xff]   ;;  %v2149_v18 = vcombine.high %v2141_v14, %v2141_v14  ;;  %v15324_v19 = vrot.slane %v2134_v15, %v14720_v41  ;;  %v13825_v15 = vld [vmem:[%s17860_s1 + $0x8f8] sm:$0xff]  }
  0xa7   :  { %12427 = vmatprep.subr.bf16.mxu1 %v13731_v20  ;;  %v13786_v20 = vld [vmem:[%s17860_s1 + $0x688] sm:$0xff]   ;;  %v13788_v21 = vld [vmem:[%s17860_s1 + $0x6c0] sm:$0xff]  }
  0xa8   :  { %12406 = vmatpush3.bf16.msra.mxu0 %v13732_v22  ;;  %v13789_v22 = vld [vmem:[%s17860_s1 + $0x600] sm:$0xff]  }
  0xa9   :  { %12407 = vmatprep.subr.bf16.mxu0 %v13734_v24  ;;  %v2150_v24 = vcombine.high %v15324_v19, %v15324_v19 }
  0xaa   :  { %12428 = vmatpush3.bf16.msra.mxu1 %v13733_v23  ;;  %v2171_v23 = vrot.slane %v2149_v18, %v14720_v41 }
  0xab   :  { %12429 = vmatprep.subr.bf16.mxu1 %v13735_v25  ;;  %v13790_v25 = vld [vmem:[%s17860_s1 + $0x680] sm:$0xff]  }
  0xac   :  { %12408 = vmatpush3.bf16.msra.mxu0 %v13736_v26  ;;  %v2181_v26 = vcombine.high %v2171_v23, %v2171_v23 }
  0xad   :  { %12409 = vmatprep.subr.bf16.mxu0 %v13738_v28  ;;  %v13791_v28 = vld [vmem:[%s17860_s1 + $0x778] sm:$0xff]  }
  0xae   :  { %12430 = vmatpush3.bf16.msra.mxu1 %v13737_v27  ;;  %v2157_v27 = vrot.slane %v2141_v14, %v14720_v41  ;;  %v13824_v14 = vld [vmem:[%s17860_s1 + $0x878] sm:$0xff]  }
  0xaf   :  { %12431 = vmatprep.subr.bf16.mxu1 %v13739_v29  ;;  %v13792_v29 = vld [vmem:[%s17860_s1 + $0x7f8] sm:$0xff]  }
  0xb0   :  { %12410 = vmatpush3.bf16.msra.mxu0 %v13740_v30  ;;  %v2178_v30 = vrot.slane %v2150_v24, %v14720_v41 }
  0xb1   :  { %12411 = vmatprep.subr.bf16.mxu0 %v13742_v32  ;;  %v13794_v32 = vld [vmem:[%s17860_s1 + $0x7b8] sm:$0xff]  }
  0xb2   :  { %12432 = vmatpush3.bf16.msra.mxu1 %v13741_v31  ;;  %v13793_v31 = vld [vmem:[%s17860_s1 + $0x738] sm:$0xff]  }
  0xb3   :  { %12433 = vmatprep.subr.bf16.mxu1 %v13743_v33  ;;  %v2179_v33 = vcombine.high %v2157_v27, %v2157_v27 }
  0xb4   :  { %12412 = vmatpush3.bf16.msra.mxu0 %v13744_v34  ;;  %v13795_v34 = vld [vmem:[%s17860_s1 + $0x770] sm:$0xff]  }
  0xb5   :  { %12413 = vmatprep.subr.bf16.mxu0 %v13746_v36  ;;  %v2182_v36 = vcombine.high %v2178_v30, %v2178_v30 }
  0xb6   :  { %12434 = vmatpush3.bf16.msra.mxu1 %v13745_v35  ;;  %v13796_v35 = vld [vmem:[%s17860_s1 + $0x7f0] sm:$0xff]  }
  0xb7   :  { %12435 = vmatprep.subr.bf16.mxu1 %v13747_v37 }
  0xb8   :  { %12414 = vmatpush3.bf16.msra.mxu0 %v13748_v38  ;;  %v11218_v38 = vld [vmem:[%s17861_s2] ss:$0 sm:$0xff] }
  0xb9   :  { %12415 = vmatprep.subr.bf16.mxu0 %v13750_v40  ;;  %v13798_v40 = vld [vmem:[%s17860_s1 + $0x7b0] sm:$0xff]  }
  0xba   :  { %12436 = vmatpush3.bf16.msra.mxu1 %v13749_v39  ;;  %v13797_v39 = vld [vmem:[%s17860_s1 + $0x730] sm:$0xff]  }
  0xbb   :  { %12437 = vmatprep.subr.bf16.mxu1 %v13751_v42 }
  0xbc   :  { %12416 = vmatpush3.bf16.msra.mxu0 %v13752_v43 }
  0xbd   :  { %12417 = vmatprep.subr.bf16.mxu0 %v13754_v45 }
  0xbe   :  { %12438 = vmatpush3.bf16.msra.mxu1 %v13753_v44  ;;  %v13799_v44 = vld [vmem:[%s17860_s1 + $0x768] sm:$0xff]  }
  0xbf   :  { %12439 = vmatprep.subr.bf16.mxu1 %v13755_v46  ;;  %v13800_v46 = vld [vmem:[%s17860_s1 + $0x7e8] sm:$0xff]  }
  0xc0   :  { %12418 = vmatpush3.bf16.msra.mxu0 %v13756_v47 }
  0xc1   :  { %12447 = vmatprep.subr.bf16.mxu0 %v13759_v50 }
  0xc2   :  { %12440 = vmatpush3.bf16.msra.mxu1 %v13757_v48 }
  0xc3   :  { %9035 = vmatmul.mubr.bf16.vlgmr.msra.gmra.mxu0 %v2115_v49  ;;  %12469 = vmatprep.subr.bf16.mxu1 %v13760_v51  ;;  %v13801_v49 = vld [vmem:[%s17860_s1 + $0x728] sm:$0xff]  }
  0xc4   :  { %12448 = vmatpush3.bf16.msra.mxu0 %v13761_v52  ;;  %9114 = vmatprep.mubr.bf16.mxu0 %v2171_v23  ;;  %v13802_v52 = vld [vmem:[%s17860_s1 + $0x7a8] sm:$0xff]   ;;  %v13831_v23 = vld [vmem:[%s17860_s1 + $0x8b0] sm:$0xff]  }
  0xc5   :  { %9075 = vmatmul.mubr.bf16.vlgmr.msra.gmra.mxu1 %v2131_v54  ;;  %12449 = vmatprep.subr.bf16.mxu0 %v13763_v55  ;;  %v13803_v55 = vld [vmem:[%s17860_s1 + $0x760] sm:$0xff]  }
  0xc6   :  { %12470 = vmatpush3.bf16.msra.mxu1 %v13762_v53  ;;  %9154 = vmatprep.mubr.bf16.mxu1 %v2181_v26  ;;  %v13832_v26 = vld [vmem:[%s17860_s1 + $0x868] sm:$0xff]  }
  0xc7   :  { %12471 = vmatprep.subr.bf16.mxu1 %v13764_v56 }
  0xc8   :  { %12450 = vmatpush3.bf16.msra.mxu0 %v13765_v57  ;;  %v13804_v57 = vld [vmem:[%s17860_s1 + $0x7e0] sm:$0xff]  }
  0xc9   :  { %12451 = vmatprep.subr.bf16.mxu0 %v13767_v59  ;;  %v13805_v59 = vld [vmem:[%s17860_s1 + $0x720] sm:$0xff]  }
  0xca   :  { %12472 = vmatpush3.bf16.msra.mxu1 %v13766_v58 }
  0xcb   :  { %12473 = vmatprep.subr.bf16.mxu1 %v13768_v60  ;;  %v13806_v60 = vld [vmem:[%s17860_s1 + $0x7a0] sm:$0xff]  }
  0xcc   :  { %12452 = vmatpush3.bf16.msra.mxu0 %v13769_v61  ;;  %v13807_v61 = vld [vmem:[%s17860_s1 + $0x758] sm:$0xff]  }
  0xcd   :  { %12453 = vmatprep.subr.bf16.mxu0 %v13771_v63  ;;  %v13809_v63 = vld [vmem:[%s17860_s1 + $0x718] sm:$0xff]  }
  0xce   :  { %12474 = vmatpush3.bf16.msra.mxu1 %v13770_v62  ;;  %v13808_v62 = vld [vmem:[%s17860_s1 + $0x7d8] sm:$0xff]  }
  0xcf   :  { %12475 = vmatprep.subr.bf16.mxu1 %v13772_v0  ;;  %v13810_v0 = vld [vmem:[%s17860_s1 + $0x798] sm:$0xff]  }
  0xd0   :  { %12454 = vmatpush3.bf16.msra.mxu0 %v13773_v1  ;;  %v13811_v1 = vld [vmem:[%s17860_s1 + $0x750] sm:$0xff]  }
  0xd1   :  { %12455 = vmatprep.subr.bf16.mxu0 %v13775_v3  ;;  %v13813_v3 = vld [vmem:[%s17860_s1 + $0x710] sm:$0xff]  }
  0xd2   :  { %12476 = vmatpush3.bf16.msra.mxu1 %v13774_v2  ;;  %v13812_v2 = vld [vmem:[%s17860_s1 + $0x7d0] sm:$0xff]  }
  0xd3   :  { %12477 = vmatprep.subr.bf16.mxu1 %v13776_v4  ;;  %v13814_v4 = vld [vmem:[%s17860_s1 + $0x790] sm:$0xff]  }
  0xd4   :  { %12456 = vmatpush3.bf16.msra.mxu0 %v13777_v5  ;;  %v13815_v5 = vld [vmem:[%s17860_s1 + $0x748] sm:$0xff]  }
  0xd5   :  { %12457 = vmatprep.subr.bf16.mxu0 %v13779_v7  ;;  %v13817_v7 = vld [vmem:[%s17860_s1 + $0x708] sm:$0xff]  }
  0xd6   :  { %12478 = vmatpush3.bf16.msra.mxu1 %v13778_v6  ;;  %v13816_v6 = vld [vmem:[%s17860_s1 + $0x7c8] sm:$0xff]  }
  0xd7   :  { %12479 = vmatprep.subr.bf16.mxu1 %v13780_v8  ;;  %v13818_v8 = vld [vmem:[%s17860_s1 + $0x788] sm:$0xff]  }
  0xd8   :  { %12458 = vmatpush3.bf16.msra.mxu0 %v13781_v9  ;;  %v13819_v9 = vld [vmem:[%s17860_s1 + $0x740] sm:$0xff]  }
  0xd9   :  { %12459 = vmatprep.subr.bf16.mxu0 %v13783_v11  ;;  %v13821_v11 = vld [vmem:[%s17860_s1 + $0x700] sm:$0xff]  }
  0xda   :  { %12480 = vmatpush3.bf16.msra.mxu1 %v13782_v10  ;;  %v13820_v10 = vld [vmem:[%s17860_s1 + $0x7c0] sm:$0xff]  }
  0xdb   :  { %12481 = vmatprep.subr.bf16.mxu1 %v13784_v13  ;;  %v2164_v13 = vrot.slane %v15324_v19, %v14720_v41  ;;  %v13828_v19 = vld [vmem:[%s17860_s1 + $0x870] sm:$0xff]  }
  0xdc   :  { %12460 = vmatpush3.bf16.msra.mxu0 %v13785_v16  ;;  %v13826_v16 = vld [vmem:[%s17860_s1 + $0x838] sm:$0xff]  }
  0xdd   :  { %12461 = vmatprep.subr.bf16.mxu0 %v13787_v17  ;;  %v13827_v17 = vld [vmem:[%s17860_s1 + $0x8b8] sm:$0xff]   ;;  %v2180_v18 = vcombine.high %v2164_v13, %v2164_v13 }
  0xde   :  { %12482 = vmatpush3.bf16.msra.mxu1 %v13786_v20  ;;  %v13829_v20 = vld [vmem:[%s17860_s1 + $0x8f0] sm:$0xff]  }
  0xdf   :  { %12483 = vmatprep.subr.bf16.mxu1 %v13788_v21 }
  0xe0   :  { %12462 = vmatpush3.bf16.msra.mxu0 %v13789_v22  ;;  %v13830_v22 = vld [vmem:[%s17860_s1 + $0x830] sm:$0xff]  }
  0xe1   :  { %12491 = vmatprep.subr.bf16.mxu0 %v13791_v28  ;;  %v13833_v28 = vld [vmem:[%s17860_s1 + $0x8e8] sm:$0xff]  }
  0xe2   :  { %12484 = vmatpush3.bf16.msra.mxu1 %v13790_v25 }
  0xe3   :  { %v12199_v37 = vpop.f32.mrf.mxu0  ;;  %9115 = vmatmul.mubr.bf16.vlgmr.msra.gmra.mxu0 %v2157_v27  ;;  %12513 = vmatprep.subr.bf16.mxu1 %v13792_v29 }
  0xe4   :  { %12492 = vmatpush3.bf16.msra.mxu0 %v13793_v31  ;;  %9194 = vmatprep.mubr.bf16.mxu0 %v2178_v30  ;;  %v12221_v42 = vpop.f32.mrf.mxu1  ;;  %v13834_v31 = vld [vmem:[%s17860_s1 + $0x828] sm:$0xff]  }
  0xe5   :  { %9155 = vmatmul.mubr.bf16.vlgmr.msra.gmra.mxu1 %v2179_v33  ;;  %v12200_v43 = vpop.f32.mrf.mxu0  ;;  %12493 = vmatprep.subr.bf16.mxu0 %v13795_v34  ;;  %v13835_v34 = vld [vmem:[%s17860_s1 + $0x8a8] sm:$0xff]  }
  0xe6   :  { %12514 = vmatpush3.bf16.msra.mxu1 %v13794_v32  ;;  %v12201_v45 = vadd.f32 %v12200_v43, %v12199_v37  ;;  %9234 = vmatprep.mubr.bf16.mxu1 %v2182_v36  ;;  %v12222_v47 = vpop.f32.mrf.mxu1  ;;  %v13836_v37 = vld [vmem:[%s17860_s1 + $0x860] sm:$0xff]  }
  0xe7   :  { %v12202_v48 = vpop.f32.mrf.mxu0  ;;  %12515 = vmatprep.subr.bf16.mxu1 %v13796_v35  ;;  %v12223_v51 = vadd.f32 %v12222_v47, %v12221_v42  ;;  %v13838_v42 = vld [vmem:[%s17860_s1 + $0x820] sm:$0xff]   ;;  %v13843_v47 = vld [vmem:[%s17860_s1 + $0x898] sm:$0xff]  }
  0xe8   :  { %v8637_v50 = vadd.f32 %v12201_v45, %v11218_v38  ;;  %12494 = vmatpush3.bf16.msra.mxu0 %v13797_v39  ;;  %v12224_v53 = vpop.f32.mrf.mxu1  ;;  %v13837_v39 = vld [vmem:[%s17860_s1 + $0x8e0] sm:$0xff]   ;;  %v13841_v45 = vld [vmem:[%s17860_s1 + $0x8d8] sm:$0xff]   ;;  %v13844_v48 = vld [vmem:[%s17860_s1 + $0x850] sm:$0xff]  }
  0xe9   :  { %v12203_v54 = vpop.f32.mrf.mxu0  ;;  %12495 = vmatprep.subr.bf16.mxu0 %v13799_v44  ;;  %v13839_v43 = vld [vmem:[%s17860_s1 + $0x8a0] sm:$0xff]   ;;  %v13840_v44 = vld [vmem:[%s17860_s1 + $0x858] sm:$0xff]   ;;  %v13849_v53 = vld [vmem:[%s17860_s1 + $0x8c8] sm:$0xff]  }
  0xea   :  { %v15385_v56 = vadd.f32 %v12223_v51, %v8637_v50  ;;  %12516 = vmatpush3.bf16.msra.mxu1 %v13798_v40  ;;  %v12225_v58 = vpop.f32.mrf.mxu1  ;;  %v13846_v50 = vld [vmem:[%s17860_s1 + $0x810] sm:$0xff]   ;;  %v34_v54 = vld [vmem:[%s17859_s0 + $0x20] sm:$0xff] }
  0xeb   :  { %12517 = vmatprep.subr.bf16.mxu1 %v13800_v46  ;;  %v13842_v46 = vld [vmem:[%s17860_s1 + $0x818] sm:$0xff]   ;;  %v13847_v51 = vld [vmem:[%s17860_s1 + $0x890] sm:$0xff]   ;;  %v13851_v58 = vld [vmem:[%s17860_s1 + $0x888] sm:$0xff]  }
  0xec   :  { %12496 = vmatpush3.bf16.msra.mxu0 %v13801_v49  ;;  %v13845_v49 = vld [vmem:[%s17860_s1 + $0x8d0] sm:$0xff]  }
  0xed   :  { %12497 = vmatprep.subr.bf16.mxu0 %v13803_v55  ;;  %v13850_v55 = vld [vmem:[%s17860_s1 + $0x808] sm:$0xff]  }
  0xee   :  { %12518 = vmatpush3.bf16.msra.mxu1 %v13802_v52  ;;  %v13848_v52 = vld [vmem:[%s17860_s1 + $0x848] sm:$0xff]  }
  0xef   :  { %12519 = vmatprep.subr.bf16.mxu1 %v13804_v57  ;;  %v2183_v57 = vcombine.high %v34_v54, %v34_v54 }
  0xf0   :  { %12498 = vmatpush3.bf16.msra.mxu0 %v13805_v59  ;;  %v13852_v59 = vld [vmem:[%s17860_s1 + $0x840] sm:$0xff]  }
  0xf1   :  { %12499 = vmatprep.subr.bf16.mxu0 %v13807_v61  ;;  %v15541_v61 = vrot.slane %v2183_v57, %v14720_v41  ;;  %v13892_v57 = vld [vmem:[%s17860_s1 + $0xab8] sm:$0xff]  }
  0xf2   :  { %12520 = vmatpush3.bf16.msra.mxu1 %v13806_v60 }
  0xf3   :  { %12521 = vmatprep.subr.bf16.mxu1 %v13808_v62  ;;  %v13853_v62 = vld [vmem:[%s17860_s1 + $0x8c0] sm:$0xff]  }
  0xf4   :  { %12500 = vmatpush3.bf16.msra.mxu0 %v13809_v63  ;;  %v13854_v63 = vld [vmem:[%s17860_s1 + $0x800] sm:$0xff]  }
  0xf5   :  { %12501 = vmatprep.subr.bf16.mxu0 %v13811_v1  ;;  %v2199_v1 = vcombine.high %v15541_v61, %v15541_v61 }
  0xf6   :  { %12522 = vmatpush3.bf16.msra.mxu1 %v13810_v0 }
  0xf7   :  { %12523 = vmatprep.subr.bf16.mxu1 %v13812_v2  ;;  %v13855_v2 = vld [vmem:[%s17860_s1 + $0x880] sm:$0xff]  }
  0xf8   :  { %12502 = vmatpush3.bf16.msra.mxu0 %v13813_v3 }
  0xf9   :  { %12503 = vmatprep.subr.bf16.mxu0 %v13815_v5  ;;  %v13856_v5 = vld [vmem:[%s17860_s1 + $0x978] sm:$0xff]  }
  0xfa   :  { %12524 = vmatpush3.bf16.msra.mxu1 %v13814_v4 }
  0xfb   :  { %12525 = vmatprep.subr.bf16.mxu1 %v13816_v6  ;;  %v13857_v6 = vld [vmem:[%s17860_s1 + $0x9f8] sm:$0xff]  }
  0xfc   :  { %12504 = vmatpush3.bf16.msra.mxu0 %v13817_v7  ;;  %v2227_v7 = vrot.slane %v2199_v1, %v14720_v41 }
  0xfd   :  { %12505 = vmatprep.subr.bf16.mxu0 %v13819_v9  ;;  %v13859_v9 = vld [vmem:[%s17860_s1 + $0x9b8] sm:$0xff]  }
  0xfe   :  { %12526 = vmatpush3.bf16.msra.mxu1 %v13818_v8  ;;  %v13858_v8 = vld [vmem:[%s17860_s1 + $0x938] sm:$0xff]  }
  0xff   :  { %12527 = vmatprep.subr.bf16.mxu1 %v13820_v10 }
 0x100   :  { %12506 = vmatpush3.bf16.msra.mxu0 %v13821_v11  ;;  %v13860_v11 = vld [vmem:[%s17860_s1 + $0x970] sm:$0xff]  }
 0x101   :  { %12535 = vmatprep.subr.bf16.mxu0 %v13824_v14 }
 0x102   :  { %12528 = vmatpush3.bf16.msra.mxu1 %v13822_v12  ;;  %v13861_v12 = vld [vmem:[%s17860_s1 + $0x9f0] sm:$0xff]  }
 0x103   :  { %v12243_v21 = vpop.f32.mrf.mxu0  ;;  %9195 = vmatmul.mubr.bf16.vlgmr.msra.gmra.mxu0 %v2164_v13  ;;  %12557 = vmatprep.subr.bf16.mxu1 %v13825_v15  ;;  %v2231_v13 = vcombine.high %v2227_v7, %v2227_v7  ;;  %v13862_v15 = vld [vmem:[%s17860_s1 + $0x930] sm:$0xff]  }
 0x104   :  { %12536 = vmatpush3.bf16.msra.mxu0 %v13826_v16  ;;  %v12265_v24 = vpop.f32.mrf.mxu1  ;;  %v13863_v16 = vld [vmem:[%s17860_s1 + $0x9b0] sm:$0xff]  }
 0x105   :  { %9235 = vmatmul.mubr.bf16.vlgmr.msra.gmra.mxu1 %v2180_v18  ;;  %v12244_v25 = vpop.f32.mrf.mxu0  ;;  %12537 = vmatprep.subr.bf16.mxu0 %v13828_v19  ;;  %v13864_v19 = vld [vmem:[%s17860_s1 + $0x968] sm:$0xff]  }
 0x106   :  { %12558 = vmatpush3.bf16.msra.mxu1 %v13827_v17  ;;  %v12245_v27 = vadd.f32 %v12244_v25, %v12243_v21  ;;  %v12266_v29 = vpop.f32.mrf.mxu1  ;;  %v13865_v21 = vld [vmem:[%s17860_s1 + $0x9e8] sm:$0xff]  }
 0x107   :  { %v12246_v30 = vpop.f32.mrf.mxu0  ;;  %12559 = vmatprep.subr.bf16.mxu1 %v13829_v20  ;;  %v12267_v33 = vadd.f32 %v12266_v29, %v12265_v24  ;;  %v13866_v24 = vld [vmem:[%s17860_s1 + $0x928] sm:$0xff]  }
 0x108   :  { %v8717_v32 = vadd.f32 %v12245_v27, %v15385_v56  ;;  %12538 = vmatpush3.bf16.msra.mxu0 %v13830_v22  ;;  %v12268_v35 = vpop.f32.mrf.mxu1  ;;  %v2190_v56 = vrot.slane %v34_v54, %v14720_v41  ;;  %v13867_v27 = vld [vmem:[%s17860_s1 + $0x9a8] sm:$0xff]   ;;  %v13868_v30 = vld [vmem:[%s17860_s1 + $0x960] sm:$0xff]   ;;  %v13889_v54 = vld [vmem:[%s17860_s1 + $0xa78] sm:$0xff]  }
 0x109   :  { %v12247_v36 = vpop.f32.mrf.mxu0  ;;  %12539 = vmatprep.subr.bf16.mxu0 %v13832_v26  ;;  %v13871_v35 = vld [vmem:[%s17860_s1 + $0x9a0] sm:$0xff]  }
 0x10a   :  { %v15486_v38 = vadd.f32 %v12267_v33, %v8717_v32  ;;  %12560 = vmatpush3.bf16.msra.mxu1 %v13831_v23  ;;  %v12269_v40 = vpop.f32.mrf.mxu1  ;;  %v2198_v60 = vcombine.high %v2190_v56, %v2190_v56  ;;  %v2206_v4 = vrot.slane %v2190_v56, %v14720_v41  ;;  %v13869_v32 = vld [vmem:[%s17860_s1 + $0x9e0] sm:$0xff]   ;;  %v13872_v36 = vld [vmem:[%s17860_s1 + $0x958] sm:$0xff]  }
 0x10b   :  { %12561 = vmatprep.subr.bf16.mxu1 %v13833_v28  ;;  %v13876_v40 = vld [vmem:[%s17860_s1 + $0x950] sm:$0xff]   ;;  %v13891_v56 = vld [vmem:[%s17860_s1 + $0xa38] sm:$0xff]  }
 0x10c   :  { %12540 = vmatpush3.bf16.msra.mxu0 %v13834_v31  ;;  %v2220_v0 = vrot.slane %v2198_v60, %v14720_v41  ;;  %v2228_v10 = vcombine.high %v2206_v4, %v2206_v4  ;;  %v13894_v60 = vld [vmem:[%s17860_s1 + $0xaf0] sm:$0xff]  }
 0x10d   :  { %12541 = vmatprep.subr.bf16.mxu0 %v13836_v37  ;;  %v13873_v37 = vld [vmem:[%s17860_s1 + $0x9d8] sm:$0xff]  }
 0x10e   :  { %12562 = vmatpush3.bf16.msra.mxu1 %v13835_v34  ;;  %9274 = vmatprep.mubr.bf16.mxu0 %v2220_v0  ;;  %v2230_v3 = vcombine.high %v2220_v0, %v2220_v0  ;;  %v13870_v34 = vld [vmem:[%s17860_s1 + $0x920] sm:$0xff]  }
 0x10f   :  { %12563 = vmatprep.subr.bf16.mxu1 %v13837_v39  ;;  %v13875_v39 = vld [vmem:[%s17860_s1 + $0x998] sm:$0xff]  }
 0x110   :  { %12542 = vmatpush3.bf16.msra.mxu0 %v13838_v42  ;;  %9314 = vmatprep.mubr.bf16.mxu1 %v2230_v3  ;;  %v13877_v42 = vld [vmem:[%s17860_s1 + $0x9d0] sm:$0xff]  }
 0x111   :  { %12543 = vmatprep.subr.bf16.mxu0 %v13840_v44  ;;  %v13879_v44 = vld [vmem:[%s17860_s1 + $0x990] sm:$0xff]  }
 0x112   :  { %12564 = vmatpush3.bf16.msra.mxu1 %v13839_v43  ;;  %v13878_v43 = vld [vmem:[%s17860_s1 + $0x910] sm:$0xff]  }
 0x113   :  { %12565 = vmatprep.subr.bf16.mxu1 %v13841_v45  ;;  %v13880_v45 = vld [vmem:[%s17860_s1 + $0x948] sm:$0xff]  }
 0x114   :  { %12544 = vmatpush3.bf16.msra.mxu0 %v13842_v46  ;;  %v13881_v46 = vld [vmem:[%s17860_s1 + $0x9c8] sm:$0xff]  }
 0x115   :  { %12545 = vmatprep.subr.bf16.mxu0 %v13844_v48  ;;  %v13883_v48 = vld [vmem:[%s17860_s1 + $0x988] sm:$0xff]  }
 0x116   :  { %12566 = vmatpush3.bf16.msra.mxu1 %v13843_v47  ;;  %v13882_v47 = vld [vmem:[%s17860_s1 + $0x908] sm:$0xff]  }
 0x117   :  { %12567 = vmatprep.subr.bf16.mxu1 %v13845_v49  ;;  %v13884_v49 = vld [vmem:[%s17860_s1 + $0x940] sm:$0xff]  }
 0x118   :  { %12546 = vmatpush3.bf16.msra.mxu0 %v13846_v50  ;;  %v13885_v50 = vld [vmem:[%s17860_s1 + $0x9c0] sm:$0xff]  }
 0x119   :  { %12547 = vmatprep.subr.bf16.mxu0 %v13848_v52  ;;  %v13887_v52 = vld [vmem:[%s17860_s1 + $0x980] sm:$0xff]  }
 0x11a   :  { %12568 = vmatpush3.bf16.msra.mxu1 %v13847_v51  ;;  %v13886_v51 = vld [vmem:[%s17860_s1 + $0x900] sm:$0xff]  }
 0x11b   :  { %12569 = vmatprep.subr.bf16.mxu1 %v13849_v53  ;;  %v2213_v53 = vrot.slane %v15541_v61, %v14720_v41 }
 0x11c   :  { %12548 = vmatpush3.bf16.msra.mxu0 %v13850_v55  ;;  %v13890_v55 = vld [vmem:[%s17860_s1 + $0xaf8] sm:$0xff]  }
 0x11d   :  { %12549 = vmatprep.subr.bf16.mxu0 %v13852_v59  ;;  %v13893_v59 = vld [vmem:[%s17860_s1 + $0xa70] sm:$0xff]  }
 0x11e   :  { %12570 = vmatpush3.bf16.msra.mxu1 %v13851_v58  ;;  %v2229_v58 = vcombine.high %v2213_v53, %v2213_v53 }
 0x11f   :  { %12571 = vmatprep.subr.bf16.mxu1 %v13853_v62  ;;  %v13895_v62 = vld [vmem:[%s17860_s1 + $0xa30] sm:$0xff]  }
 0x120   :  { %12550 = vmatpush3.bf16.msra.mxu0 %v13854_v63  ;;  %v13896_v63 = vld [vmem:[%s17860_s1 + $0xab0] sm:$0xff]  }
 0x121   :  { %12579 = vmatprep.subr.bf16.mxu0 %v13856_v5 }
 0x122   :  { %12572 = vmatpush3.bf16.msra.mxu1 %v13855_v2  ;;  %v13897_v2 = vld [vmem:[%s17860_s1 + $0xa68] sm:$0xff]  }
 0x123   :  { %v12287_v14 = vpop.f32.mrf.mxu0  ;;  %9275 = vmatmul.mubr.bf16.vlgmr.msra.gmra.mxu0 %v2206_v4  ;;  %12601 = vmatprep.subr.bf16.mxu1 %v13857_v6  ;;  %v13898_v4 = vld [vmem:[%s17860_s1 + $0xae8] sm:$0xff]  }
 0x124   :  { %12580 = vmatpush3.bf16.msra.mxu0 %v13858_v8  ;;  %9354 = vmatprep.mubr.bf16.mxu0 %v2227_v7  ;;  %v13899_v7 = vld [vmem:[%s17860_s1 + $0xa28] sm:$0xff]  }
 0x125   :  { %v12309_v17 = vpop.f32.mrf.mxu1  ;;  %9315 = vmatmul.mubr.bf16.vlgmr.msra.gmra.mxu1 %v2228_v10  ;;  %v12288_v18 = vpop.f32.mrf.mxu0  ;;  %12581 = vmatprep.subr.bf16.mxu0 %v13860_v11  ;;  %v13900_v10 = vld [vmem:[%s17860_s1 + $0xaa8] sm:$0xff]  }
 0x126   :  { %12602 = vmatpush3.bf16.msra.mxu1 %v13859_v9  ;;  %v12289_v20 = vadd.f32 %v12288_v18, %v12287_v14  ;;  %9394 = vmatprep.mubr.bf16.mxu1 %v2231_v13  ;;  %v13901_v13 = vld [vmem:[%s17860_s1 + $0xa60] sm:$0xff]  }
 0x127   :  { %v12310_v22 = vpop.f32.mrf.mxu1  ;;  %v12290_v23 = vpop.f32.mrf.mxu0  ;;  %12603 = vmatprep.subr.bf16.mxu1 %v13861_v12  ;;  %v13904_v18 = vld [vmem:[%s17860_s1 + $0xaa0] sm:$0xff]  }
 0x128   :  { %v8797_v25 = vadd.f32 %v12289_v20, %v15486_v38  ;;  %v12311_v26 = vadd.f32 %v12310_v22, %v12309_v17  ;;  %12582 = vmatpush3.bf16.msra.mxu0 %v13862_v15  ;;  %v13874_v38 = vld [vmem:[%s17860_s1 + $0x918] sm:$0xff]   ;;  %v13902_v15 = vld [vmem:[%s17860_s1 + $0xae0] sm:$0xff]   ;;  %v13909_v23 = vld [vmem:[%s17860_s1 + $0xa50] sm:$0xff]  }
 0x129   :  { %v12312_v28 = vpop.f32.mrf.mxu1  ;;  %v12291_v29 = vpop.f32.mrf.mxu0  ;;  %12583 = vmatprep.subr.bf16.mxu0 %v13864_v19  ;;  %v13903_v17 = vld [vmem:[%s17860_s1 + $0xa20] sm:$0xff]   ;;  %v13905_v19 = vld [vmem:[%s17860_s1 + $0xa58] sm:$0xff]  }
 0x12a   :  { %v15597_v31 = vadd.f32 %v12311_v26, %v8797_v25  ;;  %12604 = vmatpush3.bf16.msra.mxu1 %v13863_v16  ;;  %v13906_v20 = vld [vmem:[%s17860_s1 + $0xad8] sm:$0xff]   ;;  %v13911_v25 = vld [vmem:[%s17860_s1 + $0xa10] sm:$0xff]   ;;  %v13914_v28 = vld [vmem:[%s17860_s1 + $0xac8] sm:$0xff]  }
 0x12b   :  { %v12313_v33 = vpop.f32.mrf.mxu1  ;;  %12605 = vmatprep.subr.bf16.mxu1 %v13865_v21  ;;  %v13907_v21 = vld [vmem:[%s17860_s1 + $0xa18] sm:$0xff]   ;;  %v13912_v26 = vld [vmem:[%s17860_s1 + $0xa90] sm:$0xff]   ;;  %v13915_v29 = vld [vmem:[%s17860_s1 + $0xa08] sm:$0xff]  }
 0x12c   :  { %12584 = vmatpush3.bf16.msra.mxu0 %v13866_v24  ;;  %v13908_v22 = vld [vmem:[%s17860_s1 + $0xa98] sm:$0xff]   ;;  %v13910_v24 = vld [vmem:[%s17860_s1 + $0xad0] sm:$0xff]  }
 0x12d   :  { %12585 = vmatprep.subr.bf16.mxu0 %v13868_v30  ;;  %v35_v30 = vld [vmem:[%s17859_s0 + $0x28] sm:$0xff] }
 0x12e   :  { %12606 = vmatpush3.bf16.msra.mxu1 %v13867_v27  ;;  %v13913_v27 = vld [vmem:[%s17860_s1 + $0xa48] sm:$0xff]   ;;  %v2232_v33 = vcombine.high %v35_v30, %v35_v30 }
 0x12f   :  { %12607 = vmatprep.subr.bf16.mxu1 %v13869_v32  ;;  %v2239_v32 = vrot.slane %v35_v30, %v14720_v41  ;;  %v13955_v30 = vld [vmem:[%s17860_s1 + $0xcf8] sm:$0xff]  }
 0x130   :  { %12586 = vmatpush3.bf16.msra.mxu0 %v13870_v34  ;;  %v13917_v34 = vld [vmem:[%s17860_s1 + $0xa40] sm:$0xff]  }
 0x131   :  { %12587 = vmatprep.subr.bf16.mxu0 %v13872_v36  ;;  %v2247_v36 = vcombine.high %v2239_v32, %v2239_v32 }
 0x132   :  { %12608 = vmatpush3.bf16.msra.mxu1 %v13871_v35  ;;  %v13918_v35 = vld [vmem:[%s17860_s1 + $0xac0] sm:$0xff]  }
 0x133   :  { %12609 = vmatprep.subr.bf16.mxu1 %v13873_v37  ;;  %v15756_v37 = vrot.slane %v2232_v33, %v14720_v41 }
 0x134   :  { %12588 = vmatpush3.bf16.msra.mxu0 %v13874_v38  ;;  %v13919_v38 = vld [vmem:[%s17860_s1 + $0xa00] sm:$0xff]  }
 0x135   :  { %12589 = vmatprep.subr.bf16.mxu0 %v13876_v40  ;;  %v2269_v40 = vrot.slane %v2247_v36, %v14720_v41 }
 0x136   :  { %12610 = vmatpush3.bf16.msra.mxu1 %v13875_v39  ;;  %v13920_v39 = vld [vmem:[%s17860_s1 + $0xa80] sm:$0xff]  }
 0x137   :  { %12611 = vmatprep.subr.bf16.mxu1 %v13877_v42  ;;  %v2248_v42 = vcombine.high %v15756_v37, %v15756_v37 }
 0x138   :  { %12590 = vmatpush3.bf16.msra.mxu0 %v13878_v43  ;;  %v2255_v43 = vrot.slane %v2239_v32, %v14720_v41  ;;  %v13957_v32 = vld [vmem:[%s17860_s1 + $0xcb8] sm:$0xff]  }
 0x139   :  { %12591 = vmatprep.subr.bf16.mxu0 %v13880_v45  ;;  %v2279_v45 = vcombine.high %v2269_v40, %v2269_v40 }
 0x13a   :  { %12612 = vmatpush3.bf16.msra.mxu1 %v13879_v44  ;;  %v13921_v44 = vld [vmem:[%s17860_s1 + $0xb78] sm:$0xff]  }
 0x13b   :  { %12613 = vmatprep.subr.bf16.mxu1 %v13881_v46  ;;  %v13922_v46 = vld [vmem:[%s17860_s1 + $0xbf8] sm:$0xff]  }
 0x13c   :  { %12592 = vmatpush3.bf16.msra.mxu0 %v13882_v47  ;;  %v2276_v47 = vrot.slane %v2248_v42, %v14720_v41  ;;  %v13962_v42 = vld [vmem:[%s17860_s1 + $0xc68] sm:$0xff]  }
 0x13d   :  { %12593 = vmatprep.subr.bf16.mxu0 %v13884_v49  ;;  %v13924_v49 = vld [vmem:[%s17860_s1 + $0xbb8] sm:$0xff]  }
 0x13e   :  { %12614 = vmatpush3.bf16.msra.mxu1 %v13883_v48  ;;  %v13923_v48 = vld [vmem:[%s17860_s1 + $0xb38] sm:$0xff]  }
 0x13f   :  { %12615 = vmatprep.subr.bf16.mxu1 %v13885_v50  ;;  %v2277_v50 = vcombine.high %v2255_v43, %v2255_v43 }
 0x140   :  { %12594 = vmatpush3.bf16.msra.mxu0 %v13886_v51  ;;  %v13925_v51 = vld [vmem:[%s17860_s1 + $0xb70] sm:$0xff]  }
 0x141   :  { %12623 = vmatprep.subr.bf16.mxu0 %v13889_v54 }
 0x142   :  { %12616 = vmatpush3.bf16.msra.mxu1 %v13887_v52  ;;  %v13926_v52 = vld [vmem:[%s17860_s1 + $0xbf0] sm:$0xff]  }
 0x143   :  { %v12331_v61 = vpop.f32.mrf.mxu0  ;;  %9355 = vmatmul.mubr.bf16.vlgmr.msra.gmra.mxu0 %v2213_v53  ;;  %12645 = vmatprep.subr.bf16.mxu1 %v13890_v55  ;;  %v2280_v53 = vcombine.high %v2276_v47, %v2276_v47  ;;  %v13927_v55 = vld [vmem:[%s17860_s1 + $0xb30] sm:$0xff]  }
 0x144   :  { %12624 = vmatpush3.bf16.msra.mxu0 %v13891_v56  ;;  %9434 = vmatprep.mubr.bf16.mxu0 %v2269_v40  ;;  %v13928_v56 = vld [vmem:[%s17860_s1 + $0xbb0] sm:$0xff]  }
 0x145   :  { %v12353_v0 = vpop.f32.mrf.mxu1  ;;  %9395 = vmatmul.mubr.bf16.vlgmr.msra.gmra.mxu1 %v2229_v58  ;;  %v12332_v1 = vpop.f32.mrf.mxu0  ;;  %12625 = vmatprep.subr.bf16.mxu0 %v13893_v59  ;;  %v13929_v59 = vld [vmem:[%s17860_s1 + $0xb68] sm:$0xff]  }
 0x146   :  { %12646 = vmatpush3.bf16.msra.mxu1 %v13892_v57  ;;  %v12333_v3 = vadd.f32 %v12332_v1, %v12331_v61  ;;  %9474 = vmatprep.mubr.bf16.mxu1 %v2279_v45  ;;  %v13930_v61 = vld [vmem:[%s17860_s1 + $0xbe8] sm:$0xff]  }
 0x147   :  { %v12354_v5 = vpop.f32.mrf.mxu1  ;;  %v12334_v6 = vpop.f32.mrf.mxu0  ;;  %12647 = vmatprep.subr.bf16.mxu1 %v13894_v60 }
 0x148   :  { %v8877_v8 = vadd.f32 %v12333_v3, %v15597_v31  ;;  %v12355_v9 = vadd.f32 %v12354_v5, %v12353_v0  ;;  %12626 = vmatpush3.bf16.msra.mxu0 %v13895_v62  ;;  %v13916_v31 = vld [vmem:[%s17860_s1 + $0xa88] sm:$0xff]   ;;  %v13933_v6 = vld [vmem:[%s17860_s1 + $0xb60] sm:$0xff]  }
 0x149   :  { %v12356_v11 = vpop.f32.mrf.mxu1  ;;  %v12335_v12 = vpop.f32.mrf.mxu0  ;;  %12627 = vmatprep.subr.bf16.mxu0 %v13897_v2  ;;  %v13931_v0 = vld [vmem:[%s17860_s1 + $0xb28] sm:$0xff]  }
 0x14a   :  { %v15698_v14 = vadd.f32 %v12355_v9, %v8877_v8  ;;  %12648 = vmatpush3.bf16.msra.mxu1 %v13896_v63  ;;  %v13932_v3 = vld [vmem:[%s17860_s1 + $0xba8] sm:$0xff]   ;;  %v13934_v8 = vld [vmem:[%s17860_s1 + $0xbe0] sm:$0xff]   ;;  %v13937_v12 = vld [vmem:[%s17860_s1 + $0xb58] sm:$0xff]  }
 0x14b   :  { %v12357_v16 = vpop.f32.mrf.mxu1  ;;  %12649 = vmatprep.subr.bf16.mxu1 %v13898_v4  ;;  %v13936_v11 = vld [vmem:[%s17860_s1 + $0xba0] sm:$0xff]  }
 0x14c   :  { %12628 = vmatpush3.bf16.msra.mxu0 %v13899_v7  ;;  %v13941_v16 = vld [vmem:[%s17860_s1 + $0xb50] sm:$0xff]  }
 0x14d   :  { %12629 = vmatprep.subr.bf16.mxu0 %v13901_v13  ;;  %v13938_v13 = vld [vmem:[%s17860_s1 + $0xbd8] sm:$0xff]  }
 0x14e   :  { %12650 = vmatpush3.bf16.msra.mxu1 %v13900_v10  ;;  %v13935_v10 = vld [vmem:[%s17860_s1 + $0xb20] sm:$0xff]  }
 0x14f   :  { %12651 = vmatprep.subr.bf16.mxu1 %v13902_v15  ;;  %v13940_v15 = vld [vmem:[%s17860_s1 + $0xb98] sm:$0xff]  }
 0x150   :  { %12630 = vmatpush3.bf16.msra.mxu0 %v13903_v17  ;;  %v13942_v17 = vld [vmem:[%s17860_s1 + $0xbd0] sm:$0xff]  }
 0x151   :  { %12631 = vmatprep.subr.bf16.mxu0 %v13905_v19  ;;  %v13944_v19 = vld [vmem:[%s17860_s1 + $0xb90] sm:$0xff]  }
 0x152   :  { %12652 = vmatpush3.bf16.msra.mxu1 %v13904_v18  ;;  %v13943_v18 = vld [vmem:[%s17860_s1 + $0xb10] sm:$0xff]  }
 0x153   :  { %12653 = vmatprep.subr.bf16.mxu1 %v13906_v20  ;;  %v13945_v20 = vld [vmem:[%s17860_s1 + $0xb48] sm:$0xff]  }
 0x154   :  { %12632 = vmatpush3.bf16.msra.mxu0 %v13907_v21  ;;  %v13946_v21 = vld [vmem:[%s17860_s1 + $0xbc8] sm:$0xff]  }
 0x155   :  { %12633 = vmatprep.subr.bf16.mxu0 %v13909_v23  ;;  %v13948_v23 = vld [vmem:[%s17860_s1 + $0xb88] sm:$0xff]  }
 0x156   :  { %12654 = vmatpush3.bf16.msra.mxu1 %v13908_v22  ;;  %v13947_v22 = vld [vmem:[%s17860_s1 + $0xb08] sm:$0xff]  }
 0x157   :  { %12655 = vmatprep.subr.bf16.mxu1 %v13910_v24  ;;  %v13949_v24 = vld [vmem:[%s17860_s1 + $0xb40] sm:$0xff]  }
 0x158   :  { %12634 = vmatpush3.bf16.msra.mxu0 %v13911_v25  ;;  %v13950_v25 = vld [vmem:[%s17860_s1 + $0xbc0] sm:$0xff]  }
 0x159   :  { %12635 = vmatprep.subr.bf16.mxu0 %v13913_v27  ;;  %v13952_v27 = vld [vmem:[%s17860_s1 + $0xb80] sm:$0xff]  }
 0x15a   :  { %12656 = vmatpush3.bf16.msra.mxu1 %v13912_v26  ;;  %v13951_v26 = vld [vmem:[%s17860_s1 + $0xb00] sm:$0xff]  }
 0x15b   :  { %12657 = vmatprep.subr.bf16.mxu1 %v13914_v28  ;;  %v2262_v28 = vrot.slane %v15756_v37, %v14720_v41  ;;  %v13960_v37 = vld [vmem:[%s17860_s1 + $0xc30] sm:$0xff]  }
 0x15c   :  { %12636 = vmatpush3.bf16.msra.mxu0 %v13915_v29  ;;  %v13954_v29 = vld [vmem:[%s17860_s1 + $0xc78] sm:$0xff]  }
 0x15d   :  { %12637 = vmatprep.subr.bf16.mxu0 %v13917_v34  ;;  %v2278_v33 = vcombine.high %v2262_v28, %v2262_v28  ;;  %v13958_v34 = vld [vmem:[%s17860_s1 + $0xc70] sm:$0xff]  }
 0x15e   :  { %12658 = vmatpush3.bf16.msra.mxu1 %v13916_v31  ;;  %v13956_v31 = vld [vmem:[%s17860_s1 + $0xc38] sm:$0xff]  }
 0x15f   :  { %12659 = vmatprep.subr.bf16.mxu1 %v13918_v35  ;;  %v13959_v35 = vld [vmem:[%s17860_s1 + $0xcf0] sm:$0xff]  }
 0x160   :  { %12638 = vmatpush3.bf16.msra.mxu0 %v13919_v38  ;;  %v13961_v38 = vld [vmem:[%s17860_s1 + $0xcb0] sm:$0xff]  }
 0x161   :  { %12667 = vmatprep.subr.bf16.mxu0 %v13921_v44  ;;  %v13963_v44 = vld [vmem:[%s17860_s1 + $0xce8] sm:$0xff]  }
 0x162   :  { %12660 = vmatpush3.bf16.msra.mxu1 %v13920_v39 }
 0x163   :  { %v12375_v54 = vpop.f32.mrf.mxu0  ;;  %9435 = vmatmul.mubr.bf16.vlgmr.msra.gmra.mxu0 %v2255_v43  ;;  %12689 = vmatprep.subr.bf16.mxu1 %v13922_v46 }
 0x164   :  { %12668 = vmatpush3.bf16.msra.mxu0 %v13923_v48  ;;  %9514 = vmatprep.mubr.bf16.mxu0 %v2276_v47  ;;  %v13964_v47 = vld [vmem:[%s17860_s1 + $0xc28] sm:$0xff]  }
 0x165   :  { %v12397_v57 = vpop.f32.mrf.mxu1  ;;  %9475 = vmatmul.mubr.bf16.vlgmr.msra.gmra.mxu1 %v2277_v50  ;;  %v12376_v58 = vpop.f32.mrf.mxu0  ;;  %12669 = vmatprep.subr.bf16.mxu0 %v13925_v51  ;;  %v13965_v50 = vld [vmem:[%s17860_s1 + $0xca8] sm:$0xff]  }
 0x166   :  { %12690 = vmatpush3.bf16.msra.mxu1 %v13924_v49  ;;  %v12377_v60 = vadd.f32 %v12376_v58, %v12375_v54  ;;  %9554 = vmatprep.mubr.bf16.mxu1 %v2280_v53  ;;  %v13966_v53 = vld [vmem:[%s17860_s1 + $0xc60] sm:$0xff]  }
 0x167   :  { %v12398_v62 = vpop.f32.mrf.mxu1  ;;  %v12378_v63 = vpop.f32.mrf.mxu0  ;;  %12691 = vmatprep.subr.bf16.mxu1 %v13926_v52  ;;  %v13969_v58 = vld [vmem:[%s17860_s1 + $0xca0] sm:$0xff]  }
 0x168   :  { %v8957_v1 = vadd.f32 %v12377_v60, %v15698_v14  ;;  %v12399_v2 = vadd.f32 %v12398_v62, %v12397_v57  ;;  %12670 = vmatpush3.bf16.msra.mxu0 %v13927_v55  ;;  %v13939_v14 = vld [vmem:[%s17860_s1 + $0xb18] sm:$0xff]   ;;  %v13967_v55 = vld [vmem:[%s17860_s1 + $0xce0] sm:$0xff]   ;;  %v13974_v63 = vld [vmem:[%s17860_s1 + $0xc50] sm:$0xff]  }
 0x169   :  { %v12400_v4 = vpop.f32.mrf.mxu1  ;;  %v12379_v5 = vpop.f32.mrf.mxu0  ;;  %12671 = vmatprep.subr.bf16.mxu0 %v13929_v59  ;;  %v13968_v57 = vld [vmem:[%s17860_s1 + $0xc20] sm:$0xff]   ;;  %v13970_v59 = vld [vmem:[%s17860_s1 + $0xc58] sm:$0xff]  }
 0x16a   :  { %v15809_v7 = vadd.f32 %v12399_v2, %v8957_v1  ;;  %12692 = vmatpush3.bf16.msra.mxu1 %v13928_v56  ;;  %v13971_v60 = vld [vmem:[%s17860_s1 + $0xcd8] sm:$0xff]   ;;  %v13976_v1 = vld [vmem:[%s17860_s1 + $0xc10] sm:$0xff]   ;;  %v13979_v4 = vld [vmem:[%s17860_s1 + $0xcc8] sm:$0xff]  }
 0x16b   :  { %v12401_v9 = vpop.f32.mrf.mxu1  ;;  %12693 = vmatprep.subr.bf16.mxu1 %v13930_v61  ;;  %v13972_v61 = vld [vmem:[%s17860_s1 + $0xc18] sm:$0xff]   ;;  %v13977_v2 = vld [vmem:[%s17860_s1 + $0xc90] sm:$0xff]   ;;  %v13980_v5 = vld [vmem:[%s17860_s1 + $0xc08] sm:$0xff]  }
 0x16c   :  { %12672 = vmatpush3.bf16.msra.mxu0 %v13931_v0  ;;  %v13973_v62 = vld [vmem:[%s17860_s1 + $0xc98] sm:$0xff]   ;;  %v13975_v0 = vld [vmem:[%s17860_s1 + $0xcd0] sm:$0xff]  }
 0x16d   :  { %12673 = vmatprep.subr.bf16.mxu0 %v13933_v6  ;;  %v36_v6 = vld [vmem:[%s17859_s0 + $0x30] sm:$0xff] }
 0x16e   :  { %12694 = vmatpush3.bf16.msra.mxu1 %v13932_v3  ;;  %v13978_v3 = vld [vmem:[%s17860_s1 + $0xc48] sm:$0xff]   ;;  %v2281_v9 = vcombine.high %v36_v6, %v36_v6 }
 0x16f   :  { %12695 = vmatprep.subr.bf16.mxu1 %v13934_v8  ;;  %v2288_v8 = vrot.slane %v36_v6, %v14720_v41  ;;  %v14020_v6 = vld [vmem:[%s17860_s1 + $0xef8] sm:$0xff]  }
 0x170   :  { %12674 = vmatpush3.bf16.msra.mxu0 %v13935_v10  ;;  %v13982_v10 = vld [vmem:[%s17860_s1 + $0xc40] sm:$0xff]  }
 0x171   :  { %12675 = vmatprep.subr.bf16.mxu0 %v13937_v12  ;;  %v2296_v12 = vcombine.high %v2288_v8, %v2288_v8 }
 0x172   :  { %12696 = vmatpush3.bf16.msra.mxu1 %v13936_v11  ;;  %v13983_v11 = vld [vmem:[%s17860_s1 + $0xcc0] sm:$0xff]  }
 0x173   :  { %12697 = vmatprep.subr.bf16.mxu1 %v13938_v13  ;;  %v15968_v13 = vrot.slane %v2281_v9, %v14720_v41 }
 0x174   :  { %12676 = vmatpush3.bf16.msra.mxu0 %v13939_v14  ;;  %v13984_v14 = vld [vmem:[%s17860_s1 + $0xc00] sm:$0xff]  }
 0x175   :  { %12677 = vmatprep.subr.bf16.mxu0 %v13941_v16  ;;  %v2318_v16 = vrot.slane %v2296_v12, %v14720_v41 }
 0x176   :  { %12698 = vmatpush3.bf16.msra.mxu1 %v13940_v15  ;;  %v13985_v15 = vld [vmem:[%s17860_s1 + $0xc80] sm:$0xff]  }
 0x177   :  { %12699 = vmatprep.subr.bf16.mxu1 %v13942_v17  ;;  %v2297_v17 = vcombine.high %v15968_v13, %v15968_v13 }
 0x178   :  { %12678 = vmatpush3.bf16.msra.mxu0 %v13943_v18  ;;  %v2304_v18 = vrot.slane %v2288_v8, %v14720_v41  ;;  %v14022_v8 = vld [vmem:[%s17860_s1 + $0xeb8] sm:$0xff]  }
 0x179   :  { %12679 = vmatprep.subr.bf16.mxu0 %v13945_v20  ;;  %v2328_v20 = vcombine.high %v2318_v16, %v2318_v16 }
 0x17a   :  { %12700 = vmatpush3.bf16.msra.mxu1 %v13944_v19  ;;  %v13986_v19 = vld [vmem:[%s17860_s1 + $0xd78] sm:$0xff]  }
 0x17b   :  { %12701 = vmatprep.subr.bf16.mxu1 %v13946_v21  ;;  %v13987_v21 = vld [vmem:[%s17860_s1 + $0xdf8] sm:$0xff]  }
 0x17c   :  { %12680 = vmatpush3.bf16.msra.mxu0 %v13947_v22  ;;  %v2325_v22 = vrot.slane %v2297_v17, %v14720_v41  ;;  %v14027_v17 = vld [vmem:[%s17860_s1 + $0xe68] sm:$0xff]  }
 0x17d   :  { %12681 = vmatprep.subr.bf16.mxu0 %v13949_v24  ;;  %v13989_v24 = vld [vmem:[%s17860_s1 + $0xdb8] sm:$0xff]  }
 0x17e   :  { %12702 = vmatpush3.bf16.msra.mxu1 %v13948_v23  ;;  %v13988_v23 = vld [vmem:[%s17860_s1 + $0xd38] sm:$0xff]  }
 0x17f   :  { %12703 = vmatprep.subr.bf16.mxu1 %v13950_v25  ;;  %v2326_v25 = vcombine.high %v2304_v18, %v2304_v18 }
 0x180   :  { %12682 = vmatpush3.bf16.msra.mxu0 %v13951_v26  ;;  %v13990_v26 = vld [vmem:[%s17860_s1 + $0xd70] sm:$0xff]  }
 0x181   :  { %12711 = vmatprep.subr.bf16.mxu0 %v13954_v29 }
 0x182   :  { %12704 = vmatpush3.bf16.msra.mxu1 %v13952_v27  ;;  %v13991_v27 = vld [vmem:[%s17860_s1 + $0xdf0] sm:$0xff]  }
 0x183   :  { %v12419_v36 = vpop.f32.mrf.mxu0  ;;  %9515 = vmatmul.mubr.bf16.vlgmr.msra.gmra.mxu0 %v2262_v28  ;;  %12733 = vmatprep.subr.bf16.mxu1 %v13955_v30  ;;  %v2329_v28 = vcombine.high %v2325_v22, %v2325_v22  ;;  %v13992_v30 = vld [vmem:[%s17860_s1 + $0xd30] sm:$0xff]  }
 0x184   :  { %12712 = vmatpush3.bf16.msra.mxu0 %v13956_v31  ;;  %9594 = vmatprep.mubr.bf16.mxu0 %v2318_v16  ;;  %v13993_v31 = vld [vmem:[%s17860_s1 + $0xdb0] sm:$0xff]  }
 0x185   :  { %v12441_v39 = vpop.f32.mrf.mxu1  ;;  %9555 = vmatmul.mubr.bf16.vlgmr.msra.gmra.mxu1 %v2278_v33  ;;  %v12420_v40 = vpop.f32.mrf.mxu0  ;;  %12713 = vmatprep.subr.bf16.mxu0 %v13958_v34  ;;  %v13994_v34 = vld [vmem:[%s17860_s1 + $0xd68] sm:$0xff]  }
 0x186   :  { %12734 = vmatpush3.bf16.msra.mxu1 %v13957_v32  ;;  %v12421_v43 = vadd.f32 %v12420_v40, %v12419_v36  ;;  %9634 = vmatprep.mubr.bf16.mxu1 %v2328_v20  ;;  %v13995_v36 = vld [vmem:[%s17860_s1 + $0xde8] sm:$0xff]  }
 0x187   :  { %v12442_v45 = vpop.f32.mrf.mxu1  ;;  %v12422_v46 = vpop.f32.mrf.mxu0  ;;  %12735 = vmatprep.subr.bf16.mxu1 %v13959_v35 }
 0x188   :  { %v9037_v48 = vadd.f32 %v12421_v43, %v15809_v7  ;;  %v12443_v49 = vadd.f32 %v12442_v45, %v12441_v39  ;;  %12714 = vmatpush3.bf16.msra.mxu0 %v13960_v37  ;;  %v13981_v7 = vld [vmem:[%s17860_s1 + $0xc88] sm:$0xff]   ;;  %v13998_v46 = vld [vmem:[%s17860_s1 + $0xd60] sm:$0xff]  }
 0x189   :  { %v12444_v51 = vpop.f32.mrf.mxu1  ;;  %v12423_v52 = vpop.f32.mrf.mxu0  ;;  %12715 = vmatprep.subr.bf16.mxu0 %v13962_v42  ;;  %v13996_v39 = vld [vmem:[%s17860_s1 + $0xd28] sm:$0xff]  }
 0x18a   :  { %v15910_v54 = vadd.f32 %v12443_v49, %v9037_v48  ;;  %12736 = vmatpush3.bf16.msra.mxu1 %v13961_v38  ;;  %v13997_v43 = vld [vmem:[%s17860_s1 + $0xda8] sm:$0xff]   ;;  %v13999_v48 = vld [vmem:[%s17860_s1 + $0xde0] sm:$0xff]   ;;  %v14002_v52 = vld [vmem:[%s17860_s1 + $0xd58] sm:$0xff]  }
 0x18b   :  { %v12445_v56 = vpop.f32.mrf.mxu1  ;;  %12737 = vmatprep.subr.bf16.mxu1 %v13963_v44  ;;  %v14001_v51 = vld [vmem:[%s17860_s1 + $0xda0] sm:$0xff]  }
 0x18c   :  { %12716 = vmatpush3.bf16.msra.mxu0 %v13964_v47  ;;  %v14006_v56 = vld [vmem:[%s17860_s1 + $0xd50] sm:$0xff]  }
 0x18d   :  { %12717 = vmatprep.subr.bf16.mxu0 %v13966_v53  ;;  %v14003_v53 = vld [vmem:[%s17860_s1 + $0xdd8] sm:$0xff]  }
 0x18e   :  { %12738 = vmatpush3.bf16.msra.mxu1 %v13965_v50  ;;  %v14000_v50 = vld [vmem:[%s17860_s1 + $0xd20] sm:$0xff]  }
 0x18f   :  { %12739 = vmatprep.subr.bf16.mxu1 %v13967_v55  ;;  %v14005_v55 = vld [vmem:[%s17860_s1 + $0xd98] sm:$0xff]  }
 0x190   :  { %12718 = vmatpush3.bf16.msra.mxu0 %v13968_v57  ;;  %v14007_v57 = vld [vmem:[%s17860_s1 + $0xdd0] sm:$0xff]  }
 0x191   :  { %12719 = vmatprep.subr.bf16.mxu0 %v13970_v59  ;;  %v14009_v59 = vld [vmem:[%s17860_s1 + $0xd90] sm:$0xff]  }
 0x192   :  { %12740 = vmatpush3.bf16.msra.mxu1 %v13969_v58  ;;  %v14008_v58 = vld [vmem:[%s17860_s1 + $0xd10] sm:$0xff]  }
 0x193   :  { %12741 = vmatprep.subr.bf16.mxu1 %v13971_v60  ;;  %v14010_v60 = vld [vmem:[%s17860_s1 + $0xd48] sm:$0xff]  }
 0x194   :  { %12720 = vmatpush3.bf16.msra.mxu0 %v13972_v61  ;;  %v14011_v61 = vld [vmem:[%s17860_s1 + $0xdc8] sm:$0xff]  }
 0x195   :  { %12721 = vmatprep.subr.bf16.mxu0 %v13974_v63  ;;  %v14013_v63 = vld [vmem:[%s17860_s1 + $0xd88] sm:$0xff]  }
 0x196   :  { %12742 = vmatpush3.bf16.msra.mxu1 %v13973_v62  ;;  %v14012_v62 = vld [vmem:[%s17860_s1 + $0xd08] sm:$0xff]  }
 0x197   :  { %12743 = vmatprep.subr.bf16.mxu1 %v13975_v0  ;;  %v14014_v0 = vld [vmem:[%s17860_s1 + $0xd40] sm:$0xff]  }
 0x198   :  { %12722 = vmatpush3.bf16.msra.mxu0 %v13976_v1  ;;  %v14015_v1 = vld [vmem:[%s17860_s1 + $0xdc0] sm:$0xff]  }
 0x199   :  { %12723 = vmatprep.subr.bf16.mxu0 %v13978_v3  ;;  %v14017_v3 = vld [vmem:[%s17860_s1 + $0xd80] sm:$0xff]  }
 0x19a   :  { %12744 = vmatpush3.bf16.msra.mxu1 %v13977_v2  ;;  %v14016_v2 = vld [vmem:[%s17860_s1 + $0xd00] sm:$0xff]  }
 0x19b   :  { %12745 = vmatprep.subr.bf16.mxu1 %v13979_v4  ;;  %v2311_v4 = vrot.slane %v15968_v13, %v14720_v41  ;;  %v14025_v13 = vld [vmem:[%s17860_s1 + $0xe30] sm:$0xff]  }
 0x19c   :  { %12724 = vmatpush3.bf16.msra.mxu0 %v13980_v5  ;;  %v14019_v5 = vld [vmem:[%s17860_s1 + $0xe78] sm:$0xff]  }
 0x19d   :  { %12725 = vmatprep.subr.bf16.mxu0 %v13982_v10  ;;  %v2327_v9 = vcombine.high %v2311_v4, %v2311_v4  ;;  %v14023_v10 = vld [vmem:[%s17860_s1 + $0xe70] sm:$0xff]  }
 0x19e   :  { %12746 = vmatpush3.bf16.msra.mxu1 %v13981_v7  ;;  %v14021_v7 = vld [vmem:[%s17860_s1 + $0xe38] sm:$0xff]  }
 0x19f   :  { %12747 = vmatprep.subr.bf16.mxu1 %v13983_v11  ;;  %v14024_v11 = vld [vmem:[%s17860_s1 + $0xef0] sm:$0xff]  }
 0x1a0   :  { %12726 = vmatpush3.bf16.msra.mxu0 %v13984_v14  ;;  %v14026_v14 = vld [vmem:[%s17860_s1 + $0xeb0] sm:$0xff]  }
 0x1a1   :  { %12755 = vmatprep.subr.bf16.mxu0 %v13986_v19  ;;  %v14028_v19 = vld [vmem:[%s17860_s1 + $0xee8] sm:$0xff]  }
 0x1a2   :  { %12748 = vmatpush3.bf16.msra.mxu1 %v13985_v15 }
 0x1a3   :  { %v12463_v29 = vpop.f32.mrf.mxu0  ;;  %9595 = vmatmul.mubr.bf16.vlgmr.msra.gmra.mxu0 %v2304_v18  ;;  %12777 = vmatprep.subr.bf16.mxu1 %v13987_v21 }
 0x1a4   :  { %12756 = vmatpush3.bf16.msra.mxu0 %v13988_v23  ;;  %9674 = vmatprep.mubr.bf16.mxu0 %v2325_v22  ;;  %v14029_v22 = vld [vmem:[%s17860_s1 + $0xe28] sm:$0xff]  }
 0x1a5   :  { %v12485_v32 = vpop.f32.mrf.mxu1  ;;  %9635 = vmatmul.mubr.bf16.vlgmr.msra.gmra.mxu1 %v2326_v25  ;;  %v12464_v33 = vpop.f32.mrf.mxu0  ;;  %12757 = vmatprep.subr.bf16.mxu0 %v13990_v26  ;;  %v14030_v25 = vld [vmem:[%s17860_s1 + $0xea8] sm:$0xff]  }
 0x1a6   :  { %12778 = vmatpush3.bf16.msra.mxu1 %v13989_v24  ;;  %v12465_v35 = vadd.f32 %v12464_v33, %v12463_v29  ;;  %9714 = vmatprep.mubr.bf16.mxu1 %v2329_v28  ;;  %v14031_v28 = vld [vmem:[%s17860_s1 + $0xe60] sm:$0xff]  }
 0x1a7   :  { %v12486_v37 = vpop.f32.mrf.mxu1  ;;  %v12466_v38 = vpop.f32.mrf.mxu0  ;;  %12779 = vmatprep.subr.bf16.mxu1 %v13991_v27  ;;  %v14034_v33 = vld [vmem:[%s17860_s1 + $0xea0] sm:$0xff]  }
 0x1a8   :  { %v9117_v40 = vadd.f32 %v12465_v35, %v15910_v54  ;;  %v12487_v42 = vadd.f32 %v12486_v37, %v12485_v32  ;;  %12758 = vmatpush3.bf16.msra.mxu0 %v13992_v30  ;;  %v14004_v54 = vld [vmem:[%s17860_s1 + $0xd18] sm:$0xff]   ;;  %v14032_v30 = vld [vmem:[%s17860_s1 + $0xee0] sm:$0xff]   ;;  %v14039_v38 = vld [vmem:[%s17860_s1 + $0xe50] sm:$0xff]  }
 0x1a9   :  { %v12488_v44 = vpop.f32.mrf.mxu1  ;;  %v12467_v45 = vpop.f32.mrf.mxu0  ;;  %12759 = vmatprep.subr.bf16.mxu0 %v13994_v34  ;;  %v14033_v32 = vld [vmem:[%s17860_s1 + $0xe20] sm:$0xff]   ;;  %v14035_v34 = vld [vmem:[%s17860_s1 + $0xe58] sm:$0xff]  }
 0x1aa   :  { %v16021_v47 = vadd.f32 %v12487_v42, %v9117_v40  ;;  %12780 = vmatpush3.bf16.msra.mxu1 %v13993_v31  ;;  %v14036_v35 = vld [vmem:[%s17860_s1 + $0xed8] sm:$0xff]   ;;  %v14041_v40 = vld [vmem:[%s17860_s1 + $0xe10] sm:$0xff]   ;;  %v14044_v44 = vld [vmem:[%s17860_s1 + $0xec8] sm:$0xff]  }
 0x1ab   :  { %v12489_v49 = vpop.f32.mrf.mxu1  ;;  %12781 = vmatprep.subr.bf16.mxu1 %v13995_v36  ;;  %v14037_v36 = vld [vmem:[%s17860_s1 + $0xe18] sm:$0xff]   ;;  %v14042_v42 = vld [vmem:[%s17860_s1 + $0xe90] sm:$0xff]   ;;  %v14045_v45 = vld [vmem:[%s17860_s1 + $0xe08] sm:$0xff]  }
 0x1ac   :  { %12760 = vmatpush3.bf16.msra.mxu0 %v13996_v39  ;;  %v14038_v37 = vld [vmem:[%s17860_s1 + $0xe98] sm:$0xff]   ;;  %v14040_v39 = vld [vmem:[%s17860_s1 + $0xed0] sm:$0xff]  }
 0x1ad   :  { %12761 = vmatprep.subr.bf16.mxu0 %v13998_v46  ;;  %v37_v46 = vld [vmem:[%s17859_s0 + $0x38] sm:$0xff] }
 0x1ae   :  { %12782 = vmatpush3.bf16.msra.mxu1 %v13997_v43  ;;  %v14043_v43 = vld [vmem:[%s17860_s1 + $0xe48] sm:$0xff]   ;;  %v2330_v49 = vcombine.high %v37_v46, %v37_v46 }
 0x1af   :  { %12783 = vmatprep.subr.bf16.mxu1 %v13999_v48  ;;  %v2337_v48 = vrot.slane %v37_v46, %v14720_v41  ;;  %v14085_v46 = vld [vmem:[%s17860_s1 + $0x10f8] sm:$0xff]  }
 0x1b0   :  { %12762 = vmatpush3.bf16.msra.mxu0 %v14000_v50  ;;  %v14047_v50 = vld [vmem:[%s17860_s1 + $0xe40] sm:$0xff]  }
 0x1b1   :  { %12763 = vmatprep.subr.bf16.mxu0 %v14002_v52  ;;  %v2345_v52 = vcombine.high %v2337_v48, %v2337_v48 }
 0x1b2   :  { %12784 = vmatpush3.bf16.msra.mxu1 %v14001_v51  ;;  %v14048_v51 = vld [vmem:[%s17860_s1 + $0xec0] sm:$0xff]  }
 0x1b3   :  { %12785 = vmatprep.subr.bf16.mxu1 %v14003_v53  ;;  %v16180_v53 = vrot.slane %v2330_v49, %v14720_v41 }
 0x1b4   :  { %12764 = vmatpush3.bf16.msra.mxu0 %v14004_v54  ;;  %v14049_v54 = vld [vmem:[%s17860_s1 + $0xe00] sm:$0xff]  }
 0x1b5   :  { %12765 = vmatprep.subr.bf16.mxu0 %v14006_v56  ;;  %v2367_v56 = vrot.slane %v2345_v52, %v14720_v41 }
 0x1b6   :  { %12786 = vmatpush3.bf16.msra.mxu1 %v14005_v55  ;;  %v14050_v55 = vld [vmem:[%s17860_s1 + $0xe80] sm:$0xff]  }
 0x1b7   :  { %12787 = vmatprep.subr.bf16.mxu1 %v14007_v57  ;;  %v2346_v57 = vcombine.high %v16180_v53, %v16180_v53 }
 0x1b8   :  { %12766 = vmatpush3.bf16.msra.mxu0 %v14008_v58  ;;  %v2353_v58 = vrot.slane %v2337_v48, %v14720_v41  ;;  %v14087_v48 = vld [vmem:[%s17860_s1 + $0x10b8] sm:$0xff]  }
 0x1b9   :  { %12767 = vmatprep.subr.bf16.mxu0 %v14010_v60  ;;  %v2377_v60 = vcombine.high %v2367_v56, %v2367_v56 }
 0x1ba   :  { %12788 = vmatpush3.bf16.msra.mxu1 %v14009_v59  ;;  %v14051_v59 = vld [vmem:[%s17860_s1 + $0xf78] sm:$0xff]  }
 0x1bb   :  { %12789 = vmatprep.subr.bf16.mxu1 %v14011_v61  ;;  %v14052_v61 = vld [vmem:[%s17860_s1 + $0xff8] sm:$0xff]  }
 0x1bc   :  { %12768 = vmatpush3.bf16.msra.mxu0 %v14012_v62  ;;  %v2374_v62 = vrot.slane %v2346_v57, %v14720_v41  ;;  %v14092_v57 = vld [vmem:[%s17860_s1 + $0x1068] sm:$0xff]  }
 0x1bd   :  { %12769 = vmatprep.subr.bf16.mxu0 %v14014_v0  ;;  %v14054_v0 = vld [vmem:[%s17860_s1 + $0xfb8] sm:$0xff]  }
 0x1be   :  { %12790 = vmatpush3.bf16.msra.mxu1 %v14013_v63  ;;  %v14053_v63 = vld [vmem:[%s17860_s1 + $0xf38] sm:$0xff]  }
 0x1bf   :  { %12791 = vmatprep.subr.bf16.mxu1 %v14015_v1  ;;  %v2375_v1 = vcombine.high %v2353_v58, %v2353_v58 }
 0x1c0   :  { %12770 = vmatpush3.bf16.msra.mxu0 %v14016_v2  ;;  %v14055_v2 = vld [vmem:[%s17860_s1 + $0xf70] sm:$0xff]  }
 0x1c1   :  { %12799 = vmatprep.subr.bf16.mxu0 %v14019_v5 }
 0x1c2   :  { %12792 = vmatpush3.bf16.msra.mxu1 %v14017_v3  ;;  %v14056_v3 = vld [vmem:[%s17860_s1 + $0xff0] sm:$0xff]  }
 0x1c3   :  { %v12507_v12 = vpop.f32.mrf.mxu0  ;;  %9675 = vmatmul.mubr.bf16.vlgmr.msra.gmra.mxu0 %v2311_v4  ;;  %12821 = vmatprep.subr.bf16.mxu1 %v14020_v6  ;;  %v2378_v4 = vcombine.high %v2374_v62, %v2374_v62  ;;  %v14057_v6 = vld [vmem:[%s17860_s1 + $0xf30] sm:$0xff]  }
 0x1c4   :  { %12800 = vmatpush3.bf16.msra.mxu0 %v14021_v7  ;;  %9754 = vmatprep.mubr.bf16.mxu0 %v2367_v56  ;;  %v14058_v7 = vld [vmem:[%s17860_s1 + $0xfb0] sm:$0xff]  }
 0x1c5   :  { %v12529_v15 = vpop.f32.mrf.mxu1  ;;  %9715 = vmatmul.mubr.bf16.vlgmr.msra.gmra.mxu1 %v2327_v9  ;;  %v12508_v16 = vpop.f32.mrf.mxu0  ;;  %12801 = vmatprep.subr.bf16.mxu0 %v14023_v10  ;;  %v14059_v10 = vld [vmem:[%s17860_s1 + $0xf68] sm:$0xff]  }
 0x1c6   :  { %12822 = vmatpush3.bf16.msra.mxu1 %v14022_v8  ;;  %v12509_v18 = vadd.f32 %v12508_v16, %v12507_v12  ;;  %9794 = vmatprep.mubr.bf16.mxu1 %v2377_v60  ;;  %v14060_v12 = vld [vmem:[%s17860_s1 + $0xfe8] sm:$0xff]  }
 0x1c7   :  { %v12530_v20 = vpop.f32.mrf.mxu1  ;;  %v12510_v21 = vpop.f32.mrf.mxu0  ;;  %12823 = vmatprep.subr.bf16.mxu1 %v14024_v11 }
 0x1c8   :  { %v9197_v23 = vadd.f32 %v12509_v18, %v16021_v47  ;;  %v12531_v24 = vadd.f32 %v12530_v20, %v12529_v15  ;;  %12802 = vmatpush3.bf16.msra.mxu0 %v14025_v13  ;;  %v14046_v47 = vld [vmem:[%s17860_s1 + $0xe88] sm:$0xff]   ;;  %v14063_v21 = vld [vmem:[%s17860_s1 + $0xf60] sm:$0xff]  }
 0x1c9   :  { %v12532_v26 = vpop.f32.mrf.mxu1  ;;  %v12511_v27 = vpop.f32.mrf.mxu0  ;;  %12803 = vmatprep.subr.bf16.mxu0 %v14027_v17  ;;  %v14061_v15 = vld [vmem:[%s17860_s1 + $0xf28] sm:$0xff]  }
 0x1ca   :  { %v16122_v29 = vadd.f32 %v12531_v24, %v9197_v23  ;;  %12824 = vmatpush3.bf16.msra.mxu1 %v14026_v14  ;;  %v14062_v18 = vld [vmem:[%s17860_s1 + $0xfa8] sm:$0xff]   ;;  %v14064_v23 = vld [vmem:[%s17860_s1 + $0xfe0] sm:$0xff]   ;;  %v14067_v27 = vld [vmem:[%s17860_s1 + $0xf58] sm:$0xff]  }
 0x1cb   :  { %v12533_v31 = vpop.f32.mrf.mxu1  ;;  %12825 = vmatprep.subr.bf16.mxu1 %v14028_v19  ;;  %v14066_v26 = vld [vmem:[%s17860_s1 + $0xfa0] sm:$0xff]  }
 0x1cc   :  { %12804 = vmatpush3.bf16.msra.mxu0 %v14029_v22  ;;  %v14071_v31 = vld [vmem:[%s17860_s1 + $0xf50] sm:$0xff]  }
 0x1cd   :  { %12805 = vmatprep.subr.bf16.mxu0 %v14031_v28  ;;  %v14068_v28 = vld [vmem:[%s17860_s1 + $0xfd8] sm:$0xff]  }
 0x1ce   :  { %12826 = vmatpush3.bf16.msra.mxu1 %v14030_v25  ;;  %v14065_v25 = vld [vmem:[%s17860_s1 + $0xf20] sm:$0xff]  }
 0x1cf   :  { %12827 = vmatprep.subr.bf16.mxu1 %v14032_v30  ;;  %v14070_v30 = vld [vmem:[%s17860_s1 + $0xf98] sm:$0xff]  }
 0x1d0   :  { %12806 = vmatpush3.bf16.msra.mxu0 %v14033_v32  ;;  %v14072_v32 = vld [vmem:[%s17860_s1 + $0xfd0] sm:$0xff]  }
 0x1d1   :  { %12807 = vmatprep.subr.bf16.mxu0 %v14035_v34  ;;  %v14074_v34 = vld [vmem:[%s17860_s1 + $0xf90] sm:$0xff]  }
 0x1d2   :  { %12828 = vmatpush3.bf16.msra.mxu1 %v14034_v33  ;;  %v14073_v33 = vld [vmem:[%s17860_s1 + $0xf10] sm:$0xff]  }
 0x1d3   :  { %12829 = vmatprep.subr.bf16.mxu1 %v14036_v35  ;;  %v14075_v35 = vld [vmem:[%s17860_s1 + $0xf48] sm:$0xff]  }
 0x1d4   :  { %12808 = vmatpush3.bf16.msra.mxu0 %v14037_v36  ;;  %v14076_v36 = vld [vmem:[%s17860_s1 + $0xfc8] sm:$0xff]  }
 0x1d5   :  { %12809 = vmatprep.subr.bf16.mxu0 %v14039_v38  ;;  %v14078_v38 = vld [vmem:[%s17860_s1 + $0xf88] sm:$0xff]  }
 0x1d6   :  { %12830 = vmatpush3.bf16.msra.mxu1 %v14038_v37  ;;  %v14077_v37 = vld [vmem:[%s17860_s1 + $0xf08] sm:$0xff]  }
 0x1d7   :  { %12831 = vmatprep.subr.bf16.mxu1 %v14040_v39  ;;  %v14079_v39 = vld [vmem:[%s17860_s1 + $0xf40] sm:$0xff]  }
 0x1d8   :  { %12810 = vmatpush3.bf16.msra.mxu0 %v14041_v40  ;;  %v14080_v40 = vld [vmem:[%s17860_s1 + $0xfc0] sm:$0xff]  }
 0x1d9   :  { %12811 = vmatprep.subr.bf16.mxu0 %v14043_v43  ;;  %v14082_v43 = vld [vmem:[%s17860_s1 + $0xf80] sm:$0xff]  }
 0x1da   :  { %12832 = vmatpush3.bf16.msra.mxu1 %v14042_v42  ;;  %v14081_v42 = vld [vmem:[%s17860_s1 + $0xf00] sm:$0xff]  }
 0x1db   :  { %12833 = vmatprep.subr.bf16.mxu1 %v14044_v44  ;;  %v2360_v44 = vrot.slane %v16180_v53, %v14720_v41  ;;  %v14090_v53 = vld [vmem:[%s17860_s1 + $0x1030] sm:$0xff]  }
 0x1dc   :  { %12812 = vmatpush3.bf16.msra.mxu0 %v14045_v45  ;;  %v14084_v45 = vld [vmem:[%s17860_s1 + $0x1078] sm:$0xff]  }
 0x1dd   :  { %12813 = vmatprep.subr.bf16.mxu0 %v14047_v50  ;;  %v2376_v49 = vcombine.high %v2360_v44, %v2360_v44  ;;  %v14088_v50 = vld [vmem:[%s17860_s1 + $0x1070] sm:$0xff]  }
 0x1de   :  { %12834 = vmatpush3.bf16.msra.mxu1 %v14046_v47  ;;  %v14086_v47 = vld [vmem:[%s17860_s1 + $0x1038] sm:$0xff]  }
 0x1df   :  { %12835 = vmatprep.subr.bf16.mxu1 %v14048_v51  ;;  %v14089_v51 = vld [vmem:[%s17860_s1 + $0x10f0] sm:$0xff]  }
 0x1e0   :  { %12814 = vmatpush3.bf16.msra.mxu0 %v14049_v54  ;;  %v14091_v54 = vld [vmem:[%s17860_s1 + $0x10b0] sm:$0xff]  }
 0x1e1   :  { %12843 = vmatprep.subr.bf16.mxu0 %v14051_v59  ;;  %v14093_v59 = vld [vmem:[%s17860_s1 + $0x10e8] sm:$0xff]  }
 0x1e2   :  { %12836 = vmatpush3.bf16.msra.mxu1 %v14050_v55 }
 0x1e3   :  { %v12551_v5 = vpop.f32.mrf.mxu0  ;;  %9755 = vmatmul.mubr.bf16.vlgmr.msra.gmra.mxu0 %v2353_v58  ;;  %12865 = vmatprep.subr.bf16.mxu1 %v14052_v61 }
 0x1e4   :  { %12844 = vmatpush3.bf16.msra.mxu0 %v14053_v63  ;;  %9834 = vmatprep.mubr.bf16.mxu0 %v2374_v62  ;;  %v14094_v62 = vld [vmem:[%s17860_s1 + $0x1028] sm:$0xff]  }
 0x1e5   :  { %v12573_v8 = vpop.f32.mrf.mxu1  ;;  %9795 = vmatmul.mubr.bf16.vlgmr.msra.gmra.mxu1 %v2375_v1  ;;  %v12552_v9 = vpop.f32.mrf.mxu0  ;;  %12845 = vmatprep.subr.bf16.mxu0 %v14055_v2  ;;  %v14095_v1 = vld [vmem:[%s17860_s1 + $0x10a8] sm:$0xff]  }
 0x1e6   :  { %12866 = vmatpush3.bf16.msra.mxu1 %v14054_v0  ;;  %v12553_v11 = vadd.f32 %v12552_v9, %v12551_v5  ;;  %9874 = vmatprep.mubr.bf16.mxu1 %v2378_v4  ;;  %v14096_v4 = vld [vmem:[%s17860_s1 + $0x1060] sm:$0xff]  }
 0x1e7   :  { %v12574_v13 = vpop.f32.mrf.mxu1  ;;  %v12554_v14 = vpop.f32.mrf.mxu0  ;;  %12867 = vmatprep.subr.bf16.mxu1 %v14056_v3  ;;  %v14099_v9 = vld [vmem:[%s17860_s1 + $0x10a0] sm:$0xff]  }
 0x1e8   :  { %v9277_v16 = vadd.f32 %v12553_v11, %v16122_v29  ;;  %v12575_v17 = vadd.f32 %v12574_v13, %v12573_v8  ;;  %12846 = vmatpush3.bf16.msra.mxu0 %v14057_v6  ;;  %v14069_v29 = vld [vmem:[%s17860_s1 + $0xf18] sm:$0xff]   ;;  %v14097_v6 = vld [vmem:[%s17860_s1 + $0x10e0] sm:$0xff]   ;;  %v14104_v14 = vld [vmem:[%s17860_s1 + $0x1050] sm:$0xff]  }
 0x1e9   :  { %v12576_v19 = vpop.f32.mrf.mxu1  ;;  %v12555_v20 = vpop.f32.mrf.mxu0  ;;  %12847 = vmatprep.subr.bf16.mxu0 %v14059_v10  ;;  %v14098_v8 = vld [vmem:[%s17860_s1 + $0x1020] sm:$0xff]   ;;  %v14100_v10 = vld [vmem:[%s17860_s1 + $0x1058] sm:$0xff]  }
 0x1ea   :  { %v16233_v22 = vadd.f32 %v12575_v17, %v9277_v16  ;;  %12868 = vmatpush3.bf16.msra.mxu1 %v14058_v7  ;;  %v14101_v11 = vld [vmem:[%s17860_s1 + $0x10d8] sm:$0xff]   ;;  %v14106_v16 = vld [vmem:[%s17860_s1 + $0x1010] sm:$0xff]   ;;  %v14109_v19 = vld [vmem:[%s17860_s1 + $0x10c8] sm:$0xff]  }
 0x1eb   :  { %v12577_v24 = vpop.f32.mrf.mxu1  ;;  %12869 = vmatprep.subr.bf16.mxu1 %v14060_v12  ;;  %v14102_v12 = vld [vmem:[%s17860_s1 + $0x1018] sm:$0xff]   ;;  %v14107_v17 = vld [vmem:[%s17860_s1 + $0x1090] sm:$0xff]   ;;  %v14110_v20 = vld [vmem:[%s17860_s1 + $0x1008] sm:$0xff]  }
 0x1ec   :  { %12848 = vmatpush3.bf16.msra.mxu0 %v14061_v15  ;;  %v14103_v13 = vld [vmem:[%s17860_s1 + $0x1098] sm:$0xff]   ;;  %v14105_v15 = vld [vmem:[%s17860_s1 + $0x10d0] sm:$0xff]  }
 0x1ed   :  { %12849 = vmatprep.subr.bf16.mxu0 %v14063_v21  ;;  %v14111_v21 = vld [vmem:[%s17860_s1 + $0x1088] sm:$0xff]  }
 0x1ee   :  { %12870 = vmatpush3.bf16.msra.mxu1 %v14062_v18  ;;  %v14108_v18 = vld [vmem:[%s17860_s1 + $0x1048] sm:$0xff]  }
 0x1ef   :  { %12871 = vmatprep.subr.bf16.mxu1 %v14064_v23  ;;  %v14112_v23 = vld [vmem:[%s17860_s1 + $0x1040] sm:$0xff]  }
 0x1f0   :  { %12850 = vmatpush3.bf16.msra.mxu0 %v14065_v25 }
 0x1f1   :  { %12851 = vmatprep.subr.bf16.mxu0 %v14067_v27  ;;  %v14114_v27 = vld [vmem:[%s17860_s1 + $0x1000] sm:$0xff]  }
 0x1f2   :  { %12872 = vmatpush3.bf16.msra.mxu1 %v14066_v26  ;;  %v14113_v26 = vld [vmem:[%s17860_s1 + $0x10c0] sm:$0xff]  }
 0x1f3   :  { %12873 = vmatprep.subr.bf16.mxu1 %v14068_v28 }
 0x1f4   :  { %12852 = vmatpush3.bf16.msra.mxu0 %v14069_v29 }
 0x1f5   :  { %12853 = vmatprep.subr.bf16.mxu0 %v14071_v31 }
 0x1f6   :  { %12874 = vmatpush3.bf16.msra.mxu1 %v14070_v30  ;;  %v14115_v30 = vld [vmem:[%s17860_s1 + $0x1080] sm:$0xff]  }
 0x1f7   :  { %12875 = vmatprep.subr.bf16.mxu1 %v14072_v32 }
 0x1f8   :  { %12854 = vmatpush3.bf16.msra.mxu0 %v14073_v33  ;;  %v14116_v33 = vld [vmem:[%s17860_s1 + $0x1178] sm:$0xff]  }
 0x1f9   :  { %12855 = vmatprep.subr.bf16.mxu0 %v14075_v35  ;;  %v14117_v35 = vld [vmem:[%s17860_s1 + $0x11f8] sm:$0xff]  }
 0x1fa   :  { %12876 = vmatpush3.bf16.msra.mxu1 %v14074_v34 }
 0x1fb   :  { %12877 = vmatprep.subr.bf16.mxu1 %v14076_v36 }
 0x1fc   :  { %12856 = vmatpush3.bf16.msra.mxu0 %v14077_v37  ;;  %v14118_v37 = vld [vmem:[%s17860_s1 + $0x1138] sm:$0xff]  }
 0x1fd   :  { %12857 = vmatprep.subr.bf16.mxu0 %v14079_v39  ;;  %v14119_v39 = vld [vmem:[%s17860_s1 + $0x11b8] sm:$0xff]  }
 0x1fe   :  { %12878 = vmatpush3.bf16.msra.mxu1 %v14078_v38 }
 0x1ff   :  { %12879 = vmatprep.subr.bf16.mxu1 %v14080_v40 }
 0x200   :  { %12858 = vmatpush3.bf16.msra.mxu0 %v14081_v42  ;;  %v14120_v42 = vld [vmem:[%s17860_s1 + $0x1170] sm:$0xff]  }
 0x201   :  { %12887 = vmatprep.subr.bf16.mxu0 %v14084_v45 }
 0x202   :  { %12880 = vmatpush3.bf16.msra.mxu1 %v14082_v43  ;;  %v14121_v43 = vld [vmem:[%s17860_s1 + $0x11f0] sm:$0xff]  }
 0x203   :  { %v12595_v52 = vpop.f32.mrf.mxu0  ;;  %9835 = vmatmul.mubr.bf16.vlgmr.msra.gmra.mxu0 %v2360_v44  ;;  %12909 = vmatprep.subr.bf16.mxu1 %v14085_v46  ;;  %v14122_v46 = vld [vmem:[%s17860_s1 + $0x1130] sm:$0xff]  }
 0x204   :  { %12888 = vmatpush3.bf16.msra.mxu0 %v14086_v47  ;;  %v14123_v47 = vld [vmem:[%s17860_s1 + $0x11b0] sm:$0xff]  }
 0x205   :  { %v12617_v55 = vpop.f32.mrf.mxu1  ;;  %9875 = vmatmul.mubr.bf16.vlgmr.msra.gmra.mxu1 %v2376_v49  ;;  %v12596_v56 = vpop.f32.mrf.mxu0  ;;  %12889 = vmatprep.subr.bf16.mxu0 %v14088_v50  ;;  %v14124_v50 = vld [vmem:[%s17860_s1 + $0x1168] sm:$0xff]  }
 0x206   :  { %12910 = vmatpush3.bf16.msra.mxu1 %v14087_v48  ;;  %v12597_v58 = vadd.f32 %v12596_v56, %v12595_v52  ;;  %v14125_v52 = vld [vmem:[%s17860_s1 + $0x11e8] sm:$0xff]  }
 0x207   :  { %v12618_v60 = vpop.f32.mrf.mxu1  ;;  %v12598_v61 = vpop.f32.mrf.mxu0  ;;  %12911 = vmatprep.subr.bf16.mxu1 %v14089_v51 }
 0x208   :  { %v9357_v63 = vadd.f32 %v12597_v58, %v16233_v22  ;;  %v12619_v0 = vadd.f32 %v12618_v60, %v12617_v55  ;;  %12890 = vmatpush3.bf16.msra.mxu0 %v14090_v53  ;;  %v38_v22 = vld [vmem:[%s17859_s0 + $0x40] sm:$0xff]  ;;  %v14126_v55 = vld [vmem:[%s17860_s1 + $0x1128] sm:$0xff]  }
 0x209   :  { %v12620_v2 = vpop.f32.mrf.mxu1  ;;  %v12599_v3 = vpop.f32.mrf.mxu0  ;;  %12891 = vmatprep.subr.bf16.mxu0 %v14092_v57  ;;  %v2386_v24 = vrot.slane %v38_v22, %v14720_v41  ;;  %v2379_v25 = vcombine.high %v38_v22, %v38_v22  ;;  %v14127_v58 = vld [vmem:[%s17860_s1 + $0x11a8] sm:$0xff]   ;;  %v14128_v61 = vld [vmem:[%s17860_s1 + $0x1160] sm:$0xff]   ;;  %v14151_v22 = vld [vmem:[%s17860_s1 + $0x1238] sm:$0xff]  }
 0x20a   :  { %v16334_v5 = vadd.f32 %v12619_v0, %v9357_v63  ;;  %12912 = vmatpush3.bf16.msra.mxu1 %v14091_v54  ;;  %v14129_v63 = vld [vmem:[%s17860_s1 + $0x11e0] sm:$0xff]   ;;  %v14132_v3 = vld [vmem:[%s17860_s1 + $0x1158] sm:$0xff]  }
 0x20b   :  { %v12621_v7 = vpop.f32.mrf.mxu1  ;;  %12913 = vmatprep.subr.bf16.mxu1 %v14093_v59  ;;  %v2394_v28 = vcombine.high %v2386_v24, %v2386_v24  ;;  %v16395_v29 = vrot.slane %v2379_v25, %v14720_v41  ;;  %v2402_v32 = vrot.slane %v2386_v24, %v14720_v41  ;;  %v14131_v2 = vld [vmem:[%s17860_s1 + $0x11a0] sm:$0xff]   ;;  %v14153_v25 = vld [vmem:[%s17860_s1 + $0x1270] sm:$0xff]  }
 0x20c   :  { %12892 = vmatpush3.bf16.msra.mxu0 %v14094_v62  ;;  %v14136_v7 = vld [vmem:[%s17860_s1 + $0x1150] sm:$0xff]  }
 0x20d   :  { %12893 = vmatprep.subr.bf16.mxu0 %v14096_v4  ;;  %v2416_v31 = vrot.slane %v2394_v28, %v14720_v41  ;;  %v2395_v34 = vcombine.high %v16395_v29, %v16395_v29  ;;  %v2424_v40 = vcombine.high %v2402_v32, %v2402_v32  ;;  %v14133_v4 = vld [vmem:[%s17860_s1 + $0x11d8] sm:$0xff]   ;;  %v14155_v28 = vld [vmem:[%s17860_s1 + $0x1230] sm:$0xff]  }
 0x20e   :  { %12914 = vmatpush3.bf16.msra.mxu1 %v14095_v1  ;;  %v14130_v1 = vld [vmem:[%s17860_s1 + $0x1120] sm:$0xff]  }
 0x20f   :  { %12915 = vmatprep.subr.bf16.mxu1 %v14097_v6  ;;  %9914 = vmatprep.mubr.bf16.mxu0 %v2416_v31  ;;  %v2426_v36 = vcombine.high %v2416_v31, %v2416_v31  ;;  %v2423_v38 = vrot.slane %v2395_v34, %v14720_v41  ;;  %v14135_v6 = vld [vmem:[%s17860_s1 + $0x1198] sm:$0xff]   ;;  %v14158_v34 = vld [vmem:[%s17860_s1 + $0x12e8] sm:$0xff]  }
 0x210   :  { %12894 = vmatpush3.bf16.msra.mxu0 %v14098_v8  ;;  %v14137_v8 = vld [vmem:[%s17860_s1 + $0x11d0] sm:$0xff]  }
 0x211   :  { %12895 = vmatprep.subr.bf16.mxu0 %v14100_v10  ;;  %9954 = vmatprep.mubr.bf16.mxu1 %v2426_v36  ;;  %v2427_v44 = vcombine.high %v2423_v38, %v2423_v38  ;;  %v14139_v10 = vld [vmem:[%s17860_s1 + $0x1190] sm:$0xff]  }
 0x212   :  { %12916 = vmatpush3.bf16.msra.mxu1 %v14099_v9  ;;  %v14138_v9 = vld [vmem:[%s17860_s1 + $0x1110] sm:$0xff]  }
 0x213   :  { %12917 = vmatprep.subr.bf16.mxu1 %v14101_v11  ;;  %v14140_v11 = vld [vmem:[%s17860_s1 + $0x1148] sm:$0xff]  }
 0x214   :  { %12896 = vmatpush3.bf16.msra.mxu0 %v14102_v12  ;;  %v14141_v12 = vld [vmem:[%s17860_s1 + $0x11c8] sm:$0xff]  }
 0x215   :  { %12897 = vmatprep.subr.bf16.mxu0 %v14104_v14  ;;  %v14143_v14 = vld [vmem:[%s17860_s1 + $0x1188] sm:$0xff]  }
 0x216   :  { %12918 = vmatpush3.bf16.msra.mxu1 %v14103_v13  ;;  %v14142_v13 = vld [vmem:[%s17860_s1 + $0x1108] sm:$0xff]  }
 0x217   :  { %12919 = vmatprep.subr.bf16.mxu1 %v14105_v15  ;;  %v14144_v15 = vld [vmem:[%s17860_s1 + $0x1140] sm:$0xff]  }
 0x218   :  { %12898 = vmatpush3.bf16.msra.mxu0 %v14106_v16  ;;  %v14145_v16 = vld [vmem:[%s17860_s1 + $0x11c0] sm:$0xff]  }
 0x219   :  { %12899 = vmatprep.subr.bf16.mxu0 %v14108_v18  ;;  %v14147_v18 = vld [vmem:[%s17860_s1 + $0x1180] sm:$0xff]  }
 0x21a   :  { %12920 = vmatpush3.bf16.msra.mxu1 %v14107_v17  ;;  %v14146_v17 = vld [vmem:[%s17860_s1 + $0x1100] sm:$0xff]  }
 0x21b   :  { %12921 = vmatprep.subr.bf16.mxu1 %v14109_v19  ;;  %v2409_v19 = vrot.slane %v16395_v29, %v14720_v41  ;;  %v14156_v29 = vld [vmem:[%s17860_s1 + $0x12b0] sm:$0xff]  }
 0x21c   :  { %12900 = vmatpush3.bf16.msra.mxu0 %v14110_v20  ;;  %v14149_v20 = vld [vmem:[%s17860_s1 + $0x1278] sm:$0xff]  }
 0x21d   :  { %12901 = vmatprep.subr.bf16.mxu0 %v14112_v23  ;;  %v14152_v23 = vld [vmem:[%s17860_s1 + $0x12b8] sm:$0xff]   ;;  %v2425_v24 = vcombine.high %v2409_v19, %v2409_v19 }
 0x21e   :  { %12922 = vmatpush3.bf16.msra.mxu1 %v14111_v21  ;;  %v14150_v21 = vld [vmem:[%s17860_s1 + $0x12f8] sm:$0xff]  }
 0x21f   :  { %12923 = vmatprep.subr.bf16.mxu1 %v14113_v26  ;;  %v14154_v26 = vld [vmem:[%s17860_s1 + $0x12f0] sm:$0xff]  }
 0x220   :  { %12902 = vmatpush3.bf16.msra.mxu0 %v14114_v27 }
 0x221   :  { %12931 = vmatprep.subr.bf16.mxu0 %v14116_v33 }
 0x222   :  { %12924 = vmatpush3.bf16.msra.mxu1 %v14115_v30 }
 0x223   :  { %v12639_v45 = vpop.f32.mrf.mxu0  ;;  %9915 = vmatmul.mubr.bf16.vlgmr.msra.gmra.mxu0 %v2402_v32  ;;  %12953 = vmatprep.subr.bf16.mxu1 %v14117_v35  ;;  %v14157_v32 = vld [vmem:[%s17860_s1 + $0x1268] sm:$0xff]  }
 0x224   :  { %12932 = vmatpush3.bf16.msra.mxu0 %v14118_v37  ;;  %9994 = vmatprep.mubr.bf16.mxu0 %v2423_v38  ;;  %v14159_v37 = vld [vmem:[%s17860_s1 + $0x1228] sm:$0xff]  }
 0x225   :  { %v12661_v48 = vpop.f32.mrf.mxu1  ;;  %9955 = vmatmul.mubr.bf16.vlgmr.msra.gmra.mxu1 %v2424_v40  ;;  %v12640_v49 = vpop.f32.mrf.mxu0  ;;  %12933 = vmatprep.subr.bf16.mxu0 %v14120_v42  ;;  %v14160_v40 = vld [vmem:[%s17860_s1 + $0x12a8] sm:$0xff]  }
 0x226   :  { %12954 = vmatpush3.bf16.msra.mxu1 %v14119_v39  ;;  %v12641_v51 = vadd.f32 %v12640_v49, %v12639_v45  ;;  %10034 = vmatprep.mubr.bf16.mxu1 %v2427_v44  ;;  %v14161_v44 = vld [vmem:[%s17860_s1 + $0x1260] sm:$0xff]  }
 0x227   :  { %v12662_v53 = vpop.f32.mrf.mxu1  ;;  %v12642_v54 = vpop.f32.mrf.mxu0  ;;  %12955 = vmatprep.subr.bf16.mxu1 %v14121_v43  ;;  %v14164_v49 = vld [vmem:[%s17860_s1 + $0x12a0] sm:$0xff]  }
 0x228   :  { %v9437_v56 = vadd.f32 %v12641_v51, %v16334_v5  ;;  %v12663_v57 = vadd.f32 %v12662_v53, %v12661_v48  ;;  %12934 = vmatpush3.bf16.msra.mxu0 %v14122_v46  ;;  %v14134_v5 = vld [vmem:[%s17860_s1 + $0x1118] sm:$0xff]   ;;  %v14162_v46 = vld [vmem:[%s17860_s1 + $0x12e0] sm:$0xff]   ;;  %v14169_v54 = vld [vmem:[%s17860_s1 + $0x1250] sm:$0xff]  }
 0x229   :  { %v12664_v59 = vpop.f32.mrf.mxu1  ;;  %v12643_v60 = vpop.f32.mrf.mxu0  ;;  %12935 = vmatprep.subr.bf16.mxu0 %v14124_v50  ;;  %v14163_v48 = vld [vmem:[%s17860_s1 + $0x1220] sm:$0xff]   ;;  %v14165_v50 = vld [vmem:[%s17860_s1 + $0x1258] sm:$0xff]  }
 0x22a   :  { %v16445_v62 = vadd.f32 %v12663_v57, %v9437_v56  ;;  %12956 = vmatpush3.bf16.msra.mxu1 %v14123_v47  ;;  %v14166_v51 = vld [vmem:[%s17860_s1 + $0x12d8] sm:$0xff]   ;;  %v14171_v56 = vld [vmem:[%s17860_s1 + $0x1210] sm:$0xff]   ;;  %v14174_v59 = vld [vmem:[%s17860_s1 + $0x12c8] sm:$0xff]  }
 0x22b   :  { %v12665_v0 = vpop.f32.mrf.mxu1  ;;  %12957 = vmatprep.subr.bf16.mxu1 %v14125_v52  ;;  %v14167_v52 = vld [vmem:[%s17860_s1 + $0x1218] sm:$0xff]   ;;  %v14172_v57 = vld [vmem:[%s17860_s1 + $0x1290] sm:$0xff]   ;;  %v14175_v60 = vld [vmem:[%s17860_s1 + $0x1208] sm:$0xff]  }
 0x22c   :  { %12936 = vmatpush3.bf16.msra.mxu0 %v14126_v55  ;;  %v14168_v53 = vld [vmem:[%s17860_s1 + $0x1298] sm:$0xff]   ;;  %v14170_v55 = vld [vmem:[%s17860_s1 + $0x12d0] sm:$0xff]  }
 0x22d   :  { %12937 = vmatprep.subr.bf16.mxu0 %v14128_v61  ;;  %v14176_v61 = vld [vmem:[%s17860_s1 + $0x1288] sm:$0xff]  }
 0x22e   :  { %12958 = vmatpush3.bf16.msra.mxu1 %v14127_v58  ;;  %v14173_v58 = vld [vmem:[%s17860_s1 + $0x1248] sm:$0xff]  }
 0x22f   :  { %12959 = vmatprep.subr.bf16.mxu1 %v14129_v63  ;;  %v14177_v63 = vld [vmem:[%s17860_s1 + $0x1240] sm:$0xff]  }
 0x230   :  { %12938 = vmatpush3.bf16.msra.mxu0 %v14130_v1 }
 0x231   :  { %12939 = vmatprep.subr.bf16.mxu0 %v14132_v3  ;;  %v14179_v3 = vld [vmem:[%s17860_s1 + $0x1200] sm:$0xff]  }
 0x232   :  { %12960 = vmatpush3.bf16.msra.mxu1 %v14131_v2  ;;  %v14178_v2 = vld [vmem:[%s17860_s1 + $0x12c0] sm:$0xff]  }
 0x233   :  { %12961 = vmatprep.subr.bf16.mxu1 %v14133_v4 }
 0x234   :  { %12940 = vmatpush3.bf16.msra.mxu0 %v14134_v5 }
 0x235   :  { %12941 = vmatprep.subr.bf16.mxu0 %v14136_v7 }
 0x236   :  { %12962 = vmatpush3.bf16.msra.mxu1 %v14135_v6  ;;  %v14180_v6 = vld [vmem:[%s17860_s1 + $0x1280] sm:$0xff]  }
 0x237   :  { %12963 = vmatprep.subr.bf16.mxu1 %v14137_v8 }
 0x238   :  { %12942 = vmatpush3.bf16.msra.mxu0 %v14138_v9  ;;  %v14181_v9 = vld [vmem:[%s17860_s1 + $0x1378] sm:$0xff]  }
 0x239   :  { %12943 = vmatprep.subr.bf16.mxu0 %v14140_v11  ;;  %v14182_v11 = vld [vmem:[%s17860_s1 + $0x13f8] sm:$0xff]  }
 0x23a   :  { %12964 = vmatpush3.bf16.msra.mxu1 %v14139_v10 }
 0x23b   :  { %12965 = vmatprep.subr.bf16.mxu1 %v14141_v12 }
 0x23c   :  { %12944 = vmatpush3.bf16.msra.mxu0 %v14142_v13  ;;  %v14183_v13 = vld [vmem:[%s17860_s1 + $0x1338] sm:$0xff]  }
 0x23d   :  { %12945 = vmatprep.subr.bf16.mxu0 %v14144_v15  ;;  %v14184_v15 = vld [vmem:[%s17860_s1 + $0x13b8] sm:$0xff]  }
 0x23e   :  { %12966 = vmatpush3.bf16.msra.mxu1 %v14143_v14 }
 0x23f   :  { %12967 = vmatprep.subr.bf16.mxu1 %v14145_v16 }
 0x240   :  { %12946 = vmatpush3.bf16.msra.mxu0 %v14146_v17  ;;  %v14185_v17 = vld [vmem:[%s17860_s1 + $0x1370] sm:$0xff]  }
 0x241   :  { %12975 = vmatprep.subr.bf16.mxu0 %v14149_v20 }
 0x242   :  { %12968 = vmatpush3.bf16.msra.mxu1 %v14147_v18  ;;  %v14186_v18 = vld [vmem:[%s17860_s1 + $0x13f0] sm:$0xff]  }
 0x243   :  { %v12683_v27 = vpop.f32.mrf.mxu0  ;;  %9995 = vmatmul.mubr.bf16.vlgmr.msra.gmra.mxu0 %v2409_v19  ;;  %12997 = vmatprep.subr.bf16.mxu1 %v14150_v21  ;;  %v14187_v21 = vld [vmem:[%s17860_s1 + $0x1330] sm:$0xff]  }
 0x244   :  { %12976 = vmatpush3.bf16.msra.mxu0 %v14151_v22  ;;  %v14188_v22 = vld [vmem:[%s17860_s1 + $0x13b0] sm:$0xff]  }
 0x245   :  { %v12705_v30 = vpop.f32.mrf.mxu1  ;;  %10035 = vmatmul.mubr.bf16.vlgmr.msra.gmra.mxu1 %v2425_v24  ;;  %v12684_v31 = vpop.f32.mrf.mxu0  ;;  %12977 = vmatprep.subr.bf16.mxu0 %v14153_v25  ;;  %v14189_v25 = vld [vmem:[%s17860_s1 + $0x1368] sm:$0xff]  }
 0x246   :  { %12998 = vmatpush3.bf16.msra.mxu1 %v14152_v23  ;;  %v12685_v33 = vadd.f32 %v12684_v31, %v12683_v27  ;;  %v14190_v27 = vld [vmem:[%s17860_s1 + $0x13e8] sm:$0xff]  }
 0x247   :  { %v12706_v35 = vpop.f32.mrf.mxu1  ;;  %v12686_v36 = vpop.f32.mrf.mxu0  ;;  %12999 = vmatprep.subr.bf16.mxu1 %v14154_v26 }
 0x248   :  { %v9517_v38 = vadd.f32 %v12685_v33, %v16445_v62  ;;  %v12707_v39 = vadd.f32 %v12706_v35, %v12705_v30  ;;  %12978 = vmatpush3.bf16.msra.mxu0 %v14155_v28  ;;  %v39_v62 = vld [vmem:[%s17859_s0 + $0x48] sm:$0xff]  ;;  %v14193_v36 = vld [vmem:[%s17860_s1 + $0x1360] sm:$0xff]  }
 0x249   :  { %v12708_v42 = vpop.f32.mrf.mxu1  ;;  %v12687_v43 = vpop.f32.mrf.mxu0  ;;  %12979 = vmatprep.subr.bf16.mxu0 %v14157_v32  ;;  %v2435_v0 = vrot.slane %v39_v62, %v14720_v41  ;;  %v2428_v1 = vcombine.high %v39_v62, %v39_v62  ;;  %v14191_v30 = vld [vmem:[%s17860_s1 + $0x1328] sm:$0xff]   ;;  %v14216_v62 = vld [vmem:[%s17860_s1 + $0x1438] sm:$0xff]  }
 0x24a   :  { %v16546_v45 = vadd.f32 %v12707_v39, %v9517_v38  ;;  %13000 = vmatpush3.bf16.msra.mxu1 %v14156_v29  ;;  %v14192_v33 = vld [vmem:[%s17860_s1 + $0x13a8] sm:$0xff]   ;;  %v14194_v38 = vld [vmem:[%s17860_s1 + $0x13e0] sm:$0xff]   ;;  %v14197_v43 = vld [vmem:[%s17860_s1 + $0x1358] sm:$0xff]  }
 0x24b   :  { %v12709_v47 = vpop.f32.mrf.mxu1  ;;  %13001 = vmatprep.subr.bf16.mxu1 %v14158_v34  ;;  %v2443_v4 = vcombine.high %v2435_v0, %v2435_v0  ;;  %v16607_v5 = vrot.slane %v2428_v1, %v14720_v41  ;;  %v2451_v8 = vrot.slane %v2435_v0, %v14720_v41  ;;  %v14196_v42 = vld [vmem:[%s17860_s1 + $0x13a0] sm:$0xff]   ;;  %v14218_v1 = vld [vmem:[%s17860_s1 + $0x1470] sm:$0xff]  }
 0x24c   :  { %12980 = vmatpush3.bf16.msra.mxu0 %v14159_v37  ;;  %v14201_v47 = vld [vmem:[%s17860_s1 + $0x1350] sm:$0xff]  }
 0x24d   :  { %12981 = vmatprep.subr.bf16.mxu0 %v14161_v44  ;;  %v2465_v7 = vrot.slane %v2443_v4, %v14720_v41  ;;  %v2444_v10 = vcombine.high %v16607_v5, %v16607_v5  ;;  %v2473_v16 = vcombine.high %v2451_v8, %v2451_v8  ;;  %v14198_v44 = vld [vmem:[%s17860_s1 + $0x13d8] sm:$0xff]   ;;  %v14220_v4 = vld [vmem:[%s17860_s1 + $0x1430] sm:$0xff]  }
 0x24e   :  { %13002 = vmatpush3.bf16.msra.mxu1 %v14160_v40  ;;  %v14195_v40 = vld [vmem:[%s17860_s1 + $0x1320] sm:$0xff]  }
 0x24f   :  { %13003 = vmatprep.subr.bf16.mxu1 %v14162_v46  ;;  %10074 = vmatprep.mubr.bf16.mxu0 %v2465_v7  ;;  %v2475_v12 = vcombine.high %v2465_v7, %v2465_v7  ;;  %v2472_v14 = vrot.slane %v2444_v10, %v14720_v41  ;;  %v14200_v46 = vld [vmem:[%s17860_s1 + $0x1398] sm:$0xff]   ;;  %v14223_v10 = vld [vmem:[%s17860_s1 + $0x14e8] sm:$0xff]  }
 0x250   :  { %12982 = vmatpush3.bf16.msra.mxu0 %v14163_v48  ;;  %v14202_v48 = vld [vmem:[%s17860_s1 + $0x13d0] sm:$0xff]  }
 0x251   :  { %12983 = vmatprep.subr.bf16.mxu0 %v14165_v50  ;;  %10114 = vmatprep.mubr.bf16.mxu1 %v2475_v12  ;;  %v2476_v19 = vcombine.high %v2472_v14, %v2472_v14  ;;  %v14204_v50 = vld [vmem:[%s17860_s1 + $0x1390] sm:$0xff]  }
 0x252   :  { %13004 = vmatpush3.bf16.msra.mxu1 %v14164_v49  ;;  %v14203_v49 = vld [vmem:[%s17860_s1 + $0x1310] sm:$0xff]  }
 0x253   :  { %13005 = vmatprep.subr.bf16.mxu1 %v14166_v51  ;;  %v14205_v51 = vld [vmem:[%s17860_s1 + $0x1348] sm:$0xff]  }
 0x254   :  { %12984 = vmatpush3.bf16.msra.mxu0 %v14167_v52  ;;  %v14206_v52 = vld [vmem:[%s17860_s1 + $0x13c8] sm:$0xff]  }
 0x255   :  { %12985 = vmatprep.subr.bf16.mxu0 %v14169_v54  ;;  %v14208_v54 = vld [vmem:[%s17860_s1 + $0x1388] sm:$0xff]  }
 0x256   :  { %13006 = vmatpush3.bf16.msra.mxu1 %v14168_v53  ;;  %v14207_v53 = vld [vmem:[%s17860_s1 + $0x1308] sm:$0xff]  }
 0x257   :  { %13007 = vmatprep.subr.bf16.mxu1 %v14170_v55  ;;  %v14209_v55 = vld [vmem:[%s17860_s1 + $0x1340] sm:$0xff]  }
 0x258   :  { %12986 = vmatpush3.bf16.msra.mxu0 %v14171_v56  ;;  %v14210_v56 = vld [vmem:[%s17860_s1 + $0x13c0] sm:$0xff]  }
 0x259   :  { %12987 = vmatprep.subr.bf16.mxu0 %v14173_v58  ;;  %v14212_v58 = vld [vmem:[%s17860_s1 + $0x1380] sm:$0xff]  }
 0x25a   :  { %13008 = vmatpush3.bf16.msra.mxu1 %v14172_v57  ;;  %v14211_v57 = vld [vmem:[%s17860_s1 + $0x1300] sm:$0xff]  }
 0x25b   :  { %13009 = vmatprep.subr.bf16.mxu1 %v14174_v59  ;;  %v2458_v59 = vrot.slane %v16607_v5, %v14720_v41  ;;  %v14221_v5 = vld [vmem:[%s17860_s1 + $0x14b0] sm:$0xff]  }
 0x25c   :  { %12988 = vmatpush3.bf16.msra.mxu0 %v14175_v60  ;;  %v14214_v60 = vld [vmem:[%s17860_s1 + $0x1478] sm:$0xff]  }
 0x25d   :  { %12989 = vmatprep.subr.bf16.mxu0 %v14177_v63  ;;  %v14217_v63 = vld [vmem:[%s17860_s1 + $0x14b8] sm:$0xff]   ;;  %v2474_v0 = vcombine.high %v2458_v59, %v2458_v59 }
 0x25e   :  { %13010 = vmatpush3.bf16.msra.mxu1 %v14176_v61  ;;  %v14215_v61 = vld [vmem:[%s17860_s1 + $0x14f8] sm:$0xff]  }
 0x25f   :  { %13011 = vmatprep.subr.bf16.mxu1 %v14178_v2  ;;  %v14219_v2 = vld [vmem:[%s17860_s1 + $0x14f0] sm:$0xff]  }
 0x260   :  { %12990 = vmatpush3.bf16.msra.mxu0 %v14179_v3 }
 0x261   :  { %13019 = vmatprep.subr.bf16.mxu0 %v14181_v9 }
 0x262   :  { %13012 = vmatpush3.bf16.msra.mxu1 %v14180_v6 }
 0x263   :  { %v12727_v20 = vpop.f32.mrf.mxu0  ;;  %10075 = vmatmul.mubr.bf16.vlgmr.msra.gmra.mxu0 %v2451_v8  ;;  %13041 = vmatprep.subr.bf16.mxu1 %v14182_v11  ;;  %v14222_v8 = vld [vmem:[%s17860_s1 + $0x1468] sm:$0xff]  }
 0x264   :  { %13020 = vmatpush3.bf16.msra.mxu0 %v14183_v13  ;;  %10154 = vmatprep.mubr.bf16.mxu0 %v2472_v14  ;;  %v14224_v13 = vld [vmem:[%s17860_s1 + $0x1428] sm:$0xff]  }
 0x265   :  { %v12749_v23 = vpop.f32.mrf.mxu1  ;;  %10115 = vmatmul.mubr.bf16.vlgmr.msra.gmra.mxu1 %v2473_v16  ;;  %v12728_v24 = vpop.f32.mrf.mxu0  ;;  %13021 = vmatprep.subr.bf16.mxu0 %v14185_v17  ;;  %v14225_v16 = vld [vmem:[%s17860_s1 + $0x14a8] sm:$0xff]  }
 0x266   :  { %13042 = vmatpush3.bf16.msra.mxu1 %v14184_v15  ;;  %v12729_v26 = vadd.f32 %v12728_v24, %v12727_v20  ;;  %10194 = vmatprep.mubr.bf16.mxu1 %v2476_v19  ;;  %v14226_v19 = vld [vmem:[%s17860_s1 + $0x1460] sm:$0xff]  }
 0x267   :  { %v12750_v28 = vpop.f32.mrf.mxu1  ;;  %v12730_v29 = vpop.f32.mrf.mxu0  ;;  %13043 = vmatprep.subr.bf16.mxu1 %v14186_v18  ;;  %v14229_v24 = vld [vmem:[%s17860_s1 + $0x14a0] sm:$0xff]  }
 0x268   :  { %v9597_v31 = vadd.f32 %v12729_v26, %v16546_v45  ;;  %v12751_v32 = vadd.f32 %v12750_v28, %v12749_v23  ;;  %13022 = vmatpush3.bf16.msra.mxu0 %v14187_v21  ;;  %v14199_v45 = vld [vmem:[%s17860_s1 + $0x1318] sm:$0xff]   ;;  %v14227_v21 = vld [vmem:[%s17860_s1 + $0x14e0] sm:$0xff]   ;;  %v14234_v29 = vld [vmem:[%s17860_s1 + $0x1450] sm:$0xff]  }
 0x269   :  { %v12752_v34 = vpop.f32.mrf.mxu1  ;;  %v12731_v35 = vpop.f32.mrf.mxu0  ;;  %13023 = vmatprep.subr.bf16.mxu0 %v14189_v25  ;;  %v14228_v23 = vld [vmem:[%s17860_s1 + $0x1420] sm:$0xff]   ;;  %v14230_v25 = vld [vmem:[%s17860_s1 + $0x1458] sm:$0xff]  }
 0x26a   :  { %v16657_v37 = vadd.f32 %v12751_v32, %v9597_v31  ;;  %13044 = vmatpush3.bf16.msra.mxu1 %v14188_v22  ;;  %v14231_v26 = vld [vmem:[%s17860_s1 + $0x14d8] sm:$0xff]   ;;  %v14236_v31 = vld [vmem:[%s17860_s1 + $0x1410] sm:$0xff]   ;;  %v14239_v34 = vld [vmem:[%s17860_s1 + $0x14c8] sm:$0xff]  }
 0x26b   :  { %v12753_v39 = vpop.f32.mrf.mxu1  ;;  %13045 = vmatprep.subr.bf16.mxu1 %v14190_v27  ;;  %v14232_v27 = vld [vmem:[%s17860_s1 + $0x1418] sm:$0xff]   ;;  %v14237_v32 = vld [vmem:[%s17860_s1 + $0x1490] sm:$0xff]   ;;  %v14240_v35 = vld [vmem:[%s17860_s1 + $0x1408] sm:$0xff]  }
 0x26c   :  { %13024 = vmatpush3.bf16.msra.mxu0 %v14191_v30  ;;  %v14233_v28 = vld [vmem:[%s17860_s1 + $0x1498] sm:$0xff]   ;;  %v14235_v30 = vld [vmem:[%s17860_s1 + $0x14d0] sm:$0xff]  }
 0x26d   :  { %13025 = vmatprep.subr.bf16.mxu0 %v14193_v36  ;;  %v14241_v36 = vld [vmem:[%s17860_s1 + $0x1488] sm:$0xff]  }
 0x26e   :  { %13046 = vmatpush3.bf16.msra.mxu1 %v14192_v33  ;;  %v14238_v33 = vld [vmem:[%s17860_s1 + $0x1448] sm:$0xff]  }
 0x26f   :  { %13047 = vmatprep.subr.bf16.mxu1 %v14194_v38  ;;  %v14242_v38 = vld [vmem:[%s17860_s1 + $0x1440] sm:$0xff]  }
 0x270   :  { %13026 = vmatpush3.bf16.msra.mxu0 %v14195_v40 }
 0x271   :  { %13027 = vmatprep.subr.bf16.mxu0 %v14197_v43  ;;  %v14244_v43 = vld [vmem:[%s17860_s1 + $0x1400] sm:$0xff]  }
 0x272   :  { %13048 = vmatpush3.bf16.msra.mxu1 %v14196_v42  ;;  %v14243_v42 = vld [vmem:[%s17860_s1 + $0x14c0] sm:$0xff]  }
 0x273   :  { %13049 = vmatprep.subr.bf16.mxu1 %v14198_v44 }
 0x274   :  { %13028 = vmatpush3.bf16.msra.mxu0 %v14199_v45 }
 0x275   :  { %13029 = vmatprep.subr.bf16.mxu0 %v14201_v47 }
 0x276   :  { %13050 = vmatpush3.bf16.msra.mxu1 %v14200_v46  ;;  %v14245_v46 = vld [vmem:[%s17860_s1 + $0x1480] sm:$0xff]  }
 0x277   :  { %13051 = vmatprep.subr.bf16.mxu1 %v14202_v48 }
 0x278   :  { %13030 = vmatpush3.bf16.msra.mxu0 %v14203_v49  ;;  %v14246_v49 = vld [vmem:[%s17860_s1 + $0x1578] sm:$0xff]  }
 0x279   :  { %13031 = vmatprep.subr.bf16.mxu0 %v14205_v51  ;;  %v14247_v51 = vld [vmem:[%s17860_s1 + $0x15f8] sm:$0xff]  }
 0x27a   :  { %13052 = vmatpush3.bf16.msra.mxu1 %v14204_v50 }
 0x27b   :  { %13053 = vmatprep.subr.bf16.mxu1 %v14206_v52 }
 0x27c   :  { %13032 = vmatpush3.bf16.msra.mxu0 %v14207_v53  ;;  %v14248_v53 = vld [vmem:[%s17860_s1 + $0x1538] sm:$0xff]  }
 0x27d   :  { %13033 = vmatprep.subr.bf16.mxu0 %v14209_v55  ;;  %v14249_v55 = vld [vmem:[%s17860_s1 + $0x15b8] sm:$0xff]  }
 0x27e   :  { %13054 = vmatpush3.bf16.msra.mxu1 %v14208_v54 }
 0x27f   :  { %13055 = vmatprep.subr.bf16.mxu1 %v14210_v56 }
 0x280   :  { %13034 = vmatpush3.bf16.msra.mxu0 %v14211_v57  ;;  %v14250_v57 = vld [vmem:[%s17860_s1 + $0x1570] sm:$0xff]  }
 0x281   :  { %13063 = vmatprep.subr.bf16.mxu0 %v14214_v60 }
 0x282   :  { %13056 = vmatpush3.bf16.msra.mxu1 %v14212_v58  ;;  %v14251_v58 = vld [vmem:[%s17860_s1 + $0x15f0] sm:$0xff]  }
 0x283   :  { %v12771_v3 = vpop.f32.mrf.mxu0  ;;  %10155 = vmatmul.mubr.bf16.vlgmr.msra.gmra.mxu0 %v2458_v59  ;;  %13085 = vmatprep.subr.bf16.mxu1 %v14215_v61  ;;  %v14252_v61 = vld [vmem:[%s17860_s1 + $0x1530] sm:$0xff]  }
 0x284   :  { %13064 = vmatpush3.bf16.msra.mxu0 %v14216_v62  ;;  %v14253_v62 = vld [vmem:[%s17860_s1 + $0x15b0] sm:$0xff]  }
 0x285   :  { %v12793_v6 = vpop.f32.mrf.mxu1  ;;  %10195 = vmatmul.mubr.bf16.vlgmr.msra.gmra.mxu1 %v2474_v0  ;;  %v12772_v7 = vpop.f32.mrf.mxu0  ;;  %13065 = vmatprep.subr.bf16.mxu0 %v14218_v1  ;;  %v14254_v1 = vld [vmem:[%s17860_s1 + $0x1568] sm:$0xff]  }
 0x286   :  { %13086 = vmatpush3.bf16.msra.mxu1 %v14217_v63  ;;  %v12773_v9 = vadd.f32 %v12772_v7, %v12771_v3  ;;  %v14255_v3 = vld [vmem:[%s17860_s1 + $0x15e8] sm:$0xff]  }
 0x287   :  { %v12794_v11 = vpop.f32.mrf.mxu1  ;;  %v12774_v12 = vpop.f32.mrf.mxu0  ;;  %13087 = vmatprep.subr.bf16.mxu1 %v14219_v2 }
 0x288   :  { %v9677_v14 = vadd.f32 %v12773_v9, %v16657_v37  ;;  %v12795_v15 = vadd.f32 %v12794_v11, %v12793_v6  ;;  %13066 = vmatpush3.bf16.msra.mxu0 %v14220_v4  ;;  %v40_v37 = vld [vmem:[%s17859_s0 + $0x50] sm:$0xff]  ;;  %v14256_v6 = vld [vmem:[%s17860_s1 + $0x1528] sm:$0xff]   ;;  %v14258_v12 = vld [vmem:[%s17860_s1 + $0x1560] sm:$0xff]  }
 0x289   :  { %v12796_v17 = vpop.f32.mrf.mxu1  ;;  %v12775_v18 = vpop.f32.mrf.mxu0  ;;  %13067 = vmatprep.subr.bf16.mxu0 %v14222_v8  ;;  %v2484_v39 = vrot.slane %v40_v37, %v14720_v41  ;;  %v2477_v40 = vcombine.high %v40_v37, %v40_v37  ;;  %v14257_v9 = vld [vmem:[%s17860_s1 + $0x15a8] sm:$0xff]   ;;  %v14281_v37 = vld [vmem:[%s17860_s1 + $0x1638] sm:$0xff]  }
 0x28a   :  { %v16758_v20 = vadd.f32 %v12795_v15, %v9677_v14  ;;  %13088 = vmatpush3.bf16.msra.mxu1 %v14221_v5  ;;  %v14259_v14 = vld [vmem:[%s17860_s1 + $0x15e0] sm:$0xff]   ;;  %v14262_v18 = vld [vmem:[%s17860_s1 + $0x1558] sm:$0xff]  }
 0x28b   :  { %v12797_v22 = vpop.f32.mrf.mxu1  ;;  %13089 = vmatprep.subr.bf16.mxu1 %v14223_v10  ;;  %v2492_v44 = vcombine.high %v2484_v39, %v2484_v39  ;;  %v16819_v45 = vrot.slane %v2477_v40, %v14720_v41  ;;  %v2500_v48 = vrot.slane %v2484_v39, %v14720_v41  ;;  %v14261_v17 = vld [vmem:[%s17860_s1 + $0x15a0] sm:$0xff]   ;;  %v14283_v40 = vld [vmem:[%s17860_s1 + $0x1670] sm:$0xff]  }
 0x28c   :  { %13068 = vmatpush3.bf16.msra.mxu0 %v14224_v13  ;;  %v14266_v22 = vld [vmem:[%s17860_s1 + $0x1550] sm:$0xff]  }
 0x28d   :  { %13069 = vmatprep.subr.bf16.mxu0 %v14226_v19  ;;  %v2514_v47 = vrot.slane %v2492_v44, %v14720_v41  ;;  %v2493_v50 = vcombine.high %v16819_v45, %v16819_v45  ;;  %v2522_v56 = vcombine.high %v2500_v48, %v2500_v48  ;;  %v14263_v19 = vld [vmem:[%s17860_s1 + $0x15d8] sm:$0xff]   ;;  %v14285_v44 = vld [vmem:[%s17860_s1 + $0x1630] sm:$0xff]  }
 0x28e   :  { %13090 = vmatpush3.bf16.msra.mxu1 %v14225_v16  ;;  %v14260_v16 = vld [vmem:[%s17860_s1 + $0x1520] sm:$0xff]  }
 0x28f   :  { %13091 = vmatprep.subr.bf16.mxu1 %v14227_v21  ;;  %10234 = vmatprep.mubr.bf16.mxu0 %v2514_v47  ;;  %v2524_v52 = vcombine.high %v2514_v47, %v2514_v47  ;;  %v2521_v54 = vrot.slane %v2493_v50, %v14720_v41  ;;  %v14265_v21 = vld [vmem:[%s17860_s1 + $0x1598] sm:$0xff]   ;;  %v14288_v50 = vld [vmem:[%s17860_s1 + $0x16e8] sm:$0xff]  }
 0x290   :  { %13070 = vmatpush3.bf16.msra.mxu0 %v14228_v23  ;;  %v14267_v23 = vld [vmem:[%s17860_s1 + $0x15d0] sm:$0xff]  }
 0x291   :  { %13071 = vmatprep.subr.bf16.mxu0 %v14230_v25  ;;  %10274 = vmatprep.mubr.bf16.mxu1 %v2524_v52  ;;  %v2525_v59 = vcombine.high %v2521_v54, %v2521_v54  ;;  %v14269_v25 = vld [vmem:[%s17860_s1 + $0x1590] sm:$0xff]  }
 0x292   :  { %13092 = vmatpush3.bf16.msra.mxu1 %v14229_v24  ;;  %v14268_v24 = vld [vmem:[%s17860_s1 + $0x1510] sm:$0xff]  }
 0x293   :  { %13093 = vmatprep.subr.bf16.mxu1 %v14231_v26  ;;  %v14270_v26 = vld [vmem:[%s17860_s1 + $0x1548] sm:$0xff]  }
 0x294   :  { %13072 = vmatpush3.bf16.msra.mxu0 %v14232_v27  ;;  %v14271_v27 = vld [vmem:[%s17860_s1 + $0x15c8] sm:$0xff]  }
 0x295   :  { %13073 = vmatprep.subr.bf16.mxu0 %v14234_v29  ;;  %v14273_v29 = vld [vmem:[%s17860_s1 + $0x1588] sm:$0xff]  }
 0x296   :  { %13094 = vmatpush3.bf16.msra.mxu1 %v14233_v28  ;;  %v14272_v28 = vld [vmem:[%s17860_s1 + $0x1508] sm:$0xff]  }
 0x297   :  { %13095 = vmatprep.subr.bf16.mxu1 %v14235_v30  ;;  %v14274_v30 = vld [vmem:[%s17860_s1 + $0x1540] sm:$0xff]  }
 0x298   :  { %13074 = vmatpush3.bf16.msra.mxu0 %v14236_v31  ;;  %v14275_v31 = vld [vmem:[%s17860_s1 + $0x15c0] sm:$0xff]  }
 0x299   :  { %13075 = vmatprep.subr.bf16.mxu0 %v14238_v33  ;;  %v14277_v33 = vld [vmem:[%s17860_s1 + $0x1580] sm:$0xff]  }
 0x29a   :  { %13096 = vmatpush3.bf16.msra.mxu1 %v14237_v32  ;;  %v14276_v32 = vld [vmem:[%s17860_s1 + $0x1500] sm:$0xff]  }
 0x29b   :  { %13097 = vmatprep.subr.bf16.mxu1 %v14239_v34  ;;  %v2507_v34 = vrot.slane %v16819_v45, %v14720_v41  ;;  %v14286_v45 = vld [vmem:[%s17860_s1 + $0x16b0] sm:$0xff]  }
 0x29c   :  { %13076 = vmatpush3.bf16.msra.mxu0 %v14240_v35  ;;  %v14279_v35 = vld [vmem:[%s17860_s1 + $0x1678] sm:$0xff]  }
 0x29d   :  { %13077 = vmatprep.subr.bf16.mxu0 %v14242_v38  ;;  %v14282_v38 = vld [vmem:[%s17860_s1 + $0x16b8] sm:$0xff]   ;;  %v2523_v39 = vcombine.high %v2507_v34, %v2507_v34 }
 0x29e   :  { %13098 = vmatpush3.bf16.msra.mxu1 %v14241_v36  ;;  %v14280_v36 = vld [vmem:[%s17860_s1 + $0x16f8] sm:$0xff]  }
 0x29f   :  { %13099 = vmatprep.subr.bf16.mxu1 %v14243_v42  ;;  %v14284_v42 = vld [vmem:[%s17860_s1 + $0x16f0] sm:$0xff]  }
 0x2a0   :  { %13078 = vmatpush3.bf16.msra.mxu0 %v14244_v43 }
 0x2a1   :  { %13107 = vmatprep.subr.bf16.mxu0 %v14246_v49 }
 0x2a2   :  { %13100 = vmatpush3.bf16.msra.mxu1 %v14245_v46 }
 0x2a3   :  { %v12815_v60 = vpop.f32.mrf.mxu0  ;;  %10235 = vmatmul.mubr.bf16.vlgmr.msra.gmra.mxu0 %v2500_v48  ;;  %13129 = vmatprep.subr.bf16.mxu1 %v14247_v51  ;;  %v14287_v48 = vld [vmem:[%s17860_s1 + $0x1668] sm:$0xff]  }
 0x2a4   :  { %13108 = vmatpush3.bf16.msra.mxu0 %v14248_v53  ;;  %10314 = vmatprep.mubr.bf16.mxu0 %v2521_v54  ;;  %v14289_v53 = vld [vmem:[%s17860_s1 + $0x1628] sm:$0xff]  }
 0x2a5   :  { %v12837_v63 = vpop.f32.mrf.mxu1  ;;  %10275 = vmatmul.mubr.bf16.vlgmr.msra.gmra.mxu1 %v2522_v56  ;;  %v12816_v0 = vpop.f32.mrf.mxu0  ;;  %13109 = vmatprep.subr.bf16.mxu0 %v14250_v57  ;;  %v14290_v56 = vld [vmem:[%s17860_s1 + $0x16a8] sm:$0xff]  }
 0x2a6   :  { %13130 = vmatpush3.bf16.msra.mxu1 %v14249_v55  ;;  %v12817_v2 = vadd.f32 %v12816_v0, %v12815_v60  ;;  %10354 = vmatprep.mubr.bf16.mxu1 %v2525_v59  ;;  %v14291_v59 = vld [vmem:[%s17860_s1 + $0x1660] sm:$0xff]  }
 0x2a7   :  { %v12838_v4 = vpop.f32.mrf.mxu1  ;;  %v12818_v5 = vpop.f32.mrf.mxu0  ;;  %13131 = vmatprep.subr.bf16.mxu1 %v14251_v58  ;;  %v14294_v0 = vld [vmem:[%s17860_s1 + $0x16a0] sm:$0xff]  }
 0x2a8   :  { %v9757_v7 = vadd.f32 %v12817_v2, %v16758_v20  ;;  %v12839_v8 = vadd.f32 %v12838_v4, %v12837_v63  ;;  %13110 = vmatpush3.bf16.msra.mxu0 %v14252_v61  ;;  %v14264_v20 = vld [vmem:[%s17860_s1 + $0x1518] sm:$0xff]   ;;  %v14292_v61 = vld [vmem:[%s17860_s1 + $0x16e0] sm:$0xff]   ;;  %v14299_v5 = vld [vmem:[%s17860_s1 + $0x1650] sm:$0xff]  }
 0x2a9   :  { %v12840_v10 = vpop.f32.mrf.mxu1  ;;  %v12819_v11 = vpop.f32.mrf.mxu0  ;;  %13111 = vmatprep.subr.bf16.mxu0 %v14254_v1  ;;  %v14293_v63 = vld [vmem:[%s17860_s1 + $0x1620] sm:$0xff]   ;;  %v14295_v1 = vld [vmem:[%s17860_s1 + $0x1658] sm:$0xff]  }
 0x2aa   :  { %v16869_v13 = vadd.f32 %v12839_v8, %v9757_v7  ;;  %13132 = vmatpush3.bf16.msra.mxu1 %v14253_v62  ;;  %v14296_v2 = vld [vmem:[%s17860_s1 + $0x16d8] sm:$0xff]   ;;  %v14301_v7 = vld [vmem:[%s17860_s1 + $0x1610] sm:$0xff]   ;;  %v14304_v10 = vld [vmem:[%s17860_s1 + $0x16c8] sm:$0xff]  }
 0x2ab   :  { %v12841_v15 = vpop.f32.mrf.mxu1  ;;  %13133 = vmatprep.subr.bf16.mxu1 %v14255_v3  ;;  %v14297_v3 = vld [vmem:[%s17860_s1 + $0x1618] sm:$0xff]   ;;  %v14302_v8 = vld [vmem:[%s17860_s1 + $0x1690] sm:$0xff]   ;;  %v14305_v11 = vld [vmem:[%s17860_s1 + $0x1608] sm:$0xff]  }
 0x2ac   :  { %13112 = vmatpush3.bf16.msra.mxu0 %v14256_v6  ;;  %v14298_v4 = vld [vmem:[%s17860_s1 + $0x1698] sm:$0xff]   ;;  %v14300_v6 = vld [vmem:[%s17860_s1 + $0x16d0] sm:$0xff]   ;;  %v14308_v15 = vld [vmem:[%s17860_s1 + $0x16c0] sm:$0xff]  }
 0x2ad   :  { %13113 = vmatprep.subr.bf16.mxu0 %v14258_v12  ;;  %v14306_v12 = vld [vmem:[%s17860_s1 + $0x1688] sm:$0xff]  }
 0x2ae   :  { %13134 = vmatpush3.bf16.msra.mxu1 %v14257_v9  ;;  %v14303_v9 = vld [vmem:[%s17860_s1 + $0x1648] sm:$0xff]  }
 0x2af   :  { %13135 = vmatprep.subr.bf16.mxu1 %v14259_v14  ;;  %v41_v14 = vld [vmem:[%s17859_s0 + $0x58] sm:$0xff] }
 0x2b0   :  { %13114 = vmatpush3.bf16.msra.mxu0 %v14260_v16  ;;  %v2533_v16 = vrot.slane %v41_v14, %v14720_v41 }
 0x2b1   :  { %13115 = vmatprep.subr.bf16.mxu0 %v14262_v18  ;;  %v14309_v18 = vld [vmem:[%s17860_s1 + $0x1600] sm:$0xff]  }
 0x2b2   :  { %13136 = vmatpush3.bf16.msra.mxu1 %v14261_v17  ;;  %v2526_v17 = vcombine.high %v41_v14, %v41_v14  ;;  %v14347_v14 = vld [vmem:[%s17860_s1 + $0x18b8] sm:$0xff]  }
 0x2b3   :  { %13137 = vmatprep.subr.bf16.mxu1 %v14263_v19  ;;  %v14310_v19 = vld [vmem:[%s17860_s1 + $0x1680] sm:$0xff]  }
 0x2b4   :  { %13116 = vmatpush3.bf16.msra.mxu0 %v14264_v20  ;;  %v2541_v20 = vcombine.high %v2533_v16, %v2533_v16 }
 0x2b5   :  { %13117 = vmatprep.subr.bf16.mxu0 %v14266_v22  ;;  %v2549_v22 = vrot.slane %v2533_v16, %v14720_v41  ;;  %v14348_v16 = vld [vmem:[%s17860_s1 + $0x1870] sm:$0xff]  }
 0x2b6   :  { %13138 = vmatpush3.bf16.msra.mxu1 %v14265_v21  ;;  %v17034_v21 = vrot.slane %v2526_v17, %v14720_v41  ;;  %v14349_v17 = vld [vmem:[%s17860_s1 + $0x18f0] sm:$0xff]  }
 0x2b7   :  { %13139 = vmatprep.subr.bf16.mxu1 %v14267_v23  ;;  %v14311_v23 = vld [vmem:[%s17860_s1 + $0x1778] sm:$0xff]  }
 0x2b8   :  { %13118 = vmatpush3.bf16.msra.mxu0 %v14268_v24  ;;  %v2563_v24 = vrot.slane %v2541_v20, %v14720_v41  ;;  %v14351_v20 = vld [vmem:[%s17860_s1 + $0x18b0] sm:$0xff]  }
 0x2b9   :  { %13119 = vmatprep.subr.bf16.mxu0 %v14270_v26  ;;  %v2542_v26 = vcombine.high %v17034_v21, %v17034_v21 }
 0x2ba   :  { %13140 = vmatpush3.bf16.msra.mxu1 %v14269_v25  ;;  %v14312_v25 = vld [vmem:[%s17860_s1 + $0x17f8] sm:$0xff]  }
 0x2bb   :  { %13141 = vmatprep.subr.bf16.mxu1 %v14271_v27  ;;  %v14313_v27 = vld [vmem:[%s17860_s1 + $0x1738] sm:$0xff]  }
 0x2bc   :  { %13120 = vmatpush3.bf16.msra.mxu0 %v14272_v28  ;;  %v2573_v28 = vcombine.high %v2563_v24, %v2563_v24 }
 0x2bd   :  { %13121 = vmatprep.subr.bf16.mxu0 %v14274_v30  ;;  %v2570_v30 = vrot.slane %v2542_v26, %v14720_v41 }
 0x2be   :  { %13142 = vmatpush3.bf16.msra.mxu1 %v14273_v29  ;;  %v14314_v29 = vld [vmem:[%s17860_s1 + $0x17b8] sm:$0xff]  }
 0x2bf   :  { %13143 = vmatprep.subr.bf16.mxu1 %v14275_v31  ;;  %v2571_v31 = vcombine.high %v2549_v22, %v2549_v22 }
 0x2c0   :  { %13122 = vmatpush3.bf16.msra.mxu0 %v14276_v32  ;;  %v14315_v32 = vld [vmem:[%s17860_s1 + $0x1770] sm:$0xff]  }
 0x2c1   :  { %13151 = vmatprep.subr.bf16.mxu0 %v14279_v35 }
 0x2c2   :  { %13144 = vmatpush3.bf16.msra.mxu1 %v14277_v33  ;;  %v14316_v33 = vld [vmem:[%s17860_s1 + $0x17f0] sm:$0xff]  }
 0x2c3   :  { %v12859_v43 = vpop.f32.mrf.mxu0  ;;  %10315 = vmatmul.mubr.bf16.vlgmr.msra.gmra.mxu0 %v2507_v34  ;;  %13173 = vmatprep.subr.bf16.mxu1 %v14280_v36  ;;  %v2574_v34 = vcombine.high %v2570_v30, %v2570_v30  ;;  %v14317_v36 = vld [vmem:[%s17860_s1 + $0x1730] sm:$0xff]  }
 0x2c4   :  { %13152 = vmatpush3.bf16.msra.mxu0 %v14281_v37  ;;  %10394 = vmatprep.mubr.bf16.mxu0 %v2563_v24  ;;  %v14318_v37 = vld [vmem:[%s17860_s1 + $0x17b0] sm:$0xff]  }
 0x2c5   :  { %v12881_v46 = vpop.f32.mrf.mxu1  ;;  %10355 = vmatmul.mubr.bf16.vlgmr.msra.gmra.mxu1 %v2523_v39  ;;  %v12860_v47 = vpop.f32.mrf.mxu0  ;;  %13153 = vmatprep.subr.bf16.mxu0 %v14283_v40  ;;  %v14319_v40 = vld [vmem:[%s17860_s1 + $0x1768] sm:$0xff]  }
 0x2c6   :  { %13174 = vmatpush3.bf16.msra.mxu1 %v14282_v38  ;;  %v12861_v49 = vadd.f32 %v12860_v47, %v12859_v43  ;;  %10434 = vmatprep.mubr.bf16.mxu1 %v2573_v28  ;;  %v14320_v43 = vld [vmem:[%s17860_s1 + $0x17e8] sm:$0xff]  }
 0x2c7   :  { %v12882_v51 = vpop.f32.mrf.mxu1  ;;  %v12862_v52 = vpop.f32.mrf.mxu0  ;;  %13175 = vmatprep.subr.bf16.mxu1 %v14284_v42  ;;  %v14354_v28 = vld [vmem:[%s17860_s1 + $0x1828] sm:$0xff]  }
 0x2c8   :  { %v9837_v54 = vadd.f32 %v12861_v49, %v16869_v13  ;;  %v12883_v55 = vadd.f32 %v12882_v51, %v12881_v46  ;;  %13154 = vmatpush3.bf16.msra.mxu0 %v14285_v44  ;;  %v14307_v13 = vld [vmem:[%s17860_s1 + $0x1640] sm:$0xff]   ;;  %v14321_v46 = vld [vmem:[%s17860_s1 + $0x1728] sm:$0xff]  }
 0x2c9   :  { %v12884_v57 = vpop.f32.mrf.mxu1  ;;  %v12863_v58 = vpop.f32.mrf.mxu0  ;;  %13155 = vmatprep.subr.bf16.mxu0 %v14287_v48  ;;  %v14322_v49 = vld [vmem:[%s17860_s1 + $0x17a8] sm:$0xff]   ;;  %v14323_v52 = vld [vmem:[%s17860_s1 + $0x1760] sm:$0xff]  }
 0x2ca   :  { %v16970_v60 = vadd.f32 %v12883_v55, %v9837_v54  ;;  %13176 = vmatpush3.bf16.msra.mxu1 %v14286_v45  ;;  %v14324_v54 = vld [vmem:[%s17860_s1 + $0x17e0] sm:$0xff]   ;;  %v14327_v58 = vld [vmem:[%s17860_s1 + $0x1758] sm:$0xff]  }
 0x2cb   :  { %v12885_v62 = vpop.f32.mrf.mxu1  ;;  %13177 = vmatprep.subr.bf16.mxu1 %v14288_v50  ;;  %v14326_v57 = vld [vmem:[%s17860_s1 + $0x17a0] sm:$0xff]  }
 0x2cc   :  { %13156 = vmatpush3.bf16.msra.mxu0 %v14289_v53  ;;  %v14331_v62 = vld [vmem:[%s17860_s1 + $0x1750] sm:$0xff]  }
 0x2cd   :  { %13157 = vmatprep.subr.bf16.mxu0 %v14291_v59  ;;  %v14328_v59 = vld [vmem:[%s17860_s1 + $0x17d8] sm:$0xff]  }
 0x2ce   :  { %13178 = vmatpush3.bf16.msra.mxu1 %v14290_v56  ;;  %v14325_v56 = vld [vmem:[%s17860_s1 + $0x1720] sm:$0xff]  }
 0x2cf   :  { %13179 = vmatprep.subr.bf16.mxu1 %v14292_v61  ;;  %v14330_v61 = vld [vmem:[%s17860_s1 + $0x1798] sm:$0xff]  }
 0x2d0   :  { %13158 = vmatpush3.bf16.msra.mxu0 %v14293_v63  ;;  %v14332_v63 = vld [vmem:[%s17860_s1 + $0x17d0] sm:$0xff]  }
 0x2d1   :  { %13159 = vmatprep.subr.bf16.mxu0 %v14295_v1  ;;  %v14334_v1 = vld [vmem:[%s17860_s1 + $0x1790] sm:$0xff]  }
 0x2d2   :  { %13180 = vmatpush3.bf16.msra.mxu1 %v14294_v0  ;;  %v14333_v0 = vld [vmem:[%s17860_s1 + $0x1710] sm:$0xff]  }
 0x2d3   :  { %13181 = vmatprep.subr.bf16.mxu1 %v14296_v2  ;;  %v14335_v2 = vld [vmem:[%s17860_s1 + $0x1748] sm:$0xff]  }
 0x2d4   :  { %13160 = vmatpush3.bf16.msra.mxu0 %v14297_v3  ;;  %v14336_v3 = vld [vmem:[%s17860_s1 + $0x17c8] sm:$0xff]  }
 0x2d5   :  { %13161 = vmatprep.subr.bf16.mxu0 %v14299_v5  ;;  %v14338_v5 = vld [vmem:[%s17860_s1 + $0x1788] sm:$0xff]  }
 0x2d6   :  { %13182 = vmatpush3.bf16.msra.mxu1 %v14298_v4  ;;  %v14337_v4 = vld [vmem:[%s17860_s1 + $0x1708] sm:$0xff]  }
 0x2d7   :  { %13183 = vmatprep.subr.bf16.mxu1 %v14300_v6  ;;  %v14339_v6 = vld [vmem:[%s17860_s1 + $0x1740] sm:$0xff]  }
 0x2d8   :  { %13162 = vmatpush3.bf16.msra.mxu0 %v14301_v7  ;;  %v14340_v7 = vld [vmem:[%s17860_s1 + $0x17c0] sm:$0xff]  }
 0x2d9   :  { %13163 = vmatprep.subr.bf16.mxu0 %v14303_v9  ;;  %v14342_v9 = vld [vmem:[%s17860_s1 + $0x1780] sm:$0xff]  }
 0x2da   :  { %13184 = vmatpush3.bf16.msra.mxu1 %v14302_v8  ;;  %v14341_v8 = vld [vmem:[%s17860_s1 + $0x1700] sm:$0xff]  }
 0x2db   :  { %13185 = vmatprep.subr.bf16.mxu1 %v14304_v10  ;;  %v2556_v10 = vrot.slane %v17034_v21, %v14720_v41 }
 0x2dc   :  { %13164 = vmatpush3.bf16.msra.mxu0 %v14305_v11  ;;  %v14344_v11 = vld [vmem:[%s17860_s1 + $0x1878] sm:$0xff]  }
 0x2dd   :  { %13165 = vmatprep.subr.bf16.mxu0 %v14307_v13  ;;  %v14346_v13 = vld [vmem:[%s17860_s1 + $0x1838] sm:$0xff]  }
 0x2de   :  { %13186 = vmatpush3.bf16.msra.mxu1 %v14306_v12  ;;  %v14345_v12 = vld [vmem:[%s17860_s1 + $0x18f8] sm:$0xff]  }
 0x2df   :  { %13187 = vmatprep.subr.bf16.mxu1 %v14308_v15  ;;  %v2572_v15 = vcombine.high %v2556_v10, %v2556_v10 }
 0x2e0   :  { %13166 = vmatpush3.bf16.msra.mxu0 %v14309_v18 }
 0x2e1   :  { %13195 = vmatprep.subr.bf16.mxu0 %v14311_v23  ;;  %v14352_v23 = vld [vmem:[%s17860_s1 + $0x1868] sm:$0xff]  }
 0x2e2   :  { %13188 = vmatpush3.bf16.msra.mxu1 %v14310_v19  ;;  %v14350_v19 = vld [vmem:[%s17860_s1 + $0x1830] sm:$0xff]  }
 0x2e3   :  { %v12903_v35 = vpop.f32.mrf.mxu0  ;;  %10395 = vmatmul.mubr.bf16.vlgmr.msra.gmra.mxu0 %v2549_v22  ;;  %13217 = vmatprep.subr.bf16.mxu1 %v14312_v25  ;;  %v14353_v25 = vld [vmem:[%s17860_s1 + $0x18e8] sm:$0xff]  }
 0x2e4   :  { %13196 = vmatpush3.bf16.msra.mxu0 %v14313_v27  ;;  %10474 = vmatprep.mubr.bf16.mxu0 %v2570_v30 }
 0x2e5   :  { %v12925_v38 = vpop.f32.mrf.mxu1  ;;  %10435 = vmatmul.mubr.bf16.vlgmr.msra.gmra.mxu1 %v2571_v31  ;;  %v12904_v39 = vpop.f32.mrf.mxu0  ;;  %13197 = vmatprep.subr.bf16.mxu0 %v14315_v32  ;;  %v14355_v31 = vld [vmem:[%s17860_s1 + $0x18a8] sm:$0xff]  }
 0x2e6   :  { %13218 = vmatpush3.bf16.msra.mxu1 %v14314_v29  ;;  %v12905_v42 = vadd.f32 %v12904_v39, %v12903_v35  ;;  %10514 = vmatprep.mubr.bf16.mxu1 %v2574_v34  ;;  %v14356_v34 = vld [vmem:[%s17860_s1 + $0x1860] sm:$0xff]  }
 0x2e7   :  { %v12926_v44 = vpop.f32.mrf.mxu1  ;;  %v12906_v45 = vpop.f32.mrf.mxu0  ;;  %13219 = vmatprep.subr.bf16.mxu1 %v14316_v33  ;;  %v14359_v39 = vld [vmem:[%s17860_s1 + $0x18a0] sm:$0xff]  }
 0x2e8   :  { %v9917_v47 = vadd.f32 %v12905_v42, %v16970_v60  ;;  %v12927_v48 = vadd.f32 %v12926_v44, %v12925_v38  ;;  %13198 = vmatpush3.bf16.msra.mxu0 %v14317_v36  ;;  %v14329_v60 = vld [vmem:[%s17860_s1 + $0x1718] sm:$0xff]   ;;  %v14357_v36 = vld [vmem:[%s17860_s1 + $0x18e0] sm:$0xff]   ;;  %v14364_v45 = vld [vmem:[%s17860_s1 + $0x1850] sm:$0xff]  }
 0x2e9   :  { %v12928_v50 = vpop.f32.mrf.mxu1  ;;  %v12907_v51 = vpop.f32.mrf.mxu0  ;;  %13199 = vmatprep.subr.bf16.mxu0 %v14319_v40  ;;  %v14358_v38 = vld [vmem:[%s17860_s1 + $0x1820] sm:$0xff]   ;;  %v14360_v40 = vld [vmem:[%s17860_s1 + $0x1858] sm:$0xff]  }
 0x2ea   :  { %v17081_v53 = vadd.f32 %v12927_v48, %v9917_v47  ;;  %13220 = vmatpush3.bf16.msra.mxu1 %v14318_v37  ;;  %v14361_v42 = vld [vmem:[%s17860_s1 + $0x18d8] sm:$0xff]   ;;  %v14366_v47 = vld [vmem:[%s17860_s1 + $0x1810] sm:$0xff]   ;;  %v14369_v50 = vld [vmem:[%s17860_s1 + $0x18c8] sm:$0xff]  }
 0x2eb   :  { %v12929_v55 = vpop.f32.mrf.mxu1  ;;  %13221 = vmatprep.subr.bf16.mxu1 %v14320_v43  ;;  %v14362_v43 = vld [vmem:[%s17860_s1 + $0x1818] sm:$0xff]   ;;  %v14367_v48 = vld [vmem:[%s17860_s1 + $0x1890] sm:$0xff]   ;;  %v14370_v51 = vld [vmem:[%s17860_s1 + $0x1808] sm:$0xff]  }
 0x2ec   :  { %13200 = vmatpush3.bf16.msra.mxu0 %v14321_v46  ;;  %v14363_v44 = vld [vmem:[%s17860_s1 + $0x1898] sm:$0xff]   ;;  %v14365_v46 = vld [vmem:[%s17860_s1 + $0x18d0] sm:$0xff]   ;;  %v14373_v55 = vld [vmem:[%s17860_s1 + $0x18c0] sm:$0xff]  }
 0x2ed   :  { %13201 = vmatprep.subr.bf16.mxu0 %v14323_v52  ;;  %v14371_v52 = vld [vmem:[%s17860_s1 + $0x1888] sm:$0xff]  }
 0x2ee   :  { %13222 = vmatpush3.bf16.msra.mxu1 %v14322_v49  ;;  %v14368_v49 = vld [vmem:[%s17860_s1 + $0x1848] sm:$0xff]  }
 0x2ef   :  { %13223 = vmatprep.subr.bf16.mxu1 %v14324_v54  ;;  %v42_v54 = vld [vmem:[%s17859_s0 + $0x60] sm:$0xff] }
 0x2f0   :  { %13202 = vmatpush3.bf16.msra.mxu0 %v14325_v56  ;;  %v2582_v56 = vrot.slane %v42_v54, %v14720_v41 }
 0x2f1   :  { %13203 = vmatprep.subr.bf16.mxu0 %v14327_v58  ;;  %v14374_v58 = vld [vmem:[%s17860_s1 + $0x1800] sm:$0xff]  }
 0x2f2   :  { %13224 = vmatpush3.bf16.msra.mxu1 %v14326_v57  ;;  %v2575_v57 = vcombine.high %v42_v54, %v42_v54  ;;  %v14412_v54 = vld [vmem:[%s17860_s1 + $0x1ab8] sm:$0xff]  }
 0x2f3   :  { %13225 = vmatprep.subr.bf16.mxu1 %v14328_v59  ;;  %v14375_v59 = vld [vmem:[%s17860_s1 + $0x1880] sm:$0xff]  }
 0x2f4   :  { %13204 = vmatpush3.bf16.msra.mxu0 %v14329_v60  ;;  %v2590_v60 = vcombine.high %v2582_v56, %v2582_v56 }
 0x2f5   :  { %13205 = vmatprep.subr.bf16.mxu0 %v14331_v62  ;;  %v2598_v62 = vrot.slane %v2582_v56, %v14720_v41  ;;  %v14413_v56 = vld [vmem:[%s17860_s1 + $0x1a70] sm:$0xff]  }
 0x2f6   :  { %13226 = vmatpush3.bf16.msra.mxu1 %v14330_v61  ;;  %v17246_v61 = vrot.slane %v2575_v57, %v14720_v41  ;;  %v14414_v57 = vld [vmem:[%s17860_s1 + $0x1af0] sm:$0xff]  }
 0x2f7   :  { %13227 = vmatprep.subr.bf16.mxu1 %v14332_v63  ;;  %v14376_v63 = vld [vmem:[%s17860_s1 + $0x1978] sm:$0xff]  }
 0x2f8   :  { %13206 = vmatpush3.bf16.msra.mxu0 %v14333_v0  ;;  %v2612_v0 = vrot.slane %v2590_v60, %v14720_v41  ;;  %v14416_v60 = vld [vmem:[%s17860_s1 + $0x1ab0] sm:$0xff]  }
 0x2f9   :  { %13207 = vmatprep.subr.bf16.mxu0 %v14335_v2  ;;  %v2591_v2 = vcombine.high %v17246_v61, %v17246_v61 }
 0x2fa   :  { %13228 = vmatpush3.bf16.msra.mxu1 %v14334_v1  ;;  %v14377_v1 = vld [vmem:[%s17860_s1 + $0x19f8] sm:$0xff]  }
 0x2fb   :  { %13229 = vmatprep.subr.bf16.mxu1 %v14336_v3  ;;  %v14378_v3 = vld [vmem:[%s17860_s1 + $0x1938] sm:$0xff]  }
 0x2fc   :  { %13208 = vmatpush3.bf16.msra.mxu0 %v14337_v4  ;;  %v2622_v4 = vcombine.high %v2612_v0, %v2612_v0 }
 0x2fd   :  { %13209 = vmatprep.subr.bf16.mxu0 %v14339_v6  ;;  %v2619_v6 = vrot.slane %v2591_v2, %v14720_v41 }
 0x2fe   :  { %13230 = vmatpush3.bf16.msra.mxu1 %v14338_v5  ;;  %v14379_v5 = vld [vmem:[%s17860_s1 + $0x19b8] sm:$0xff]  }
 0x2ff   :  { %13231 = vmatprep.subr.bf16.mxu1 %v14340_v7  ;;  %v2620_v7 = vcombine.high %v2598_v62, %v2598_v62 }
 0x300   :  { %13210 = vmatpush3.bf16.msra.mxu0 %v14341_v8  ;;  %v14380_v8 = vld [vmem:[%s17860_s1 + $0x1970] sm:$0xff]  }
 0x301   :  { %13239 = vmatprep.subr.bf16.mxu0 %v14344_v11 }
 0x302   :  { %13232 = vmatpush3.bf16.msra.mxu1 %v14342_v9  ;;  %v14381_v9 = vld [vmem:[%s17860_s1 + $0x19f0] sm:$0xff]  }
 0x303   :  { %v12947_v18 = vpop.f32.mrf.mxu0  ;;  %10475 = vmatmul.mubr.bf16.vlgmr.msra.gmra.mxu0 %v2556_v10  ;;  %13261 = vmatprep.subr.bf16.mxu1 %v14345_v12  ;;  %v2623_v10 = vcombine.high %v2619_v6, %v2619_v6  ;;  %v14382_v12 = vld [vmem:[%s17860_s1 + $0x1930] sm:$0xff]  }
 0x304   :  { %13240 = vmatpush3.bf16.msra.mxu0 %v14346_v13  ;;  %10554 = vmatprep.mubr.bf16.mxu0 %v2612_v0  ;;  %v14383_v13 = vld [vmem:[%s17860_s1 + $0x19b0] sm:$0xff]  }
 0x305   :  { %v12969_v21 = vpop.f32.mrf.mxu1  ;;  %10515 = vmatmul.mubr.bf16.vlgmr.msra.gmra.mxu1 %v2572_v15  ;;  %v12948_v22 = vpop.f32.mrf.mxu0  ;;  %13241 = vmatprep.subr.bf16.mxu0 %v14348_v16  ;;  %v14384_v16 = vld [vmem:[%s17860_s1 + $0x1968] sm:$0xff]  }
 0x306   :  { %13262 = vmatpush3.bf16.msra.mxu1 %v14347_v14  ;;  %v12949_v24 = vadd.f32 %v12948_v22, %v12947_v18  ;;  %10594 = vmatprep.mubr.bf16.mxu1 %v2622_v4  ;;  %v14385_v18 = vld [vmem:[%s17860_s1 + $0x19e8] sm:$0xff]  }
 0x307   :  { %v12970_v26 = vpop.f32.mrf.mxu1  ;;  %v12950_v27 = vpop.f32.mrf.mxu0  ;;  %13263 = vmatprep.subr.bf16.mxu1 %v14349_v17  ;;  %v14419_v4 = vld [vmem:[%s17860_s1 + $0x1a28] sm:$0xff]  }
 0x308   :  { %v9997_v29 = vadd.f32 %v12949_v24, %v17081_v53  ;;  %v12971_v30 = vadd.f32 %v12970_v26, %v12969_v21  ;;  %13242 = vmatpush3.bf16.msra.mxu0 %v14350_v19  ;;  %v14372_v53 = vld [vmem:[%s17860_s1 + $0x1840] sm:$0xff]   ;;  %v14386_v21 = vld [vmem:[%s17860_s1 + $0x1928] sm:$0xff]  }
 0x309   :  { %v12972_v32 = vpop.f32.mrf.mxu1  ;;  %v12951_v33 = vpop.f32.mrf.mxu0  ;;  %13243 = vmatprep.subr.bf16.mxu0 %v14352_v23  ;;  %v14387_v24 = vld [vmem:[%s17860_s1 + $0x19a8] sm:$0xff]   ;;  %v14388_v27 = vld [vmem:[%s17860_s1 + $0x1960] sm:$0xff]  }
 0x30a   :  { %v17182_v35 = vadd.f32 %v12971_v30, %v9997_v29  ;;  %13264 = vmatpush3.bf16.msra.mxu1 %v14351_v20  ;;  %v14389_v29 = vld [vmem:[%s17860_s1 + $0x19e0] sm:$0xff]   ;;  %v14392_v33 = vld [vmem:[%s17860_s1 + $0x1958] sm:$0xff]  }
 0x30b   :  { %v12973_v37 = vpop.f32.mrf.mxu1  ;;  %13265 = vmatprep.subr.bf16.mxu1 %v14353_v25  ;;  %v14391_v32 = vld [vmem:[%s17860_s1 + $0x19a0] sm:$0xff]  }
 0x30c   :  { %13244 = vmatpush3.bf16.msra.mxu0 %v14354_v28  ;;  %v14396_v37 = vld [vmem:[%s17860_s1 + $0x1950] sm:$0xff]  }
 0x30d   :  { %13245 = vmatprep.subr.bf16.mxu0 %v14356_v34  ;;  %v14393_v34 = vld [vmem:[%s17860_s1 + $0x19d8] sm:$0xff]  }
 0x30e   :  { %13266 = vmatpush3.bf16.msra.mxu1 %v14355_v31  ;;  %v14390_v31 = vld [vmem:[%s17860_s1 + $0x1920] sm:$0xff]  }
 0x30f   :  { %13267 = vmatprep.subr.bf16.mxu1 %v14357_v36  ;;  %v14395_v36 = vld [vmem:[%s17860_s1 + $0x1998] sm:$0xff]  }
 0x310   :  { %13246 = vmatpush3.bf16.msra.mxu0 %v14358_v38  ;;  %v14397_v38 = vld [vmem:[%s17860_s1 + $0x19d0] sm:$0xff]  }
 0x311   :  { %13247 = vmatprep.subr.bf16.mxu0 %v14360_v40  ;;  %v14399_v40 = vld [vmem:[%s17860_s1 + $0x1990] sm:$0xff]  }
 0x312   :  { %13268 = vmatpush3.bf16.msra.mxu1 %v14359_v39  ;;  %v14398_v39 = vld [vmem:[%s17860_s1 + $0x1910] sm:$0xff]  }
 0x313   :  { %13269 = vmatprep.subr.bf16.mxu1 %v14361_v42  ;;  %v14400_v42 = vld [vmem:[%s17860_s1 + $0x1948] sm:$0xff]  }
 0x314   :  { %13248 = vmatpush3.bf16.msra.mxu0 %v14362_v43  ;;  %v14401_v43 = vld [vmem:[%s17860_s1 + $0x19c8] sm:$0xff]  }
 0x315   :  { %13249 = vmatprep.subr.bf16.mxu0 %v14364_v45  ;;  %v14403_v45 = vld [vmem:[%s17860_s1 + $0x1988] sm:$0xff]  }
 0x316   :  { %13270 = vmatpush3.bf16.msra.mxu1 %v14363_v44  ;;  %v14402_v44 = vld [vmem:[%s17860_s1 + $0x1908] sm:$0xff]  }
 0x317   :  { %13271 = vmatprep.subr.bf16.mxu1 %v14365_v46  ;;  %v14404_v46 = vld [vmem:[%s17860_s1 + $0x1940] sm:$0xff]  }
 0x318   :  { %13250 = vmatpush3.bf16.msra.mxu0 %v14366_v47  ;;  %v14405_v47 = vld [vmem:[%s17860_s1 + $0x19c0] sm:$0xff]  }
 0x319   :  { %13251 = vmatprep.subr.bf16.mxu0 %v14368_v49  ;;  %v14407_v49 = vld [vmem:[%s17860_s1 + $0x1980] sm:$0xff]  }
 0x31a   :  { %13272 = vmatpush3.bf16.msra.mxu1 %v14367_v48  ;;  %v14406_v48 = vld [vmem:[%s17860_s1 + $0x1900] sm:$0xff]  }
 0x31b   :  { %13273 = vmatprep.subr.bf16.mxu1 %v14369_v50  ;;  %v2605_v50 = vrot.slane %v17246_v61, %v14720_v41 }
 0x31c   :  { %13252 = vmatpush3.bf16.msra.mxu0 %v14370_v51  ;;  %v14409_v51 = vld [vmem:[%s17860_s1 + $0x1a78] sm:$0xff]  }
 0x31d   :  { %13253 = vmatprep.subr.bf16.mxu0 %v14372_v53  ;;  %v14411_v53 = vld [vmem:[%s17860_s1 + $0x1a38] sm:$0xff]  }
 0x31e   :  { %13274 = vmatpush3.bf16.msra.mxu1 %v14371_v52  ;;  %v14410_v52 = vld [vmem:[%s17860_s1 + $0x1af8] sm:$0xff]  }
 0x31f   :  { %13275 = vmatprep.subr.bf16.mxu1 %v14373_v55  ;;  %v2621_v55 = vcombine.high %v2605_v50, %v2605_v50 }
 0x320   :  { %13254 = vmatpush3.bf16.msra.mxu0 %v14374_v58 }
 0x321   :  { %13283 = vmatprep.subr.bf16.mxu0 %v14376_v63  ;;  %v14417_v63 = vld [vmem:[%s17860_s1 + $0x1a68] sm:$0xff]  }
 0x322   :  { %13276 = vmatpush3.bf16.msra.mxu1 %v14375_v59  ;;  %v14415_v59 = vld [vmem:[%s17860_s1 + $0x1a30] sm:$0xff]  }
 0x323   :  { %v12991_v11 = vpop.f32.mrf.mxu0  ;;  %10555 = vmatmul.mubr.bf16.vlgmr.msra.gmra.mxu0 %v2598_v62  ;;  %13305 = vmatprep.subr.bf16.mxu1 %v14377_v1  ;;  %v14418_v1 = vld [vmem:[%s17860_s1 + $0x1ae8] sm:$0xff]  }
 0x324   :  { %13284 = vmatpush3.bf16.msra.mxu0 %v14378_v3  ;;  %10634 = vmatprep.mubr.bf16.mxu0 %v2619_v6 }
 0x325   :  { %v13013_v14 = vpop.f32.mrf.mxu1  ;;  %10595 = vmatmul.mubr.bf16.vlgmr.msra.gmra.mxu1 %v2620_v7  ;;  %v12992_v15 = vpop.f32.mrf.mxu0  ;;  %13285 = vmatprep.subr.bf16.mxu0 %v14380_v8  ;;  %v14420_v7 = vld [vmem:[%s17860_s1 + $0x1aa8] sm:$0xff]  }
 0x326   :  { %13306 = vmatpush3.bf16.msra.mxu1 %v14379_v5  ;;  %v12993_v17 = vadd.f32 %v12992_v15, %v12991_v11  ;;  %10674 = vmatprep.mubr.bf16.mxu1 %v2623_v10  ;;  %v14421_v10 = vld [vmem:[%s17860_s1 + $0x1a60] sm:$0xff]  }
 0x327   :  { %v13014_v19 = vpop.f32.mrf.mxu1  ;;  %v12994_v20 = vpop.f32.mrf.mxu0  ;;  %13307 = vmatprep.subr.bf16.mxu1 %v14381_v9  ;;  %v14424_v15 = vld [vmem:[%s17860_s1 + $0x1aa0] sm:$0xff]  }
 0x328   :  { %v10077_v22 = vadd.f32 %v12993_v17, %v17182_v35  ;;  %v13015_v23 = vadd.f32 %v13014_v19, %v13013_v14  ;;  %13286 = vmatpush3.bf16.msra.mxu0 %v14382_v12  ;;  %v14394_v35 = vld [vmem:[%s17860_s1 + $0x1918] sm:$0xff]   ;;  %v14422_v12 = vld [vmem:[%s17860_s1 + $0x1ae0] sm:$0xff]   ;;  %v14429_v20 = vld [vmem:[%s17860_s1 + $0x1a50] sm:$0xff]  }
 0x329   :  { %v13016_v25 = vpop.f32.mrf.mxu1  ;;  %v12995_v26 = vpop.f32.mrf.mxu0  ;;  %13287 = vmatprep.subr.bf16.mxu0 %v14384_v16  ;;  %v14423_v14 = vld [vmem:[%s17860_s1 + $0x1a20] sm:$0xff]   ;;  %v14425_v16 = vld [vmem:[%s17860_s1 + $0x1a58] sm:$0xff]  }
 0x32a   :  { %v17293_v28 = vadd.f32 %v13015_v23, %v10077_v22  ;;  %13308 = vmatpush3.bf16.msra.mxu1 %v14383_v13  ;;  %v14426_v17 = vld [vmem:[%s17860_s1 + $0x1ad8] sm:$0xff]   ;;  %v14431_v22 = vld [vmem:[%s17860_s1 + $0x1a10] sm:$0xff]   ;;  %v14434_v25 = vld [vmem:[%s17860_s1 + $0x1ac8] sm:$0xff]  }
 0x32b   :  { %v13017_v30 = vpop.f32.mrf.mxu1  ;;  %13309 = vmatprep.subr.bf16.mxu1 %v14385_v18  ;;  %v14427_v18 = vld [vmem:[%s17860_s1 + $0x1a18] sm:$0xff]   ;;  %v14432_v23 = vld [vmem:[%s17860_s1 + $0x1a90] sm:$0xff]   ;;  %v14435_v26 = vld [vmem:[%s17860_s1 + $0x1a08] sm:$0xff]  }
 0x32c   :  { %13288 = vmatpush3.bf16.msra.mxu0 %v14386_v21  ;;  %v14428_v19 = vld [vmem:[%s17860_s1 + $0x1a98] sm:$0xff]   ;;  %v14430_v21 = vld [vmem:[%s17860_s1 + $0x1ad0] sm:$0xff]   ;;  %v14438_v30 = vld [vmem:[%s17860_s1 + $0x1ac0] sm:$0xff]  }
 0x32d   :  { %13289 = vmatprep.subr.bf16.mxu0 %v14388_v27  ;;  %v14436_v27 = vld [vmem:[%s17860_s1 + $0x1a88] sm:$0xff]  }
 0x32e   :  { %13310 = vmatpush3.bf16.msra.mxu1 %v14387_v24  ;;  %v14433_v24 = vld [vmem:[%s17860_s1 + $0x1a48] sm:$0xff]  }
 0x32f   :  { %13311 = vmatprep.subr.bf16.mxu1 %v14389_v29  ;;  %v43_v29 = vld [vmem:[%s17859_s0 + $0x68] sm:$0xff] }
 0x330   :  { %13290 = vmatpush3.bf16.msra.mxu0 %v14390_v31  ;;  %v2631_v31 = vrot.slane %v43_v29, %v14720_v41 }
 0x331   :  { %13291 = vmatprep.subr.bf16.mxu0 %v14392_v33  ;;  %v14439_v33 = vld [vmem:[%s17860_s1 + $0x1a00] sm:$0xff]  }
 0x332   :  { %13312 = vmatpush3.bf16.msra.mxu1 %v14391_v32  ;;  %v2624_v32 = vcombine.high %v43_v29, %v43_v29  ;;  %v14477_v29 = vld [vmem:[%s17860_s1 + $0x1cb8] sm:$0xff]  }
 0x333   :  { %13313 = vmatprep.subr.bf16.mxu1 %v14393_v34  ;;  %v14440_v34 = vld [vmem:[%s17860_s1 + $0x1a80] sm:$0xff]  }
 0x334   :  { %13292 = vmatpush3.bf16.msra.mxu0 %v14394_v35  ;;  %v2639_v35 = vcombine.high %v2631_v31, %v2631_v31 }
 0x335   :  { %13293 = vmatprep.subr.bf16.mxu0 %v14396_v37  ;;  %v2647_v37 = vrot.slane %v2631_v31, %v14720_v41  ;;  %v14478_v31 = vld [vmem:[%s17860_s1 + $0x1c70] sm:$0xff]  }
 0x336   :  { %13314 = vmatpush3.bf16.msra.mxu1 %v14395_v36  ;;  %v17458_v36 = vrot.slane %v2624_v32, %v14720_v41  ;;  %v14479_v32 = vld [vmem:[%s17860_s1 + $0x1cf0] sm:$0xff]  }
 0x337   :  { %13315 = vmatprep.subr.bf16.mxu1 %v14397_v38  ;;  %v14441_v38 = vld [vmem:[%s17860_s1 + $0x1b78] sm:$0xff]  }
 0x338   :  { %13294 = vmatpush3.bf16.msra.mxu0 %v14398_v39  ;;  %v2661_v39 = vrot.slane %v2639_v35, %v14720_v41  ;;  %v14481_v35 = vld [vmem:[%s17860_s1 + $0x1cb0] sm:$0xff]  }
 0x339   :  { %13295 = vmatprep.subr.bf16.mxu0 %v14400_v42  ;;  %v2640_v42 = vcombine.high %v17458_v36, %v17458_v36 }
 0x33a   :  { %13316 = vmatpush3.bf16.msra.mxu1 %v14399_v40  ;;  %v14442_v40 = vld [vmem:[%s17860_s1 + $0x1bf8] sm:$0xff]  }
 0x33b   :  { %13317 = vmatprep.subr.bf16.mxu1 %v14401_v43  ;;  %v14443_v43 = vld [vmem:[%s17860_s1 + $0x1b38] sm:$0xff]  }
 0x33c   :  { %13296 = vmatpush3.bf16.msra.mxu0 %v14402_v44  ;;  %v2671_v44 = vcombine.high %v2661_v39, %v2661_v39 }
 0x33d   :  { %13297 = vmatprep.subr.bf16.mxu0 %v14404_v46  ;;  %v2668_v46 = vrot.slane %v2640_v42, %v14720_v41 }
 0x33e   :  { %13318 = vmatpush3.bf16.msra.mxu1 %v14403_v45  ;;  %v14444_v45 = vld [vmem:[%s17860_s1 + $0x1bb8] sm:$0xff]  }
 0x33f   :  { %13319 = vmatprep.subr.bf16.mxu1 %v14405_v47  ;;  %v2669_v47 = vcombine.high %v2647_v37, %v2647_v37 }
 0x340   :  { %13298 = vmatpush3.bf16.msra.mxu0 %v14406_v48  ;;  %v14445_v48 = vld [vmem:[%s17860_s1 + $0x1b70] sm:$0xff]  }
 0x341   :  { %13327 = vmatprep.subr.bf16.mxu0 %v14409_v51 }
 0x342   :  { %13320 = vmatpush3.bf16.msra.mxu1 %v14407_v49  ;;  %v14446_v49 = vld [vmem:[%s17860_s1 + $0x1bf0] sm:$0xff]  }
 0x343   :  { %v13035_v58 = vpop.f32.mrf.mxu0  ;;  %10635 = vmatmul.mubr.bf16.vlgmr.msra.gmra.mxu0 %v2605_v50  ;;  %13349 = vmatprep.subr.bf16.mxu1 %v14410_v52  ;;  %v2672_v50 = vcombine.high %v2668_v46, %v2668_v46  ;;  %v14447_v52 = vld [vmem:[%s17860_s1 + $0x1b30] sm:$0xff]  }
 0x344   :  { %13328 = vmatpush3.bf16.msra.mxu0 %v14411_v53  ;;  %10714 = vmatprep.mubr.bf16.mxu0 %v2661_v39  ;;  %v14448_v53 = vld [vmem:[%s17860_s1 + $0x1bb0] sm:$0xff]  }
 0x345   :  { %v13057_v61 = vpop.f32.mrf.mxu1  ;;  %10675 = vmatmul.mubr.bf16.vlgmr.msra.gmra.mxu1 %v2621_v55  ;;  %v13036_v62 = vpop.f32.mrf.mxu0  ;;  %13329 = vmatprep.subr.bf16.mxu0 %v14413_v56  ;;  %v14449_v56 = vld [vmem:[%s17860_s1 + $0x1b68] sm:$0xff]  }
 0x346   :  { %13350 = vmatpush3.bf16.msra.mxu1 %v14412_v54  ;;  %v13037_v0 = vadd.f32 %v13036_v62, %v13035_v58  ;;  %10754 = vmatprep.mubr.bf16.mxu1 %v2671_v44  ;;  %v14450_v58 = vld [vmem:[%s17860_s1 + $0x1be8] sm:$0xff]  }
 0x347   :  { %v13058_v2 = vpop.f32.mrf.mxu1  ;;  %v13038_v3 = vpop.f32.mrf.mxu0  ;;  %13351 = vmatprep.subr.bf16.mxu1 %v14414_v57  ;;  %v14484_v44 = vld [vmem:[%s17860_s1 + $0x1c28] sm:$0xff]  }
 0x348   :  { %v10157_v5 = vadd.f32 %v13037_v0, %v17293_v28  ;;  %v13059_v6 = vadd.f32 %v13058_v2, %v13057_v61  ;;  %13330 = vmatpush3.bf16.msra.mxu0 %v14415_v59  ;;  %v14437_v28 = vld [vmem:[%s17860_s1 + $0x1a40] sm:$0xff]   ;;  %v14451_v61 = vld [vmem:[%s17860_s1 + $0x1b28] sm:$0xff]  }
 0x349   :  { %v13060_v8 = vpop.f32.mrf.mxu1  ;;  %v13039_v9 = vpop.f32.mrf.mxu0  ;;  %13331 = vmatprep.subr.bf16.mxu0 %v14417_v63  ;;  %v14452_v0 = vld [vmem:[%s17860_s1 + $0x1ba8] sm:$0xff]   ;;  %v14453_v3 = vld [vmem:[%s17860_s1 + $0x1b60] sm:$0xff]  }
 0x34a   :  { %v17394_v11 = vadd.f32 %v13059_v6, %v10157_v5  ;;  %13352 = vmatpush3.bf16.msra.mxu1 %v14416_v60  ;;  %v14454_v5 = vld [vmem:[%s17860_s1 + $0x1be0] sm:$0xff]   ;;  %v14457_v9 = vld [vmem:[%s17860_s1 + $0x1b58] sm:$0xff]  }
 0x34b   :  { %v13061_v13 = vpop.f32.mrf.mxu1  ;;  %13353 = vmatprep.subr.bf16.mxu1 %v14418_v1  ;;  %v14456_v8 = vld [vmem:[%s17860_s1 + $0x1ba0] sm:$0xff]  }
 0x34c   :  { %13332 = vmatpush3.bf16.msra.mxu0 %v14419_v4  ;;  %v14461_v13 = vld [vmem:[%s17860_s1 + $0x1b50] sm:$0xff]  }
 0x34d   :  { %13333 = vmatprep.subr.bf16.mxu0 %v14421_v10  ;;  %v14458_v10 = vld [vmem:[%s17860_s1 + $0x1bd8] sm:$0xff]  }
 0x34e   :  { %13354 = vmatpush3.bf16.msra.mxu1 %v14420_v7  ;;  %v14455_v7 = vld [vmem:[%s17860_s1 + $0x1b20] sm:$0xff]  }
 0x34f   :  { %13355 = vmatprep.subr.bf16.mxu1 %v14422_v12  ;;  %v14460_v12 = vld [vmem:[%s17860_s1 + $0x1b98] sm:$0xff]  }
 0x350   :  { %13334 = vmatpush3.bf16.msra.mxu0 %v14423_v14  ;;  %v14462_v14 = vld [vmem:[%s17860_s1 + $0x1bd0] sm:$0xff]  }
 0x351   :  { %13335 = vmatprep.subr.bf16.mxu0 %v14425_v16  ;;  %v14464_v16 = vld [vmem:[%s17860_s1 + $0x1b90] sm:$0xff]  }
 0x352   :  { %13356 = vmatpush3.bf16.msra.mxu1 %v14424_v15  ;;  %v14463_v15 = vld [vmem:[%s17860_s1 + $0x1b10] sm:$0xff]  }
 0x353   :  { %13357 = vmatprep.subr.bf16.mxu1 %v14426_v17  ;;  %v14465_v17 = vld [vmem:[%s17860_s1 + $0x1b48] sm:$0xff]  }
 0x354   :  { %13336 = vmatpush3.bf16.msra.mxu0 %v14427_v18  ;;  %v14466_v18 = vld [vmem:[%s17860_s1 + $0x1bc8] sm:$0xff]  }
 0x355   :  { %13337 = vmatprep.subr.bf16.mxu0 %v14429_v20  ;;  %v14468_v20 = vld [vmem:[%s17860_s1 + $0x1b88] sm:$0xff]  }
 0x356   :  { %13358 = vmatpush3.bf16.msra.mxu1 %v14428_v19  ;;  %v14467_v19 = vld [vmem:[%s17860_s1 + $0x1b08] sm:$0xff]  }
 0x357   :  { %13359 = vmatprep.subr.bf16.mxu1 %v14430_v21  ;;  %v14469_v21 = vld [vmem:[%s17860_s1 + $0x1b40] sm:$0xff]  }
 0x358   :  { %13338 = vmatpush3.bf16.msra.mxu0 %v14431_v22  ;;  %v14470_v22 = vld [vmem:[%s17860_s1 + $0x1bc0] sm:$0xff]  }
 0x359   :  { %13339 = vmatprep.subr.bf16.mxu0 %v14433_v24  ;;  %v14472_v24 = vld [vmem:[%s17860_s1 + $0x1b80] sm:$0xff]  }
 0x35a   :  { %13360 = vmatpush3.bf16.msra.mxu1 %v14432_v23  ;;  %v14471_v23 = vld [vmem:[%s17860_s1 + $0x1b00] sm:$0xff]  }
 0x35b   :  { %13361 = vmatprep.subr.bf16.mxu1 %v14434_v25  ;;  %v2654_v25 = vrot.slane %v17458_v36, %v14720_v41 }
 0x35c   :  { %13340 = vmatpush3.bf16.msra.mxu0 %v14435_v26  ;;  %v14474_v26 = vld [vmem:[%s17860_s1 + $0x1c78] sm:$0xff]  }
 0x35d   :  { %13341 = vmatprep.subr.bf16.mxu0 %v14437_v28  ;;  %v14476_v28 = vld [vmem:[%s17860_s1 + $0x1c38] sm:$0xff]  }
 0x35e   :  { %13362 = vmatpush3.bf16.msra.mxu1 %v14436_v27  ;;  %v14475_v27 = vld [vmem:[%s17860_s1 + $0x1cf8] sm:$0xff]  }
 0x35f   :  { %13363 = vmatprep.subr.bf16.mxu1 %v14438_v30  ;;  %v2670_v30 = vcombine.high %v2654_v25, %v2654_v25 }
 0x360   :  { %13342 = vmatpush3.bf16.msra.mxu0 %v14439_v33 }
 0x361   :  { %13371 = vmatprep.subr.bf16.mxu0 %v14441_v38  ;;  %v14482_v38 = vld [vmem:[%s17860_s1 + $0x1c68] sm:$0xff]  }
 0x362   :  { %13364 = vmatpush3.bf16.msra.mxu1 %v14440_v34  ;;  %v14480_v34 = vld [vmem:[%s17860_s1 + $0x1c30] sm:$0xff]  }
 0x363   :  { %v13079_v51 = vpop.f32.mrf.mxu0  ;;  %10715 = vmatmul.mubr.bf16.vlgmr.msra.gmra.mxu0 %v2647_v37  ;;  %13393 = vmatprep.subr.bf16.mxu1 %v14442_v40  ;;  %v14483_v40 = vld [vmem:[%s17860_s1 + $0x1ce8] sm:$0xff]  }
 0x364   :  { %13372 = vmatpush3.bf16.msra.mxu0 %v14443_v43  ;;  %10794 = vmatprep.mubr.bf16.mxu0 %v2668_v46 }
 0x365   :  { %v13101_v54 = vpop.f32.mrf.mxu1  ;;  %10755 = vmatmul.mubr.bf16.vlgmr.msra.gmra.mxu1 %v2669_v47  ;;  %v13080_v55 = vpop.f32.mrf.mxu0  ;;  %13373 = vmatprep.subr.bf16.mxu0 %v14445_v48  ;;  %v14485_v47 = vld [vmem:[%s17860_s1 + $0x1ca8] sm:$0xff]  }
 0x366   :  { %13394 = vmatpush3.bf16.msra.mxu1 %v14444_v45  ;;  %v13081_v57 = vadd.f32 %v13080_v55, %v13079_v51  ;;  %10834 = vmatprep.mubr.bf16.mxu1 %v2672_v50  ;;  %v14486_v50 = vld [vmem:[%s17860_s1 + $0x1c60] sm:$0xff]  }
 0x367   :  { %v13102_v59 = vpop.f32.mrf.mxu1  ;;  %v13082_v60 = vpop.f32.mrf.mxu0  ;;  %13395 = vmatprep.subr.bf16.mxu1 %v14446_v49  ;;  %v14489_v55 = vld [vmem:[%s17860_s1 + $0x1ca0] sm:$0xff]  }
 0x368   :  { %v10237_v62 = vadd.f32 %v13081_v57, %v17394_v11  ;;  %v13103_v63 = vadd.f32 %v13102_v59, %v13101_v54  ;;  %13374 = vmatpush3.bf16.msra.mxu0 %v14447_v52  ;;  %v14459_v11 = vld [vmem:[%s17860_s1 + $0x1b18] sm:$0xff]   ;;  %v14487_v52 = vld [vmem:[%s17860_s1 + $0x1ce0] sm:$0xff]   ;;  %v14494_v60 = vld [vmem:[%s17860_s1 + $0x1c50] sm:$0xff]  }
 0x369   :  { %v13104_v1 = vpop.f32.mrf.mxu1  ;;  %v13083_v2 = vpop.f32.mrf.mxu0  ;;  %13375 = vmatprep.subr.bf16.mxu0 %v14449_v56  ;;  %v14488_v54 = vld [vmem:[%s17860_s1 + $0x1c20] sm:$0xff]   ;;  %v14490_v56 = vld [vmem:[%s17860_s1 + $0x1c58] sm:$0xff]  }
 0x36a   :  { %v17505_v4 = vadd.f32 %v13103_v63, %v10237_v62  ;;  %13396 = vmatpush3.bf16.msra.mxu1 %v14448_v53  ;;  %v14491_v57 = vld [vmem:[%s17860_s1 + $0x1cd8] sm:$0xff]   ;;  %v14496_v62 = vld [vmem:[%s17860_s1 + $0x1c10] sm:$0xff]   ;;  %v14499_v1 = vld [vmem:[%s17860_s1 + $0x1cc8] sm:$0xff]  }
 0x36b   :  { %v13105_v6 = vpop.f32.mrf.mxu1  ;;  %13397 = vmatprep.subr.bf16.mxu1 %v14450_v58  ;;  %v14492_v58 = vld [vmem:[%s17860_s1 + $0x1c18] sm:$0xff]   ;;  %v14497_v63 = vld [vmem:[%s17860_s1 + $0x1c90] sm:$0xff]   ;;  %v14500_v2 = vld [vmem:[%s17860_s1 + $0x1c08] sm:$0xff]  }
 0x36c   :  { %13376 = vmatpush3.bf16.msra.mxu0 %v14451_v61  ;;  %v14493_v59 = vld [vmem:[%s17860_s1 + $0x1c98] sm:$0xff]   ;;  %v14495_v61 = vld [vmem:[%s17860_s1 + $0x1cd0] sm:$0xff]   ;;  %v14503_v6 = vld [vmem:[%s17860_s1 + $0x1cc0] sm:$0xff]  }
 0x36d   :  { %13377 = vmatprep.subr.bf16.mxu0 %v14453_v3  ;;  %v14501_v3 = vld [vmem:[%s17860_s1 + $0x1c88] sm:$0xff]  }
 0x36e   :  { %13398 = vmatpush3.bf16.msra.mxu1 %v14452_v0  ;;  %v14498_v0 = vld [vmem:[%s17860_s1 + $0x1c48] sm:$0xff]  }
 0x36f   :  { %13399 = vmatprep.subr.bf16.mxu1 %v14454_v5  ;;  %v44_v5 = vld [vmem:[%s17859_s0 + $0x70] sm:$0xff] }
 0x370   :  { %13378 = vmatpush3.bf16.msra.mxu0 %v14455_v7  ;;  %v2680_v7 = vrot.slane %v44_v5, %v14720_v41 }
 0x371   :  { %13379 = vmatprep.subr.bf16.mxu0 %v14457_v9  ;;  %v14504_v9 = vld [vmem:[%s17860_s1 + $0x1c00] sm:$0xff]  }
 0x372   :  { %13400 = vmatpush3.bf16.msra.mxu1 %v14456_v8  ;;  %v2673_v8 = vcombine.high %v44_v5, %v44_v5 }
 0x373   :  { %13401 = vmatprep.subr.bf16.mxu1 %v14458_v10  ;;  %v2688_v10 = vcombine.high %v2680_v7, %v2680_v7 }
 0x374   :  { %13380 = vmatpush3.bf16.msra.mxu0 %v14459_v11  ;;  %v2696_v11 = vrot.slane %v2680_v7, %v14720_v41 }
 0x375   :  { %13381 = vmatprep.subr.bf16.mxu0 %v14461_v13  ;;  %v17671_v13 = vrot.slane %v2673_v8, %v14720_v41 }
 0x376   :  { %13402 = vmatpush3.bf16.msra.mxu1 %v14460_v12  ;;  %v14506_v12 = vld [vmem:[%s17860_s1 + $0x1d78] sm:$0xff]  }
 0x377   :  { %13403 = vmatprep.subr.bf16.mxu1 %v14462_v14  ;;  %v14505_v14 = vld [vmem:[%s17860_s1 + $0x1c80] sm:$0xff]  }
 0x378   :  { %13382 = vmatpush3.bf16.msra.mxu0 %v14463_v15  ;;  %v2710_v15 = vrot.slane %v2688_v10, %v14720_v41 }
 0x379   :  { %13383 = vmatprep.subr.bf16.mxu0 %v14465_v17  ;;  %v2689_v17 = vcombine.high %v17671_v13, %v17671_v13 }
 0x37a   :  { %13404 = vmatpush3.bf16.msra.mxu1 %v14464_v16  ;;  %v14507_v16 = vld [vmem:[%s17860_s1 + $0x1df8] sm:$0xff]  }
 0x37b   :  { %13405 = vmatprep.subr.bf16.mxu1 %v14466_v18  ;;  %v14508_v18 = vld [vmem:[%s17860_s1 + $0x1d38] sm:$0xff]  }
 0x37c   :  { %13384 = vmatpush3.bf16.msra.mxu0 %v14467_v19  ;;  %v2720_v19 = vcombine.high %v2710_v15, %v2710_v15 }
 0x37d   :  { %13385 = vmatprep.subr.bf16.mxu0 %v14469_v21  ;;  %v14510_v21 = vld [vmem:[%s17860_s1 + $0x1d70] sm:$0xff]  }
 0x37e   :  { %13406 = vmatpush3.bf16.msra.mxu1 %v14468_v20  ;;  %v2718_v20 = vcombine.high %v2696_v11, %v2696_v11 }
 0x37f   :  { %13407 = vmatprep.subr.bf16.mxu1 %v14470_v22  ;;  %v2717_v22 = vrot.slane %v2689_v17, %v14720_v41 }
 0x380   :  { %13386 = vmatpush3.bf16.msra.mxu0 %v14471_v23  ;;  %v14509_v23 = vld [vmem:[%s17860_s1 + $0x1db8] sm:$0xff]  }
 0x381   :  { %13415 = vmatprep.subr.bf16.mxu0 %v14474_v26  ;;  %v2721_v26 = vcombine.high %v2717_v22, %v2717_v22 }
 0x382   :  { %13408 = vmatpush3.bf16.msra.mxu1 %v14472_v24 }
 0x383   :  { %v13123_v33 = vpop.f32.mrf.mxu0  ;;  %10795 = vmatmul.mubr.bf16.vlgmr.msra.gmra.mxu0 %v2654_v25  ;;  %13437 = vmatprep.subr.bf16.mxu1 %v14475_v27  ;;  %v14511_v25 = vld [vmem:[%s17860_s1 + $0x1df0] sm:$0xff]  }
 0x384   :  { %13416 = vmatpush3.bf16.msra.mxu0 %v14476_v28  ;;  %10874 = vmatprep.mubr.bf16.mxu0 %v2710_v15  ;;  %v14512_v27 = vld [vmem:[%s17860_s1 + $0x1d30] sm:$0xff]  }
 0x385   :  { %v13145_v36 = vpop.f32.mrf.mxu1  ;;  %10835 = vmatmul.mubr.bf16.vlgmr.msra.gmra.mxu1 %v2670_v30  ;;  %v13124_v37 = vpop.f32.mrf.mxu0  ;;  %13417 = vmatprep.subr.bf16.mxu0 %v14478_v31  ;;  %v14514_v30 = vld [vmem:[%s17860_s1 + $0x1d68] sm:$0xff]  }
 0x386   :  { %13438 = vmatpush3.bf16.msra.mxu1 %v14477_v29  ;;  %v13125_v39 = vadd.f32 %v13124_v37, %v13123_v33  ;;  %10914 = vmatprep.mubr.bf16.mxu1 %v2720_v19 }
 0x387   :  { %v13146_v42 = vpop.f32.mrf.mxu1  ;;  %v13126_v43 = vpop.f32.mrf.mxu0  ;;  %13439 = vmatprep.subr.bf16.mxu1 %v14479_v32  ;;  %v14513_v32 = vld [vmem:[%s17860_s1 + $0x1db0] sm:$0xff]  }
 0x388   :  { %v10317_v45 = vadd.f32 %v13125_v39, %v17505_v4  ;;  %v13147_v46 = vadd.f32 %v13146_v42, %v13145_v36  ;;  %13418 = vmatpush3.bf16.msra.mxu0 %v14480_v34  ;;  %v14502_v4 = vld [vmem:[%s17860_s1 + $0x1c40] sm:$0xff]  }
 0x389   :  { %v13148_v48 = vpop.f32.mrf.mxu1  ;;  %v13127_v49 = vpop.f32.mrf.mxu0  ;;  %13419 = vmatprep.subr.bf16.mxu0 %v14482_v38  ;;  %v14516_v38 = vld [vmem:[%s17860_s1 + $0x1d28] sm:$0xff]   ;;  %v14518_v42 = vld [vmem:[%s17860_s1 + $0x1d60] sm:$0xff]  }
 0x38a   :  { %v17606_v51 = vadd.f32 %v13147_v46, %v10317_v45  ;;  %13440 = vmatpush3.bf16.msra.mxu1 %v14481_v35  ;;  %v14515_v35 = vld [vmem:[%s17860_s1 + $0x1de8] sm:$0xff]   ;;  %v14519_v46 = vld [vmem:[%s17860_s1 + $0x1de0] sm:$0xff]   ;;  %v14522_v48 = vld [vmem:[%s17860_s1 + $0x1d58] sm:$0xff]  }
 0x38b   :  { %v13149_v53 = vpop.f32.mrf.mxu1  ;;  %13441 = vmatprep.subr.bf16.mxu1 %v14483_v40  ;;  %v14521_v49 = vld [vmem:[%s17860_s1 + $0x1da0] sm:$0xff]  }
 0x38c   :  { %13420 = vmatpush3.bf16.msra.mxu0 %v14484_v44  ;;  %v14517_v44 = vld [vmem:[%s17860_s1 + $0x1da8] sm:$0xff]   ;;  %v14525_v53 = vld [vmem:[%s17860_s1 + $0x1d98] sm:$0xff]  }
 0x38d   :  { %13421 = vmatprep.subr.bf16.mxu0 %v14486_v50  ;;  %v14523_v50 = vld [vmem:[%s17860_s1 + $0x1dd8] sm:$0xff]  }
 0x38e   :  { %13442 = vmatpush3.bf16.msra.mxu1 %v14485_v47  ;;  %v14520_v47 = vld [vmem:[%s17860_s1 + $0x1d20] sm:$0xff]  }
 0x38f   :  { %13443 = vmatprep.subr.bf16.mxu1 %v14487_v52  ;;  %v14526_v52 = vld [vmem:[%s17860_s1 + $0x1d50] sm:$0xff]  }
 0x390   :  { %13422 = vmatpush3.bf16.msra.mxu0 %v14488_v54  ;;  %v14527_v54 = vld [vmem:[%s17860_s1 + $0x1dd0] sm:$0xff]  }
 0x391   :  { %13423 = vmatprep.subr.bf16.mxu0 %v14490_v56  ;;  %v14530_v56 = vld [vmem:[%s17860_s1 + $0x1d48] sm:$0xff]  }
 0x392   :  { %13444 = vmatpush3.bf16.msra.mxu1 %v14489_v55  ;;  %v14528_v55 = vld [vmem:[%s17860_s1 + $0x1d10] sm:$0xff]  }
 0x393   :  { %13445 = vmatprep.subr.bf16.mxu1 %v14491_v57  ;;  %v14529_v57 = vld [vmem:[%s17860_s1 + $0x1d90] sm:$0xff]  }
 0x394   :  { %13424 = vmatpush3.bf16.msra.mxu0 %v14492_v58  ;;  %v14531_v58 = vld [vmem:[%s17860_s1 + $0x1dc8] sm:$0xff]  }
 0x395   :  { %13425 = vmatprep.subr.bf16.mxu0 %v14494_v60  ;;  %v14534_v60 = vld [vmem:[%s17860_s1 + $0x1d40] sm:$0xff]  }
 0x396   :  { %13446 = vmatpush3.bf16.msra.mxu1 %v14493_v59  ;;  %v14532_v59 = vld [vmem:[%s17860_s1 + $0x1d08] sm:$0xff]  }
 0x397   :  { %13447 = vmatprep.subr.bf16.mxu1 %v14495_v61  ;;  %v14533_v61 = vld [vmem:[%s17860_s1 + $0x1d88] sm:$0xff]  }
 0x398   :  { %13426 = vmatpush3.bf16.msra.mxu0 %v14496_v62 }
 0x399   :  { %13427 = vmatprep.subr.bf16.mxu0 %v14498_v0 }
 0x39a   :  { %13448 = vmatpush3.bf16.msra.mxu1 %v14497_v63 }
 0x39b   :  { %13449 = vmatprep.subr.bf16.mxu1 %v14499_v1 }
 0x39c   :  { %13428 = vmatpush3.bf16.msra.mxu0 %v14500_v2 }
 0x39d   :  { %13429 = vmatprep.subr.bf16.mxu0 %v14502_v4 }
 0x39e   :  { %13450 = vmatpush3.bf16.msra.mxu1 %v14501_v3 }
 0x39f   :  { %13451 = vmatprep.subr.bf16.mxu1 %v14503_v6 }
 0x3a0   :  { %13430 = vmatpush3.bf16.msra.mxu0 %v14504_v9 }
 0x3a1   :  { %13459 = vmatprep.subr.bf16.mxu0 %v14506_v12 }
 0x3a2   :  { %13452 = vmatpush3.bf16.msra.mxu1 %v14505_v14 }
 0x3a3   :  { %v13167_v24 = vpop.f32.mrf.mxu0  ;;  %10875 = vmatmul.mubr.bf16.vlgmr.msra.gmra.mxu0 %v2696_v11  ;;  %13481 = vmatprep.subr.bf16.mxu1 %v14507_v16 }
 0x3a4   :  { %13460 = vmatpush3.bf16.msra.mxu0 %v14508_v18  ;;  %10954 = vmatprep.mubr.bf16.mxu0 %v2717_v22 }
 0x3a5   :  { %v13189_v28 = vpop.f32.mrf.mxu1  ;;  %10915 = vmatmul.mubr.bf16.vlgmr.msra.gmra.mxu1 %v2718_v20  ;;  %v13168_v29 = vpop.f32.mrf.mxu0  ;;  %13461 = vmatprep.subr.bf16.mxu0 %v14510_v21 }
 0x3a6   :  { %13482 = vmatpush3.bf16.msra.mxu1 %v14509_v23  ;;  %v13169_v31 = vadd.f32 %v13168_v29, %v13167_v24  ;;  %10994 = vmatprep.mubr.bf16.mxu1 %v2721_v26 }
 0x3a7   :  { %v13190_v33 = vpop.f32.mrf.mxu1  ;;  %v13170_v34 = vpop.f32.mrf.mxu0  ;;  %13483 = vmatprep.subr.bf16.mxu1 %v14511_v25 }
 0x3a8   :  { %v10397_v36 = vadd.f32 %v13169_v31, %v17606_v51  ;;  %v13191_v37 = vadd.f32 %v13190_v33, %v13189_v28  ;;  %13462 = vmatpush3.bf16.msra.mxu0 %v14512_v27  ;;  %v14524_v51 = vld [vmem:[%s17860_s1 + $0x1d18] sm:$0xff]  }
 0x3a9   :  { %v13192_v39 = vpop.f32.mrf.mxu1  ;;  %v13171_v40 = vpop.f32.mrf.mxu0  ;;  %13463 = vmatprep.subr.bf16.mxu0 %v14514_v30 }
 0x3aa   :  { %v10437_v43 = vadd.f32 %v13191_v37, %v10397_v36  ;;  %13484 = vmatpush3.bf16.msra.mxu1 %v14513_v32 }
 0x3ab   :  { %v13193_v45 = vpop.f32.mrf.mxu1  ;;  %13485 = vmatprep.subr.bf16.mxu1 %v14515_v35 }
 0x3ac   :  { %13464 = vmatpush3.bf16.msra.mxu0 %v14516_v38 }
 0x3ad   :  { %13465 = vmatprep.subr.bf16.mxu0 %v14518_v42 }
 0x3ae   :  { %13486 = vmatpush3.bf16.msra.mxu1 %v14517_v44 }
 0x3af   :  { %13487 = vmatprep.subr.bf16.mxu1 %v14519_v46 }
 0x3b0   :  { %13466 = vmatpush3.bf16.msra.mxu0 %v14520_v47 }
 0x3b1   :  { %13467 = vmatprep.subr.bf16.mxu0 %v14522_v48 }
 0x3b2   :  { %13488 = vmatpush3.bf16.msra.mxu1 %v14521_v49 }
 0x3b3   :  { %13489 = vmatprep.subr.bf16.mxu1 %v14523_v50 }
 0x3b4   :  { %13468 = vmatpush3.bf16.msra.mxu0 %v14524_v51 }
 0x3b5   :  { %13469 = vmatprep.subr.bf16.mxu0 %v14526_v52 }
 0x3b6   :  { %13490 = vmatpush3.bf16.msra.mxu1 %v14525_v53 }
 0x3b7   :  { %13491 = vmatprep.subr.bf16.mxu1 %v14527_v54 }
 0x3b8   :  { %13470 = vmatpush3.bf16.msra.mxu0 %v14528_v55 }
 0x3b9   :  { %13471 = vmatprep.subr.bf16.mxu0 %v14530_v56 }
 0x3ba   :  { %13492 = vmatpush3.bf16.msra.mxu1 %v14529_v57 }
 0x3bb   :  { %14 = vsyncpa [#allocation3], 0  ;;  %13493 = vmatprep.subr.bf16.mxu1 %v14531_v58  ;;  %v14535_v62 = vld [vmem:[%s17860_s1 + $0x1dc0] sm:$0xff]   ;;  %v2703_v0 = vrot.slane %v17671_v13, %v14720_v41  ;;  %v11010_v26 = vld [vmem:[%s17862_s3 + $0x38] sm:$0xff]  ;;  %v14566_v27 = vmov 0.0   ;;  %vm14567_vm0 = vmmov 0  }
 0x3bc   :  { %13472 = vmatpush3.bf16.msra.mxu0 %v14532_v59  ;;  %v14536_v63 = vld [vmem:[%s17860_s1 + $0x1d00] sm:$0xff]   ;;  %v11009_v28 = vld [vmem:[%s17862_s3 + $0x30] sm:$0xff]  ;;  %v11008_v30 = vld [vmem:[%s17862_s3 + $0x28] sm:$0xff]  ;;  %vm11018_vm1 = vcmask 523264   ;;  %vm11181_vm2 = vcmask 41984   ;;  %vm11198_vm3 = vcmask 1024  }
 0x3bd   :  { %13473 = vmatprep.subr.bf16.mxu0 %v14534_v60  ;;  %v14537_v1 = vld [vmem:[%s17860_s1 + $0x1d80] sm:$0xff]   ;;  %v2719_v2 = vcombine.high %v2703_v0, %v2703_v0  ;;  %v11006_v39 = vld [vmem:[%s17862_s3 + $0x18] sm:$0xff]  ;;  %v11005_v44 = vld [vmem:[%s17862_s3 + $0x10] sm:$0xff] }
 0x3be   :  { %13494 = vmatpush3.bf16.msra.mxu1 %v14533_v61  ;;  %v11007_v34 = vld [vmem:[%s17862_s3 + $0x20] sm:$0xff]  ;;  %v11004_v46 = vld [vmem:[%s17862_s3 + $0x8] sm:$0xff]  ;;  %v11100_v48 = vld [vmem:[%s17864_s5 + $0x38] sm:$0xff] }
 0x3bf   :  { %13495 = vmatprep.subr.bf16.mxu1 %v14535_v62  ;;  %v11003_v47 = vld [vmem:[%s17862_s3] sm:$0xff]  ;;  %v11099_v49 = vld [vmem:[%s17864_s5 + $0x30] sm:$0xff]  ;;  %v11098_v50 = vld [vmem:[%s17864_s5 + $0x28] sm:$0xff] }
 0x3c0   :  { %13474 = vmatpush3.bf16.msra.mxu0 %v14536_v63  ;;  %v11097_v51 = vld [vmem:[%s17864_s5 + $0x20] sm:$0xff]  ;;  %v11096_v52 = vld [vmem:[%s17864_s5 + $0x18] sm:$0xff] }
 0x3c1   :  { %13521 = vmatprep.subr.mxu0 %v14566_v27 }
 0x3c2   :  { %13496 = vmatpush3.bf16.msra.mxu1 %v14537_v1 }
 0x3c3   :  { %v13211_v3 = vpop.f32.mrf.mxu0  ;;  %10955 = vmatmul.mubr.bf16.vlgmr.msra.gmra.mxu0 %v2703_v0  ;;  %13540 = vmatprep.subr.mxu1 %v14566_v27 }
 0x3c4   :  { %13522 = vmatpush3.msra.mxu0 %v11010_v26  ;;  %13537 = vmatprep.mubr.msk.f32.mxu0 %vm14567_vm0, %v14566_v27 }
 0x3c5   :  { %v13233_v4 = vpop.f32.mrf.mxu1  ;;  %10995 = vmatmul.mubr.bf16.vlgmr.msra.gmra.mxu1 %v2719_v2  ;;  %v13212_v5 = vpop.f32.mrf.mxu0  ;;  %13523 = vmatprep.subr.mxu0 %v14566_v27 }
 0x3c6   :  { %v13213_v6 = vadd.f32 %v13212_v5, %v13211_v3  ;;  %13524 = vmatpush3.msra.mxu0 %v11009_v28  ;;  %13556 = vmatprep.mubr.msk.f32.mxu1 %vm14567_vm0, %v14566_v27 }
 0x3c7   :  { %v13234_v7 = vpop.f32.mrf.mxu1  ;;  %v13214_v8 = vpop.f32.mrf.mxu0  ;;  %13525 = vmatprep.subr.mxu0 %v14566_v27  ;;  %13541 = vmatpush3.msra.mxu1 %v11100_v48 }
 0x3c8   :  { %v10477_v9 = vadd.f32 %v13213_v6, %v10437_v43  ;;  %v13235_v10 = vadd.f32 %v13234_v7, %v13233_v4  ;;  %13526 = vmatpush3.msra.mxu0 %v11008_v30  ;;  %13542 = vmatprep.subr.mxu1 %v14566_v27 }
 0x3c9   :  { %v13236_v41 = vpop.f32.mrf.mxu1  ;;  %v13215_v11 = vpop.f32.mrf.mxu0  ;;  %13527 = vmatprep.subr.mxu0 %v14566_v27  ;;  %13543 = vmatpush3.msra.mxu1 %v11099_v49 }
 0x3ca   :  { %v10517_v12 = vadd.f32 %v13235_v10, %v10477_v9  ;;  %13528 = vmatpush3.msra.mxu0 %v11007_v34  ;;  %13544 = vmatprep.subr.mxu1 %v14566_v27 }
 0x3cb   :  { %v13237_v13 = vpop.f32.mrf.mxu1  ;;  %13529 = vmatprep.subr.mxu0 %v14566_v27  ;;  %13545 = vmatpush3.msra.mxu1 %v11098_v50 }
 0x3cc   :  { %13530 = vmatpush3.msra.mxu0 %v11006_v39  ;;  %13546 = vmatprep.subr.mxu1 %v14566_v27  ;;  %v11094_v39 = vld [vmem:[%s17864_s5 + $0x8] sm:$0xff] }
 0x3cd   :  { %13531 = vmatprep.subr.mxu0 %v14566_v27  ;;  %13547 = vmatpush3.msra.mxu1 %v11097_v51 }
 0x3ce   :  { %13532 = vmatpush3.msra.mxu0 %v11005_v44  ;;  %13548 = vmatprep.subr.mxu1 %v14566_v27 }
 0x3cf   :  { %13533 = vmatprep.subr.mxu0 %v14566_v27  ;;  %13549 = vmatpush3.msra.mxu1 %v11096_v52 }
 0x3d0   :  { %13534 = vmatpush3.msra.mxu0 %v11004_v46  ;;  %13550 = vmatprep.subr.mxu1 %v14566_v27 }
 0x3d1   :  { %13535 = vmatprep.subr.mxu0 %v14566_v27 }
 0x3d2   :  { %13536 = vmatpush3.msra.mxu0 %v11003_v47  ;;  %v12181_v47 = vld [vmem:[%s17865_s6] ss:$0 sm:$0xff]  ;;  %s14569_s6 = smov [#allocation2]  }
 0x3d3   :  { %s11206_s28 = sshll.u32 %s14569_s6, 4  ;;  %s11207_s28 = int_to_ptr.vmem [resolvable:$true] %s11206_s28 }
 0x3d4   :  { %s14543_s29 = scalar_lea.vmem %s11207_s28, 32  ;;  %p14548_p1 = scmp.lt.s32.totalorder %s11207_s28, %s11207_s28 }
 0x3d5   :  { %p14544_p0 = scmp.ne.s32.totalorder %s11207_s28, %s14543_s29  ;;  %p14549_p2 = scmp.lt.s32.totalorder %s14543_s29, %s14543_s29 }
 0x3d7   :  { %p14550_p3 = por %p14549_p2, %p14548_p1 }
 0x3d9   :  { %p14551_p4 = pnand %p14550_p3, %p14544_p0 }
 0x3e3   :  { %v13255_v14 = vpop.f32.mrf.mxu0 }
 0x3e5   :  { %v13277_v15 = vpop.f32.mrf.mxu1  ;;  %v13256_v16 = vpop.f32.mrf.mxu0 }
 0x3e6   :  { %v13257_v17 = vadd.f32 %v13256_v16, %v13255_v14 }
 0x3e7   :  { %v13278_v18 = vpop.f32.mrf.mxu1  ;;  %v13258_v19 = vpop.f32.mrf.mxu0 }
 0x3e8   :  { %v10557_v20 = vadd.f32 %v13257_v17, %v10517_v12  ;;  %v13279_v21 = vadd.f32 %v13278_v18, %v13277_v15 }
 0x3e9   :  { %v13280_v22 = vpop.f32.mrf.mxu1  ;;  %v13259_v23 = vpop.f32.mrf.mxu0 }
 0x3ea   :  { %v10597_v24 = vadd.f32 %v13279_v21, %v10557_v20 }
 0x3eb   :  { %v13281_v25 = vpop.f32.mrf.mxu1 }
 0x403   :  { %v13299_v29 = vpop.f32.mrf.mxu0 }
 0x405   :  { %v13321_v31 = vpop.f32.mrf.mxu1  ;;  %v13300_v32 = vpop.f32.mrf.mxu0 }
 0x406   :  { %v13301_v33 = vadd.f32 %v13300_v32, %v13299_v29 }
 0x407   :  { %v13322_v35 = vpop.f32.mrf.mxu1  ;;  %v13302_v36 = vpop.f32.mrf.mxu0 }
 0x408   :  { %v10637_v37 = vadd.f32 %v13301_v33, %v10597_v24  ;;  %v13323_v38 = vadd.f32 %v13322_v35, %v13321_v31 }
 0x409   :  { %v13324_v40 = vpop.f32.mrf.mxu1  ;;  %v13303_v42 = vpop.f32.mrf.mxu0 }
 0x40a   :  { %v10677_v43 = vadd.f32 %v13323_v38, %v10637_v37  ;;  %v11095_v38 = vld [vmem:[%s17864_s5 + $0x10] sm:$0xff]  ;;  %v11093_v40 = vld [vmem:[%s17864_s5] sm:$0xff]  ;;  %s14568_s5 = smov 122  }
 0x40b   :  { %v13325_v45 = vpop.f32.mrf.mxu1  ;;  %13551 = vmatpush3.msra.mxu1 %v11095_v38  ;;  %v12179_v42 = vld [vmem:[%s17863_s4] ss:$0 sm:$0xff] }
 0x40c   :  { %13552 = vmatprep.subr.mxu1 %v14566_v27 }
 0x40d   :  { %13553 = vmatpush3.msra.mxu1 %v11094_v39 }
 0x40e   :  { %13554 = vmatprep.subr.mxu1 %v14566_v27 }
 0x40f   :  { %13555 = vmatpush3.msra.mxu1 %v11093_v40 }
 0x423   :  { %v13343_v53 = vpop.f32.mrf.mxu0 }
 0x425   :  { %v13365_v54 = vpop.f32.mrf.mxu1  ;;  %v13344_v55 = vpop.f32.mrf.mxu0 }
 0x426   :  { %v13345_v56 = vadd.f32 %v13344_v55, %v13343_v53 }
 0x427   :  { %v13366_v57 = vpop.f32.mrf.mxu1  ;;  %v13346_v58 = vpop.f32.mrf.mxu0 }
 0x428   :  { %v10717_v59 = vadd.f32 %v13345_v56, %v10677_v43  ;;  %v13367_v60 = vadd.f32 %v13366_v57, %v13365_v54 }
 0x429   :  { %v13368_v61 = vpop.f32.mrf.mxu1  ;;  %v13347_v62 = vpop.f32.mrf.mxu0 }
 0x42a   :  { %v10757_v63 = vadd.f32 %v13367_v60, %v10717_v59 }
 0x42b   :  { %v13369_v0 = vpop.f32.mrf.mxu1 }
 0x443   :  { %v13387_v1 = vpop.f32.mrf.mxu0 }
 0x445   :  { %v13409_v2 = vpop.f32.mrf.mxu1  ;;  %v13388_v3 = vpop.f32.mrf.mxu0 }
 0x446   :  { %v13389_v16 = vadd.f32 %v13388_v3, %v13387_v1 }
 0x447   :  { %v13410_v4 = vpop.f32.mrf.mxu1  ;;  %v13390_v5 = vpop.f32.mrf.mxu0 }
 0x448   :  { %v10797_v17 = vadd.f32 %v13389_v16, %v10757_v63  ;;  %v13411_v18 = vadd.f32 %v13410_v4, %v13409_v2 }
 0x449   :  { %v13412_v6 = vpop.f32.mrf.mxu1  ;;  %v13391_v7 = vpop.f32.mrf.mxu0 }
 0x44a   :  { %v10837_v20 = vadd.f32 %v13411_v18, %v10797_v17 }
 0x44b   :  { %v13413_v8 = vpop.f32.mrf.mxu1 }
 0x463   :  { %v13431_v9 = vpop.f32.mrf.mxu0 }
 0x465   :  { %v13453_v10 = vpop.f32.mrf.mxu1  ;;  %v13432_v41 = vpop.f32.mrf.mxu0 }
 0x466   :  { %v13433_v19 = vadd.f32 %v13432_v41, %v13431_v9 }
 0x467   :  { %v13454_v11 = vpop.f32.mrf.mxu1  ;;  %v13434_v12 = vpop.f32.mrf.mxu0 }
 0x468   :  { %v10877_v21 = vadd.f32 %v13433_v19, %v10837_v20  ;;  %v13455_v22 = vadd.f32 %v13454_v11, %v13453_v10 }
 0x469   :  { %v13456_v13 = vpop.f32.mrf.mxu1  ;;  %v13435_v14 = vpop.f32.mrf.mxu0 }
 0x46a   :  { %v10917_v26 = vadd.f32 %v13455_v22, %v10877_v21 }
 0x46b   :  { %v13457_v15 = vpop.f32.mrf.mxu1 }
 0x483   :  { %v13475_v23 = vpop.f32.mrf.mxu0 }
 0x485   :  { %v13497_v24 = vpop.f32.mrf.mxu1  ;;  %v13476_v25 = vpop.f32.mrf.mxu0 }
 0x486   :  { %v13477_v28 = vadd.f32 %v13476_v25, %v13475_v23 }
 0x487   :  { %v13498_v29 = vpop.f32.mrf.mxu1  ;;  %v13478_v30 = vpop.f32.mrf.mxu0 }
 0x488   :  { %v10957_v31 = vadd.f32 %v13477_v28, %v10917_v26  ;;  %v13499_v32 = vadd.f32 %v13498_v29, %v13497_v24 }
 0x489   :  { %v13500_v33 = vpop.f32.mrf.mxu1  ;;  %v13479_v34 = vpop.f32.mrf.mxu0 }
 0x48a   :  { %v10997_v35 = vadd.f32 %v13499_v32, %v10957_v31 }
 0x48b   :  { %v13501_v36 = vpop.f32.mrf.mxu1 }
 0x48c   :  { %v11002_v37 = vmax.f32 %v10997_v35, 0.0 }
 0x48e   :  { %13538 = vmatmul.mubr.msk.f32.vlgmr.msra.gmra.mxu0 %vm11018_vm1, %v11002_v37 }
 0x54e   :  { %v11088_v43 = vpop.f32.mrf.mxu0 }
 0x54f   :  { %v11089_v44 = vadd.f32 %v12179_v42, %v11088_v43 }
 0x550   :  { %v13539_v45 = vpop.f32.mrf.mxu0 }
 0x551   :  { %v11092_v46 = vmax.f32 %v11089_v44, 0.0 }
 0x553   :  { %13557 = vmatmul.mubr.msk.f32.vlgmr.msra.gmra.mxu1 %vm11018_vm1, %v11092_v46 }
 0x613   :  { %v11177_v48 = vpop.f32.mrf.mxu1 }
 0x614   :  { %v11178_v49 = vadd.f32 %v12181_v47, %v11177_v48 }
 0x615   :  { %v13558_v50 = vpop.f32.mrf.mxu1 }
 0x616   :  { %11195 = vrot.lane.b32.xlu1 %v11178_v49, %s14568_s5  ;;  %v11182_v27 = vsel %vm11181_vm2, %v11178_v49, -inf }
 0x617   :  { %11183 = vmax.xlane.f32.xlu0 %v11182_v27 }
 0x688   :  { %v11196_v51 = vpop.permute.xlu1 %11195 }
 0x689   :  { %11199 = vst.msk [vmem:[%s17867_s8] sm:$0x3] %vm11198_vm3, %v11196_v51 }
 0x6a0   :  { %v11184_v52 = vpop.xlane.xlu0 %11183 }
 0x6a1   :  { %v11185_v53 = vsub.f32 %v11178_v49, %v11184_v52 }
 0x6a3   :  { %v11186_v54 = vmul.f32 1.442695, %v11185_v53 }
 0x6a5   :  { %14539 = vpow2.f32 %v11186_v54 }
 0x6b2   :  { %v14540_v55 = vpop.eup %14539 }
 0x6b3   :  { %v11188_v56 = vsel %vm11181_vm2, %v14540_v55, 0.0 }
 0x6b4   :  { %11189 = vadd.xlane.f32.xlu0 %v11188_v56 }
 0x73d   :  { %v11190_v57 = vpop.xlane.xlu0 %11189 }
 0x73e   :  { %14541 = vrcp.f32 %v11190_v57 }
 0x74b   :  { %v14542_v58 = vpop.eup %14541 }
 0x74c   :  { %v11192_v59 = vmul.f32 %v14542_v58, %v14540_v55 }
 0x74e   :  { %11193 = vst.msk [vmem:[#allocation2] sm:$0x3] %vm11181_vm2, %v11192_v59 }
 0x74f   :  { %14554 = shalt.err (!%p14551_p4)
}
 0x750   :  { %11209 = dma.vmem_to_hbm [thread:$0]  %s11207_s28, 32, %s17866_s7, [#allocation3]  }
 0x751   :  { %14563 = dma.done.wait [#allocation3], 32  }
 0x752   :  { %14564 = vsyncadd [#allocation3], 4294967264 }
 0x753   :  { %11217 = vsyncpa [#allocation3], 1 }

</bundles_post_ra>
